<compile_context>
chip_gen: v6e
topology: v6e:2x2x1
jax: 0.10.0
libtpu: 0.0.40
codegen_flags: <defaults>
</compile_context>

<pallas_src>
import jax
import jax.numpy as jnp
from jax import lax
from jax.experimental import pallas as pl
from jax.experimental.pallas import tpu as pltpu

H = 16            # spatial height
W = 16            # spatial width
HW = H * W        # flattened spatial (lane dim, multiple of 128)
C_IN = 1          # input channels  (nn.Conv2d(1, 16, ...))
C_HID = 16        # hidden channels (conv1 output)
C_OUT = 1         # output channels (conv2 output)
K = 3             # kernel size
NTAP = K * K      # 9 taps
SUB = 8           # rows per fully-in-register sub-block (one sublane tile)
BATCH_BLOCK = 32  # max rows per grid step

# Flattened-lane offset of each tap (di, dj) = (ki - 1, kj - 1).
_TAP_OFFS = tuple((ki - 1) * W + (kj - 1) for ki in range(K) for kj in range(K))
_CENTER = NTAP // 2   # tap with offset 0


def unet_kernel(x_ref, mask_ref, w1_ref, b1_ref, w2_ref, b2_ref, o_ref):
    """Fused conv3x3(1->16) -> ReLU -> conv3x3(16->1), zero padding 1.

    x_ref    : (bb, HW)       f32 VMEM  flattened images (lane-dense)
    mask_ref : (9, SUB, HW)   f32 VMEM  0/1 border-validity mask per tap
    w1_ref   : (C_HID*9,)     f32 SMEM  w1[c*9+t] = conv1.weight[c, 0, ki, kj]
    b1_ref   : (C_HID,)       f32 SMEM  conv1.bias
    w2_ref   : (C_HID*9,)     f32 SMEM  w2[c*9+t] = conv2.weight[0, c, ki, kj]
    b2_ref   : (1,)           f32 SMEM  conv2.bias
    o_ref    : (bb, HW)       f32 VMEM  output (lane-dense)
    """
    bb = x_ref.shape[0]
    n_sub = bb // SUB
    b2 = b2_ref[0]

    def do_sub_block(base):
        x = x_ref[pl.ds(base, SUB), :]                        # (SUB, HW)

        # Hoisted shifted-input maps: 8 XLU rolls + 8 mask muls per sub-block.
        xs = []
        for t, off in enumerate(_TAP_OFFS):
            if off == 0:
                xs.append(x)
            else:
                xs.append(pltpu.roll(x, (-off) % HW, 1) * mask_ref[t])

        # Stream hidden channels: per-channel conv1 accumulator -> ReLU ->
        # scatter into 9 per-tap conv2 partial maps g[t].  The (SUB, C_HID, HW)
        # hidden tensor is never materialized.
        g = [None] * NTAP
        for c in range(C_HID):
            h = xs[0] * w1_ref[c * NTAP + 0]
            for t in range(1, NTAP):
                h = h + xs[t] * w1_ref[c * NTAP + t]
            h = jnp.maximum(h + b1_ref[c], 0.0)               # ReLU'd channel c
            for t in range(NTAP):
                contrib = h * w2_ref[c * NTAP + t]
                g[t] = contrib if g[t] is None else g[t] + contrib

        # Nine output shifts/masks, once per sub-block.
        out = g[_CENTER]
        for t, off in enumerate(_TAP_OFFS):
            if off == 0:
                continue
            out = out + pltpu.roll(g[t], (-off) % HW, 1) * mask_ref[t]

        o_ref[pl.ds(base, SUB), :] = out + b2

    if n_sub == 1:
        do_sub_block(0)
    else:
        # fori_loop (not a static Python loop) so each 8-row sub-block's
        # ~45-vreg working set is bounded and never spills.
        def body(s, carry):
            do_sub_block(pl.multiple_of(s * SUB, SUB))
            return carry
        lax.fori_loop(0, n_sub, body, 0)


def _grid_plan(B):
    """Pick (rows per grid step, padded batch).

    Rows per step are a multiple of SUB (tile-aligned (8,128) blocks), capped at
    BATCH_BLOCK; whenever B >= 2 there are at least 2 grid steps so the
    "parallel" axis can shard across v7x's two TensorCores.
    """
    if B <= 1:
        return SUB, SUB
    half = SUB * pl.cdiv(B, 2 * SUB)          # rows/step if split in two steps
    bb = max(SUB, min(BATCH_BLOCK, half))
    Bp = bb * pl.cdiv(B, bb)
    if Bp == bb:                               # never a single grid step
        Bp = 2 * bb
    return bb, Bp


def _build_masks():
    """Precompute the 9 (SUB, HW) border-validity masks (0/1 f32)."""
    p = jnp.arange(HW, dtype=jnp.int32)
    row, col = p // W, p % W
    rows = []
    for ki in range(K):
        for kj in range(K):
            di, dj = ki - 1, kj - 1
            m = ((row + di >= 0) & (row + di < H) &
                 (col + dj >= 0) & (col + dj < W))
            rows.append(m.astype(jnp.float32))
    m = jnp.stack(rows, axis=0)                               # (9, HW)
    return jnp.broadcast_to(m[:, None, :], (NTAP, SUB, HW))   # (9, SUB, HW)


def unet_forward(x_nchw, w1_oihw, b1, w2_oihw, b2):
    """x_nchw: (B, 1, H, W) float32 -> (B, 1, H, W) float32."""
    B = x_nchw.shape[0]

    # NCHW with C == 1 -> (B, H*W): pure reshape (conv zero-padding is handled
    # in-kernel via roll + masks, so no wrapper pad of the spatial dims).
    x2d = x_nchw.reshape(B, HW).astype(jnp.float32)

    # Parameters flattened for SMEM scalar reads: w[c*9 + (ki*3 + kj)].
    w1_flat = w1_oihw.reshape(C_HID * NTAP).astype(jnp.float32)
    w2_flat = w2_oihw.reshape(C_HID * NTAP).astype(jnp.float32)  # C_OUT == 1
    b1_vec = b1.reshape(C_HID).astype(jnp.float32)
    b2_vec = b2.reshape(C_OUT).astype(jnp.float32)
    masks = _build_masks()

    bb, Bp = _grid_plan(B)
    if Bp != B:
        x2d = jnp.pad(x2d, ((0, Bp - B), (0, 0)))

    smem = pl.BlockSpec(memory_space=pltpu.MemorySpace.SMEM)
    out2d = pl.pallas_call(
        unet_kernel,
        out_shape=jax.ShapeDtypeStruct((Bp, HW), jnp.float32),
        grid_spec=pltpu.PrefetchScalarGridSpec(
            num_scalar_prefetch=0,
            grid=(Bp // bb,),
            in_specs=[
                pl.BlockSpec((bb, HW), lambda i: (i, 0)),
                pl.BlockSpec((NTAP, SUB, HW), lambda i: (0, 0, 0)),  # constant
                smem,   # w1
                smem,   # b1
                smem,   # w2
                smem,   # b2
            ],
            out_specs=pl.BlockSpec((bb, HW), lambda i: (i, 0)),
        ),
        compiler_params=pltpu.CompilerParams(
            dimension_semantics=("parallel",)),
    )(x2d, masks, w1_flat, b1_vec, w2_flat, b2_vec)

    # Flat lane-dense output -> NCHW (pure reshape, C_OUT == 1).
    return out2d[:B].reshape(B, C_OUT, H, W)


def _reference_forward(x_nchw, w1, b1, w2, b2):
    """Plain-JAX reference (same semantics as the PyTorch module)."""
    dn = lax.conv_dimension_numbers(x_nchw.shape, w1.shape,
                                    ("NCHW", "OIHW", "NCHW"))
    h = lax.conv_general_dilated(x_nchw, w1, (1, 1), ((1, 1), (1, 1)),
                                 dimension_numbers=dn)
    h = jnp.maximum(h + b1[None, :, None, None], 0.0)
    y = lax.conv_general_dilated(h, w2, (1, 1), ((1, 1), (1, 1)),
                                 dimension_numbers=dn)
    return y + b2[None, :, None, None]


if __name__ == "__main__":
    key = jax.random.PRNGKey(0)
    kx, k1, k2, k3, k4 = jax.random.split(key, 5)

    # Deterministic synthetic parameters (shapes from the module __init__).
    w1 = jax.random.normal(k1, (C_HID, C_IN, K, K), jnp.float32) * 0.1   # conv1.weight
    b1 = jax.random.normal(k2, (C_HID,), jnp.float32) * 0.1              # conv1.bias
    w2 = jax.random.normal(k3, (C_OUT, C_HID, K, K), jnp.float32) * 0.1  # conv2.weight
    b2 = jax.random.normal(k4, (C_OUT,), jnp.float32) * 0.1              # conv2.bias

    # Input: batch=2, channels=1, 16x16 spatial (NCHW, like the PyTorch module).
    x = jax.random.normal(kx, (2, C_IN, H, W), jnp.float32)

    y = unet_forward(x, w1, b1, w2, b2)
    y = jax.block_until_ready(y)

    y_ref = _reference_forward(x, w1, b1, w2, b2)
    assert y.shape == (2, C_OUT, H, W)
    assert jnp.allclose(y, y_ref, rtol=1e-4, atol=1e-4), "mismatch vs reference"

    print("KERNEL_OK")
</pallas_src>

<mosaic_0001>
module attributes {stable_mosaic.version = 11 : i64} {
  func.func @unet_kernel(%arg0: i32, %arg1: memref<8x256xf32, #tpu.memory_space<vmem>>, %arg2: memref<9x8x256xf32, #tpu.memory_space<vmem>>, %arg3: memref<144xf32, #tpu.memory_space<smem>>, %arg4: memref<16xf32, #tpu.memory_space<smem>>, %arg5: memref<144xf32, #tpu.memory_space<smem>>, %arg6: memref<1xf32, #tpu.memory_space<smem>>, %arg7: memref<8x256xf32, #tpu.memory_space<vmem>>) attributes {dimension_semantics = [#tpu.dimension_semantics<parallel>], iteration_bounds = array<i64: 2>, scalar_prefetch = 0 : i64, scratch_operands = 0 : i64, tpu.core_type = #tpu.core_type<tc>, window_params = [{transform_indices = @transform_0, window_bounds = array<i64: 8, 256>}, {pipeline_mode = #tpu.pipeline_mode<synchronous>, transform_indices = @transform_1, window_bounds = array<i64: 9, 8, 256>}, {transform_indices = @transform_2, window_bounds = array<i64: 144>}, {transform_indices = @transform_3, window_bounds = array<i64: 16>}, {transform_indices = @transform_4, window_bounds = array<i64: 144>}, {transform_indices = @transform_5, window_bounds = array<i64: 1>}, {transform_indices = @transform_6, window_bounds = array<i64: 8, 256>}]} {
    %c0 = arith.constant 0 : index
    %0 = memref.load %arg6[%c0] : memref<1xf32, #tpu.memory_space<smem>>
    %c0_0 = arith.constant 0 : index
    %c0_1 = arith.constant 0 : index
    %1 = vector.load %arg1[%c0_0, %c0_1] : memref<8x256xf32, #tpu.memory_space<vmem>>, vector<8x256xf32>
    %c17_i32 = arith.constant 17 : i32
    %2 = tpu.dynamic_rotate %1 by %c17_i32 dim 1 : vector<8x256xf32>, i32 -> vector<8x256xf32>
    %c0_2 = arith.constant 0 : index
    %c0_3 = arith.constant 0 : index
    %c0_4 = arith.constant 0 : index
    %3 = vector.load %arg2[%c0_2, %c0_3, %c0_4] : memref<9x8x256xf32, #tpu.memory_space<vmem>>, vector<1x8x256xf32>
    %4 = vector.shape_cast %3 : vector<1x8x256xf32> to vector<8x256xf32>
    %5 = arith.mulf %2, %4 : vector<8x256xf32>
    %c16_i32 = arith.constant 16 : i32
    %6 = tpu.dynamic_rotate %1 by %c16_i32 dim 1 : vector<8x256xf32>, i32 -> vector<8x256xf32>
    %c1 = arith.constant 1 : index
    %c0_5 = arith.constant 0 : index
    %c0_6 = arith.constant 0 : index
    %7 = vector.load %arg2[%c1, %c0_5, %c0_6] : memref<9x8x256xf32, #tpu.memory_space<vmem>>, vector<1x8x256xf32>
    %8 = vector.shape_cast %7 : vector<1x8x256xf32> to vector<8x256xf32>
    %9 = arith.mulf %6, %8 : vector<8x256xf32>
    %c15_i32 = arith.constant 15 : i32
    %10 = tpu.dynamic_rotate %1 by %c15_i32 dim 1 : vector<8x256xf32>, i32 -> vector<8x256xf32>
    %c2 = arith.constant 2 : index
    %c0_7 = arith.constant 0 : index
    %c0_8 = arith.constant 0 : index
    %11 = vector.load %arg2[%c2, %c0_7, %c0_8] : memref<9x8x256xf32, #tpu.memory_space<vmem>>, vector<1x8x256xf32>
    %12 = vector.shape_cast %11 : vector<1x8x256xf32> to vector<8x256xf32>
    %13 = arith.mulf %10, %12 : vector<8x256xf32>
    %c1_i32 = arith.constant 1 : i32
    %14 = tpu.dynamic_rotate %1 by %c1_i32 dim 1 : vector<8x256xf32>, i32 -> vector<8x256xf32>
    %c3 = arith.constant 3 : index
    %c0_9 = arith.constant 0 : index
    %c0_10 = arith.constant 0 : index
    %15 = vector.load %arg2[%c3, %c0_9, %c0_10] : memref<9x8x256xf32, #tpu.memory_space<vmem>>, vector<1x8x256xf32>
    %16 = vector.shape_cast %15 : vector<1x8x256xf32> to vector<8x256xf32>
    %17 = arith.mulf %14, %16 : vector<8x256xf32>
    %c255_i32 = arith.constant 255 : i32
    %18 = tpu.dynamic_rotate %1 by %c255_i32 dim 1 : vector<8x256xf32>, i32 -> vector<8x256xf32>
    %c5 = arith.constant 5 : index
    %c0_11 = arith.constant 0 : index
    %c0_12 = arith.constant 0 : index
    %19 = vector.load %arg2[%c5, %c0_11, %c0_12] : memref<9x8x256xf32, #tpu.memory_space<vmem>>, vector<1x8x256xf32>
    %20 = vector.shape_cast %19 : vector<1x8x256xf32> to vector<8x256xf32>
    %21 = arith.mulf %18, %20 : vector<8x256xf32>
    %c241_i32 = arith.constant 241 : i32
    %22 = tpu.dynamic_rotate %1 by %c241_i32 dim 1 : vector<8x256xf32>, i32 -> vector<8x256xf32>
    %c6 = arith.constant 6 : index
    %c0_13 = arith.constant 0 : index
    %c0_14 = arith.constant 0 : index
    %23 = vector.load %arg2[%c6, %c0_13, %c0_14] : memref<9x8x256xf32, #tpu.memory_space<vmem>>, vector<1x8x256xf32>
    %24 = vector.shape_cast %23 : vector<1x8x256xf32> to vector<8x256xf32>
    %25 = arith.mulf %22, %24 : vector<8x256xf32>
    %c240_i32 = arith.constant 240 : i32
    %26 = tpu.dynamic_rotate %1 by %c240_i32 dim 1 : vector<8x256xf32>, i32 -> vector<8x256xf32>
    %c7 = arith.constant 7 : index
    %c0_15 = arith.constant 0 : index
    %c0_16 = arith.constant 0 : index
    %27 = vector.load %arg2[%c7, %c0_15, %c0_16] : memref<9x8x256xf32, #tpu.memory_space<vmem>>, vector<1x8x256xf32>
    %28 = vector.shape_cast %27 : vector<1x8x256xf32> to vector<8x256xf32>
    %29 = arith.mulf %26, %28 : vector<8x256xf32>
    %c239_i32 = arith.constant 239 : i32
    %30 = tpu.dynamic_rotate %1 by %c239_i32 dim 1 : vector<8x256xf32>, i32 -> vector<8x256xf32>
    %c8 = arith.constant 8 : index
    %c0_17 = arith.constant 0 : index
    %c0_18 = arith.constant 0 : index
    %31 = vector.load %arg2[%c8, %c0_17, %c0_18] : memref<9x8x256xf32, #tpu.memory_space<vmem>>, vector<1x8x256xf32>
    %32 = vector.shape_cast %31 : vector<1x8x256xf32> to vector<8x256xf32>
    %33 = arith.mulf %30, %32 : vector<8x256xf32>
    %c0_19 = arith.constant 0 : index
    %34 = memref.load %arg3[%c0_19] : memref<144xf32, #tpu.memory_space<smem>>
    %35 = vector.broadcast %34 : f32 to vector<8x256xf32>
    %36 = arith.mulf %5, %35 : vector<8x256xf32>
    %c1_20 = arith.constant 1 : index
    %37 = memref.load %arg3[%c1_20] : memref<144xf32, #tpu.memory_space<smem>>
    %38 = vector.broadcast %37 : f32 to vector<8x256xf32>
    %39 = arith.mulf %9, %38 : vector<8x256xf32>
    %40 = arith.addf %36, %39 : vector<8x256xf32>
    %c2_21 = arith.constant 2 : index
    %41 = memref.load %arg3[%c2_21] : memref<144xf32, #tpu.memory_space<smem>>
    %42 = vector.broadcast %41 : f32 to vector<8x256xf32>
    %43 = arith.mulf %13, %42 : vector<8x256xf32>
    %44 = arith.addf %40, %43 : vector<8x256xf32>
    %c3_22 = arith.constant 3 : index
    %45 = memref.load %arg3[%c3_22] : memref<144xf32, #tpu.memory_space<smem>>
    %46 = vector.broadcast %45 : f32 to vector<8x256xf32>
    %47 = arith.mulf %17, %46 : vector<8x256xf32>
    %48 = arith.addf %44, %47 : vector<8x256xf32>
    %c4 = arith.constant 4 : index
    %49 = memref.load %arg3[%c4] : memref<144xf32, #tpu.memory_space<smem>>
    %50 = vector.broadcast %49 : f32 to vector<8x256xf32>
    %51 = arith.mulf %1, %50 : vector<8x256xf32>
    %52 = arith.addf %48, %51 : vector<8x256xf32>
    %c5_23 = arith.constant 5 : index
    %53 = memref.load %arg3[%c5_23] : memref<144xf32, #tpu.memory_space<smem>>
    %54 = vector.broadcast %53 : f32 to vector<8x256xf32>
    %55 = arith.mulf %21, %54 : vector<8x256xf32>
    %56 = arith.addf %52, %55 : vector<8x256xf32>
    %c6_24 = arith.constant 6 : index
    %57 = memref.load %arg3[%c6_24] : memref<144xf32, #tpu.memory_space<smem>>
    %58 = vector.broadcast %57 : f32 to vector<8x256xf32>
    %59 = arith.mulf %25, %58 : vector<8x256xf32>
    %60 = arith.addf %56, %59 : vector<8x256xf32>
    %c7_25 = arith.constant 7 : index
    %61 = memref.load %arg3[%c7_25] : memref<144xf32, #tpu.memory_space<smem>>
    %62 = vector.broadcast %61 : f32 to vector<8x256xf32>
    %63 = arith.mulf %29, %62 : vector<8x256xf32>
    %64 = arith.addf %60, %63 : vector<8x256xf32>
    %c8_26 = arith.constant 8 : index
    %65 = memref.load %arg3[%c8_26] : memref<144xf32, #tpu.memory_space<smem>>
    %66 = vector.broadcast %65 : f32 to vector<8x256xf32>
    %67 = arith.mulf %33, %66 : vector<8x256xf32>
    %68 = arith.addf %64, %67 : vector<8x256xf32>
    %c0_27 = arith.constant 0 : index
    %69 = memref.load %arg4[%c0_27] : memref<16xf32, #tpu.memory_space<smem>>
    %70 = vector.broadcast %69 : f32 to vector<8x256xf32>
    %71 = arith.addf %68, %70 : vector<8x256xf32>
    %cst = arith.constant 0.000000e+00 : f32
    %72 = vector.broadcast %cst : f32 to vector<8x256xf32>
    %73 = arith.maximumf %71, %72 : vector<8x256xf32>
    %c0_28 = arith.constant 0 : index
    %74 = memref.load %arg5[%c0_28] : memref<144xf32, #tpu.memory_space<smem>>
    %75 = vector.broadcast %74 : f32 to vector<8x256xf32>
    %76 = arith.mulf %73, %75 : vector<8x256xf32>
    %c1_29 = arith.constant 1 : index
    %77 = memref.load %arg5[%c1_29] : memref<144xf32, #tpu.memory_space<smem>>
    %78 = vector.broadcast %77 : f32 to vector<8x256xf32>
    %79 = arith.mulf %73, %78 : vector<8x256xf32>
    %c2_30 = arith.constant 2 : index
    %80 = memref.load %arg5[%c2_30] : memref<144xf32, #tpu.memory_space<smem>>
    %81 = vector.broadcast %80 : f32 to vector<8x256xf32>
    %82 = arith.mulf %73, %81 : vector<8x256xf32>
    %c3_31 = arith.constant 3 : index
    %83 = memref.load %arg5[%c3_31] : memref<144xf32, #tpu.memory_space<smem>>
    %84 = vector.broadcast %83 : f32 to vector<8x256xf32>
    %85 = arith.mulf %73, %84 : vector<8x256xf32>
    %c4_32 = arith.constant 4 : index
    %86 = memref.load %arg5[%c4_32] : memref<144xf32, #tpu.memory_space<smem>>
    %87 = vector.broadcast %86 : f32 to vector<8x256xf32>
    %88 = arith.mulf %73, %87 : vector<8x256xf32>
    %c5_33 = arith.constant 5 : index
    %89 = memref.load %arg5[%c5_33] : memref<144xf32, #tpu.memory_space<smem>>
    %90 = vector.broadcast %89 : f32 to vector<8x256xf32>
    %91 = arith.mulf %73, %90 : vector<8x256xf32>
    %c6_34 = arith.constant 6 : index
    %92 = memref.load %arg5[%c6_34] : memref<144xf32, #tpu.memory_space<smem>>
    %93 = vector.broadcast %92 : f32 to vector<8x256xf32>
    %94 = arith.mulf %73, %93 : vector<8x256xf32>
    %c7_35 = arith.constant 7 : index
    %95 = memref.load %arg5[%c7_35] : memref<144xf32, #tpu.memory_space<smem>>
    %96 = vector.broadcast %95 : f32 to vector<8x256xf32>
    %97 = arith.mulf %73, %96 : vector<8x256xf32>
    %c8_36 = arith.constant 8 : index
    %98 = memref.load %arg5[%c8_36] : memref<144xf32, #tpu.memory_space<smem>>
    %99 = vector.broadcast %98 : f32 to vector<8x256xf32>
    %100 = arith.mulf %73, %99 : vector<8x256xf32>
    %c9 = arith.constant 9 : index
    %101 = memref.load %arg3[%c9] : memref<144xf32, #tpu.memory_space<smem>>
    %102 = vector.broadcast %101 : f32 to vector<8x256xf32>
    %103 = arith.mulf %5, %102 : vector<8x256xf32>
    %c10 = arith.constant 10 : index
    %104 = memref.load %arg3[%c10] : memref<144xf32, #tpu.memory_space<smem>>
    %105 = vector.broadcast %104 : f32 to vector<8x256xf32>
    %106 = arith.mulf %9, %105 : vector<8x256xf32>
    %107 = arith.addf %103, %106 : vector<8x256xf32>
    %c11 = arith.constant 11 : index
    %108 = memref.load %arg3[%c11] : memref<144xf32, #tpu.memory_space<smem>>
    %109 = vector.broadcast %108 : f32 to vector<8x256xf32>
    %110 = arith.mulf %13, %109 : vector<8x256xf32>
    %111 = arith.addf %107, %110 : vector<8x256xf32>
    %c12 = arith.constant 12 : index
    %112 = memref.load %arg3[%c12] : memref<144xf32, #tpu.memory_space<smem>>
    %113 = vector.broadcast %112 : f32 to vector<8x256xf32>
    %114 = arith.mulf %17, %113 : vector<8x256xf32>
    %115 = arith.addf %111, %114 : vector<8x256xf32>
    %c13 = arith.constant 13 : index
    %116 = memref.load %arg3[%c13] : memref<144xf32, #tpu.memory_space<smem>>
    %117 = vector.broadcast %116 : f32 to vector<8x256xf32>
    %118 = arith.mulf %1, %117 : vector<8x256xf32>
    %119 = arith.addf %115, %118 : vector<8x256xf32>
    %c14 = arith.constant 14 : index
    %120 = memref.load %arg3[%c14] : memref<144xf32, #tpu.memory_space<smem>>
    %121 = vector.broadcast %120 : f32 to vector<8x256xf32>
    %122 = arith.mulf %21, %121 : vector<8x256xf32>
    %123 = arith.addf %119, %122 : vector<8x256xf32>
    %c15 = arith.constant 15 : index
    %124 = memref.load %arg3[%c15] : memref<144xf32, #tpu.memory_space<smem>>
    %125 = vector.broadcast %124 : f32 to vector<8x256xf32>
    %126 = arith.mulf %25, %125 : vector<8x256xf32>
    %127 = arith.addf %123, %126 : vector<8x256xf32>
    %c16 = arith.constant 16 : index
    %128 = memref.load %arg3[%c16] : memref<144xf32, #tpu.memory_space<smem>>
    %129 = vector.broadcast %128 : f32 to vector<8x256xf32>
    %130 = arith.mulf %29, %129 : vector<8x256xf32>
    %131 = arith.addf %127, %130 : vector<8x256xf32>
    %c17 = arith.constant 17 : index
    %132 = memref.load %arg3[%c17] : memref<144xf32, #tpu.memory_space<smem>>
    %133 = vector.broadcast %132 : f32 to vector<8x256xf32>
    %134 = arith.mulf %33, %133 : vector<8x256xf32>
    %135 = arith.addf %131, %134 : vector<8x256xf32>
    %c1_37 = arith.constant 1 : index
    %136 = memref.load %arg4[%c1_37] : memref<16xf32, #tpu.memory_space<smem>>
    %137 = vector.broadcast %136 : f32 to vector<8x256xf32>
    %138 = arith.addf %135, %137 : vector<8x256xf32>
    %cst_38 = arith.constant 0.000000e+00 : f32
    %139 = vector.broadcast %cst_38 : f32 to vector<8x256xf32>
    %140 = arith.maximumf %138, %139 : vector<8x256xf32>
    %c9_39 = arith.constant 9 : index
    %141 = memref.load %arg5[%c9_39] : memref<144xf32, #tpu.memory_space<smem>>
    %142 = vector.broadcast %141 : f32 to vector<8x256xf32>
    %143 = arith.mulf %140, %142 : vector<8x256xf32>
    %144 = arith.addf %76, %143 : vector<8x256xf32>
    %c10_40 = arith.constant 10 : index
    %145 = memref.load %arg5[%c10_40] : memref<144xf32, #tpu.memory_space<smem>>
    %146 = vector.broadcast %145 : f32 to vector<8x256xf32>
    %147 = arith.mulf %140, %146 : vector<8x256xf32>
    %148 = arith.addf %79, %147 : vector<8x256xf32>
    %c11_41 = arith.constant 11 : index
    %149 = memref.load %arg5[%c11_41] : memref<144xf32, #tpu.memory_space<smem>>
    %150 = vector.broadcast %149 : f32 to vector<8x256xf32>
    %151 = arith.mulf %140, %150 : vector<8x256xf32>
    %152 = arith.addf %82, %151 : vector<8x256xf32>
    %c12_42 = arith.constant 12 : index
    %153 = memref.load %arg5[%c12_42] : memref<144xf32, #tpu.memory_space<smem>>
    %154 = vector.broadcast %153 : f32 to vector<8x256xf32>
    %155 = arith.mulf %140, %154 : vector<8x256xf32>
    %156 = arith.addf %85, %155 : vector<8x256xf32>
    %c13_43 = arith.constant 13 : index
    %157 = memref.load %arg5[%c13_43] : memref<144xf32, #tpu.memory_space<smem>>
    %158 = vector.broadcast %157 : f32 to vector<8x256xf32>
    %159 = arith.mulf %140, %158 : vector<8x256xf32>
    %160 = arith.addf %88, %159 : vector<8x256xf32>
    %c14_44 = arith.constant 14 : index
    %161 = memref.load %arg5[%c14_44] : memref<144xf32, #tpu.memory_space<smem>>
    %162 = vector.broadcast %161 : f32 to vector<8x256xf32>
    %163 = arith.mulf %140, %162 : vector<8x256xf32>
    %164 = arith.addf %91, %163 : vector<8x256xf32>
    %c15_45 = arith.constant 15 : index
    %165 = memref.load %arg5[%c15_45] : memref<144xf32, #tpu.memory_space<smem>>
    %166 = vector.broadcast %165 : f32 to vector<8x256xf32>
    %167 = arith.mulf %140, %166 : vector<8x256xf32>
    %168 = arith.addf %94, %167 : vector<8x256xf32>
    %c16_46 = arith.constant 16 : index
    %169 = memref.load %arg5[%c16_46] : memref<144xf32, #tpu.memory_space<smem>>
    %170 = vector.broadcast %169 : f32 to vector<8x256xf32>
    %171 = arith.mulf %140, %170 : vector<8x256xf32>
    %172 = arith.addf %97, %171 : vector<8x256xf32>
    %c17_47 = arith.constant 17 : index
    %173 = memref.load %arg5[%c17_47] : memref<144xf32, #tpu.memory_space<smem>>
    %174 = vector.broadcast %173 : f32 to vector<8x256xf32>
    %175 = arith.mulf %140, %174 : vector<8x256xf32>
    %176 = arith.addf %100, %175 : vector<8x256xf32>
    %c18 = arith.constant 18 : index
    %177 = memref.load %arg3[%c18] : memref<144xf32, #tpu.memory_space<smem>>
    %178 = vector.broadcast %177 : f32 to vector<8x256xf32>
    %179 = arith.mulf %5, %178 : vector<8x256xf32>
    %c19 = arith.constant 19 : index
    %180 = memref.load %arg3[%c19] : memref<144xf32, #tpu.memory_space<smem>>
    %181 = vector.broadcast %180 : f32 to vector<8x256xf32>
    %182 = arith.mulf %9, %181 : vector<8x256xf32>
    %183 = arith.addf %179, %182 : vector<8x256xf32>
    %c20 = arith.constant 20 : index
    %184 = memref.load %arg3[%c20] : memref<144xf32, #tpu.memory_space<smem>>
    %185 = vector.broadcast %184 : f32 to vector<8x256xf32>
    %186 = arith.mulf %13, %185 : vector<8x256xf32>
    %187 = arith.addf %183, %186 : vector<8x256xf32>
    %c21 = arith.constant 21 : index
    %188 = memref.load %arg3[%c21] : memref<144xf32, #tpu.memory_space<smem>>
    %189 = vector.broadcast %188 : f32 to vector<8x256xf32>
    %190 = arith.mulf %17, %189 : vector<8x256xf32>
    %191 = arith.addf %187, %190 : vector<8x256xf32>
    %c22 = arith.constant 22 : index
    %192 = memref.load %arg3[%c22] : memref<144xf32, #tpu.memory_space<smem>>
    %193 = vector.broadcast %192 : f32 to vector<8x256xf32>
    %194 = arith.mulf %1, %193 : vector<8x256xf32>
    %195 = arith.addf %191, %194 : vector<8x256xf32>
    %c23 = arith.constant 23 : index
    %196 = memref.load %arg3[%c23] : memref<144xf32, #tpu.memory_space<smem>>
    %197 = vector.broadcast %196 : f32 to vector<8x256xf32>
    %198 = arith.mulf %21, %197 : vector<8x256xf32>
    %199 = arith.addf %195, %198 : vector<8x256xf32>
    %c24 = arith.constant 24 : index
    %200 = memref.load %arg3[%c24] : memref<144xf32, #tpu.memory_space<smem>>
    %201 = vector.broadcast %200 : f32 to vector<8x256xf32>
    %202 = arith.mulf %25, %201 : vector<8x256xf32>
    %203 = arith.addf %199, %202 : vector<8x256xf32>
    %c25 = arith.constant 25 : index
    %204 = memref.load %arg3[%c25] : memref<144xf32, #tpu.memory_space<smem>>
    %205 = vector.broadcast %204 : f32 to vector<8x256xf32>
    %206 = arith.mulf %29, %205 : vector<8x256xf32>
    %207 = arith.addf %203, %206 : vector<8x256xf32>
    %c26 = arith.constant 26 : index
    %208 = memref.load %arg3[%c26] : memref<144xf32, #tpu.memory_space<smem>>
    %209 = vector.broadcast %208 : f32 to vector<8x256xf32>
    %210 = arith.mulf %33, %209 : vector<8x256xf32>
    %211 = arith.addf %207, %210 : vector<8x256xf32>
    %c2_48 = arith.constant 2 : index
    %212 = memref.load %arg4[%c2_48] : memref<16xf32, #tpu.memory_space<smem>>
    %213 = vector.broadcast %212 : f32 to vector<8x256xf32>
    %214 = arith.addf %211, %213 : vector<8x256xf32>
    %cst_49 = arith.constant 0.000000e+00 : f32
    %215 = vector.broadcast %cst_49 : f32 to vector<8x256xf32>
    %216 = arith.maximumf %214, %215 : vector<8x256xf32>
    %c18_50 = arith.constant 18 : index
    %217 = memref.load %arg5[%c18_50] : memref<144xf32, #tpu.memory_space<smem>>
    %218 = vector.broadcast %217 : f32 to vector<8x256xf32>
    %219 = arith.mulf %216, %218 : vector<8x256xf32>
    %220 = arith.addf %144, %219 : vector<8x256xf32>
    %c19_51 = arith.constant 19 : index
    %221 = memref.load %arg5[%c19_51] : memref<144xf32, #tpu.memory_space<smem>>
    %222 = vector.broadcast %221 : f32 to vector<8x256xf32>
    %223 = arith.mulf %216, %222 : vector<8x256xf32>
    %224 = arith.addf %148, %223 : vector<8x256xf32>
    %c20_52 = arith.constant 20 : index
    %225 = memref.load %arg5[%c20_52] : memref<144xf32, #tpu.memory_space<smem>>
    %226 = vector.broadcast %225 : f32 to vector<8x256xf32>
    %227 = arith.mulf %216, %226 : vector<8x256xf32>
    %228 = arith.addf %152, %227 : vector<8x256xf32>
    %c21_53 = arith.constant 21 : index
    %229 = memref.load %arg5[%c21_53] : memref<144xf32, #tpu.memory_space<smem>>
    %230 = vector.broadcast %229 : f32 to vector<8x256xf32>
    %231 = arith.mulf %216, %230 : vector<8x256xf32>
    %232 = arith.addf %156, %231 : vector<8x256xf32>
    %c22_54 = arith.constant 22 : index
    %233 = memref.load %arg5[%c22_54] : memref<144xf32, #tpu.memory_space<smem>>
    %234 = vector.broadcast %233 : f32 to vector<8x256xf32>
    %235 = arith.mulf %216, %234 : vector<8x256xf32>
    %236 = arith.addf %160, %235 : vector<8x256xf32>
    %c23_55 = arith.constant 23 : index
    %237 = memref.load %arg5[%c23_55] : memref<144xf32, #tpu.memory_space<smem>>
    %238 = vector.broadcast %237 : f32 to vector<8x256xf32>
    %239 = arith.mulf %216, %238 : vector<8x256xf32>
    %240 = arith.addf %164, %239 : vector<8x256xf32>
    %c24_56 = arith.constant 24 : index
    %241 = memref.load %arg5[%c24_56] : memref<144xf32, #tpu.memory_space<smem>>
    %242 = vector.broadcast %241 : f32 to vector<8x256xf32>
    %243 = arith.mulf %216, %242 : vector<8x256xf32>
    %244 = arith.addf %168, %243 : vector<8x256xf32>
    %c25_57 = arith.constant 25 : index
    %245 = memref.load %arg5[%c25_57] : memref<144xf32, #tpu.memory_space<smem>>
    %246 = vector.broadcast %245 : f32 to vector<8x256xf32>
    %247 = arith.mulf %216, %246 : vector<8x256xf32>
    %248 = arith.addf %172, %247 : vector<8x256xf32>
    %c26_58 = arith.constant 26 : index
    %249 = memref.load %arg5[%c26_58] : memref<144xf32, #tpu.memory_space<smem>>
    %250 = vector.broadcast %249 : f32 to vector<8x256xf32>
    %251 = arith.mulf %216, %250 : vector<8x256xf32>
    %252 = arith.addf %176, %251 : vector<8x256xf32>
    %c27 = arith.constant 27 : index
    %253 = memref.load %arg3[%c27] : memref<144xf32, #tpu.memory_space<smem>>
    %254 = vector.broadcast %253 : f32 to vector<8x256xf32>
    %255 = arith.mulf %5, %254 : vector<8x256xf32>
    %c28 = arith.constant 28 : index
    %256 = memref.load %arg3[%c28] : memref<144xf32, #tpu.memory_space<smem>>
    %257 = vector.broadcast %256 : f32 to vector<8x256xf32>
    %258 = arith.mulf %9, %257 : vector<8x256xf32>
    %259 = arith.addf %255, %258 : vector<8x256xf32>
    %c29 = arith.constant 29 : index
    %260 = memref.load %arg3[%c29] : memref<144xf32, #tpu.memory_space<smem>>
    %261 = vector.broadcast %260 : f32 to vector<8x256xf32>
    %262 = arith.mulf %13, %261 : vector<8x256xf32>
    %263 = arith.addf %259, %262 : vector<8x256xf32>
    %c30 = arith.constant 30 : index
    %264 = memref.load %arg3[%c30] : memref<144xf32, #tpu.memory_space<smem>>
    %265 = vector.broadcast %264 : f32 to vector<8x256xf32>
    %266 = arith.mulf %17, %265 : vector<8x256xf32>
    %267 = arith.addf %263, %266 : vector<8x256xf32>
    %c31 = arith.constant 31 : index
    %268 = memref.load %arg3[%c31] : memref<144xf32, #tpu.memory_space<smem>>
    %269 = vector.broadcast %268 : f32 to vector<8x256xf32>
    %270 = arith.mulf %1, %269 : vector<8x256xf32>
    %271 = arith.addf %267, %270 : vector<8x256xf32>
    %c32 = arith.constant 32 : index
    %272 = memref.load %arg3[%c32] : memref<144xf32, #tpu.memory_space<smem>>
    %273 = vector.broadcast %272 : f32 to vector<8x256xf32>
    %274 = arith.mulf %21, %273 : vector<8x256xf32>
    %275 = arith.addf %271, %274 : vector<8x256xf32>
    %c33 = arith.constant 33 : index
    %276 = memref.load %arg3[%c33] : memref<144xf32, #tpu.memory_space<smem>>
    %277 = vector.broadcast %276 : f32 to vector<8x256xf32>
    %278 = arith.mulf %25, %277 : vector<8x256xf32>
    %279 = arith.addf %275, %278 : vector<8x256xf32>
    %c34 = arith.constant 34 : index
    %280 = memref.load %arg3[%c34] : memref<144xf32, #tpu.memory_space<smem>>
    %281 = vector.broadcast %280 : f32 to vector<8x256xf32>
    %282 = arith.mulf %29, %281 : vector<8x256xf32>
    %283 = arith.addf %279, %282 : vector<8x256xf32>
    %c35 = arith.constant 35 : index
    %284 = memref.load %arg3[%c35] : memref<144xf32, #tpu.memory_space<smem>>
    %285 = vector.broadcast %284 : f32 to vector<8x256xf32>
    %286 = arith.mulf %33, %285 : vector<8x256xf32>
    %287 = arith.addf %283, %286 : vector<8x256xf32>
    %c3_59 = arith.constant 3 : index
    %288 = memref.load %arg4[%c3_59] : memref<16xf32, #tpu.memory_space<smem>>
    %289 = vector.broadcast %288 : f32 to vector<8x256xf32>
    %290 = arith.addf %287, %289 : vector<8x256xf32>
    %cst_60 = arith.constant 0.000000e+00 : f32
    %291 = vector.broadcast %cst_60 : f32 to vector<8x256xf32>
    %292 = arith.maximumf %290, %291 : vector<8x256xf32>
    %c27_61 = arith.constant 27 : index
    %293 = memref.load %arg5[%c27_61] : memref<144xf32, #tpu.memory_space<smem>>
    %294 = vector.broadcast %293 : f32 to vector<8x256xf32>
    %295 = arith.mulf %292, %294 : vector<8x256xf32>
    %296 = arith.addf %220, %295 : vector<8x256xf32>
    %c28_62 = arith.constant 28 : index
    %297 = memref.load %arg5[%c28_62] : memref<144xf32, #tpu.memory_space<smem>>
    %298 = vector.broadcast %297 : f32 to vector<8x256xf32>
    %299 = arith.mulf %292, %298 : vector<8x256xf32>
    %300 = arith.addf %224, %299 : vector<8x256xf32>
    %c29_63 = arith.constant 29 : index
    %301 = memref.load %arg5[%c29_63] : memref<144xf32, #tpu.memory_space<smem>>
    %302 = vector.broadcast %301 : f32 to vector<8x256xf32>
    %303 = arith.mulf %292, %302 : vector<8x256xf32>
    %304 = arith.addf %228, %303 : vector<8x256xf32>
    %c30_64 = arith.constant 30 : index
    %305 = memref.load %arg5[%c30_64] : memref<144xf32, #tpu.memory_space<smem>>
    %306 = vector.broadcast %305 : f32 to vector<8x256xf32>
    %307 = arith.mulf %292, %306 : vector<8x256xf32>
    %308 = arith.addf %232, %307 : vector<8x256xf32>
    %c31_65 = arith.constant 31 : index
    %309 = memref.load %arg5[%c31_65] : memref<144xf32, #tpu.memory_space<smem>>
    %310 = vector.broadcast %309 : f32 to vector<8x256xf32>
    %311 = arith.mulf %292, %310 : vector<8x256xf32>
    %312 = arith.addf %236, %311 : vector<8x256xf32>
    %c32_66 = arith.constant 32 : index
    %313 = memref.load %arg5[%c32_66] : memref<144xf32, #tpu.memory_space<smem>>
    %314 = vector.broadcast %313 : f32 to vector<8x256xf32>
    %315 = arith.mulf %292, %314 : vector<8x256xf32>
    %316 = arith.addf %240, %315 : vector<8x256xf32>
    %c33_67 = arith.constant 33 : index
    %317 = memref.load %arg5[%c33_67] : memref<144xf32, #tpu.memory_space<smem>>
    %318 = vector.broadcast %317 : f32 to vector<8x256xf32>
    %319 = arith.mulf %292, %318 : vector<8x256xf32>
    %320 = arith.addf %244, %319 : vector<8x256xf32>
    %c34_68 = arith.constant 34 : index
    %321 = memref.load %arg5[%c34_68] : memref<144xf32, #tpu.memory_space<smem>>
    %322 = vector.broadcast %321 : f32 to vector<8x256xf32>
    %323 = arith.mulf %292, %322 : vector<8x256xf32>
    %324 = arith.addf %248, %323 : vector<8x256xf32>
    %c35_69 = arith.constant 35 : index
    %325 = memref.load %arg5[%c35_69] : memref<144xf32, #tpu.memory_space<smem>>
    %326 = vector.broadcast %325 : f32 to vector<8x256xf32>
    %327 = arith.mulf %292, %326 : vector<8x256xf32>
    %328 = arith.addf %252, %327 : vector<8x256xf32>
    %c36 = arith.constant 36 : index
    %329 = memref.load %arg3[%c36] : memref<144xf32, #tpu.memory_space<smem>>
    %330 = vector.broadcast %329 : f32 to vector<8x256xf32>
    %331 = arith.mulf %5, %330 : vector<8x256xf32>
    %c37 = arith.constant 37 : index
    %332 = memref.load %arg3[%c37] : memref<144xf32, #tpu.memory_space<smem>>
    %333 = vector.broadcast %332 : f32 to vector<8x256xf32>
    %334 = arith.mulf %9, %333 : vector<8x256xf32>
    %335 = arith.addf %331, %334 : vector<8x256xf32>
    %c38 = arith.constant 38 : index
    %336 = memref.load %arg3[%c38] : memref<144xf32, #tpu.memory_space<smem>>
    %337 = vector.broadcast %336 : f32 to vector<8x256xf32>
    %338 = arith.mulf %13, %337 : vector<8x256xf32>
    %339 = arith.addf %335, %338 : vector<8x256xf32>
    %c39 = arith.constant 39 : index
    %340 = memref.load %arg3[%c39] : memref<144xf32, #tpu.memory_space<smem>>
    %341 = vector.broadcast %340 : f32 to vector<8x256xf32>
    %342 = arith.mulf %17, %341 : vector<8x256xf32>
    %343 = arith.addf %339, %342 : vector<8x256xf32>
    %c40 = arith.constant 40 : index
    %344 = memref.load %arg3[%c40] : memref<144xf32, #tpu.memory_space<smem>>
    %345 = vector.broadcast %344 : f32 to vector<8x256xf32>
    %346 = arith.mulf %1, %345 : vector<8x256xf32>
    %347 = arith.addf %343, %346 : vector<8x256xf32>
    %c41 = arith.constant 41 : index
    %348 = memref.load %arg3[%c41] : memref<144xf32, #tpu.memory_space<smem>>
    %349 = vector.broadcast %348 : f32 to vector<8x256xf32>
    %350 = arith.mulf %21, %349 : vector<8x256xf32>
    %351 = arith.addf %347, %350 : vector<8x256xf32>
    %c42 = arith.constant 42 : index
    %352 = memref.load %arg3[%c42] : memref<144xf32, #tpu.memory_space<smem>>
    %353 = vector.broadcast %352 : f32 to vector<8x256xf32>
    %354 = arith.mulf %25, %353 : vector<8x256xf32>
    %355 = arith.addf %351, %354 : vector<8x256xf32>
    %c43 = arith.constant 43 : index
    %356 = memref.load %arg3[%c43] : memref<144xf32, #tpu.memory_space<smem>>
    %357 = vector.broadcast %356 : f32 to vector<8x256xf32>
    %358 = arith.mulf %29, %357 : vector<8x256xf32>
    %359 = arith.addf %355, %358 : vector<8x256xf32>
    %c44 = arith.constant 44 : index
    %360 = memref.load %arg3[%c44] : memref<144xf32, #tpu.memory_space<smem>>
    %361 = vector.broadcast %360 : f32 to vector<8x256xf32>
    %362 = arith.mulf %33, %361 : vector<8x256xf32>
    %363 = arith.addf %359, %362 : vector<8x256xf32>
    %c4_70 = arith.constant 4 : index
    %364 = memref.load %arg4[%c4_70] : memref<16xf32, #tpu.memory_space<smem>>
    %365 = vector.broadcast %364 : f32 to vector<8x256xf32>
    %366 = arith.addf %363, %365 : vector<8x256xf32>
    %cst_71 = arith.constant 0.000000e+00 : f32
    %367 = vector.broadcast %cst_71 : f32 to vector<8x256xf32>
    %368 = arith.maximumf %366, %367 : vector<8x256xf32>
    %c36_72 = arith.constant 36 : index
    %369 = memref.load %arg5[%c36_72] : memref<144xf32, #tpu.memory_space<smem>>
    %370 = vector.broadcast %369 : f32 to vector<8x256xf32>
    %371 = arith.mulf %368, %370 : vector<8x256xf32>
    %372 = arith.addf %296, %371 : vector<8x256xf32>
    %c37_73 = arith.constant 37 : index
    %373 = memref.load %arg5[%c37_73] : memref<144xf32, #tpu.memory_space<smem>>
    %374 = vector.broadcast %373 : f32 to vector<8x256xf32>
    %375 = arith.mulf %368, %374 : vector<8x256xf32>
    %376 = arith.addf %300, %375 : vector<8x256xf32>
    %c38_74 = arith.constant 38 : index
    %377 = memref.load %arg5[%c38_74] : memref<144xf32, #tpu.memory_space<smem>>
    %378 = vector.broadcast %377 : f32 to vector<8x256xf32>
    %379 = arith.mulf %368, %378 : vector<8x256xf32>
    %380 = arith.addf %304, %379 : vector<8x256xf32>
    %c39_75 = arith.constant 39 : index
    %381 = memref.load %arg5[%c39_75] : memref<144xf32, #tpu.memory_space<smem>>
    %382 = vector.broadcast %381 : f32 to vector<8x256xf32>
    %383 = arith.mulf %368, %382 : vector<8x256xf32>
    %384 = arith.addf %308, %383 : vector<8x256xf32>
    %c40_76 = arith.constant 40 : index
    %385 = memref.load %arg5[%c40_76] : memref<144xf32, #tpu.memory_space<smem>>
    %386 = vector.broadcast %385 : f32 to vector<8x256xf32>
    %387 = arith.mulf %368, %386 : vector<8x256xf32>
    %388 = arith.addf %312, %387 : vector<8x256xf32>
    %c41_77 = arith.constant 41 : index
    %389 = memref.load %arg5[%c41_77] : memref<144xf32, #tpu.memory_space<smem>>
    %390 = vector.broadcast %389 : f32 to vector<8x256xf32>
    %391 = arith.mulf %368, %390 : vector<8x256xf32>
    %392 = arith.addf %316, %391 : vector<8x256xf32>
    %c42_78 = arith.constant 42 : index
    %393 = memref.load %arg5[%c42_78] : memref<144xf32, #tpu.memory_space<smem>>
    %394 = vector.broadcast %393 : f32 to vector<8x256xf32>
    %395 = arith.mulf %368, %394 : vector<8x256xf32>
    %396 = arith.addf %320, %395 : vector<8x256xf32>
    %c43_79 = arith.constant 43 : index
    %397 = memref.load %arg5[%c43_79] : memref<144xf32, #tpu.memory_space<smem>>
    %398 = vector.broadcast %397 : f32 to vector<8x256xf32>
    %399 = arith.mulf %368, %398 : vector<8x256xf32>
    %400 = arith.addf %324, %399 : vector<8x256xf32>
    %c44_80 = arith.constant 44 : index
    %401 = memref.load %arg5[%c44_80] : memref<144xf32, #tpu.memory_space<smem>>
    %402 = vector.broadcast %401 : f32 to vector<8x256xf32>
    %403 = arith.mulf %368, %402 : vector<8x256xf32>
    %404 = arith.addf %328, %403 : vector<8x256xf32>
    %c45 = arith.constant 45 : index
    %405 = memref.load %arg3[%c45] : memref<144xf32, #tpu.memory_space<smem>>
    %406 = vector.broadcast %405 : f32 to vector<8x256xf32>
    %407 = arith.mulf %5, %406 : vector<8x256xf32>
    %c46 = arith.constant 46 : index
    %408 = memref.load %arg3[%c46] : memref<144xf32, #tpu.memory_space<smem>>
    %409 = vector.broadcast %408 : f32 to vector<8x256xf32>
    %410 = arith.mulf %9, %409 : vector<8x256xf32>
    %411 = arith.addf %407, %410 : vector<8x256xf32>
    %c47 = arith.constant 47 : index
    %412 = memref.load %arg3[%c47] : memref<144xf32, #tpu.memory_space<smem>>
    %413 = vector.broadcast %412 : f32 to vector<8x256xf32>
    %414 = arith.mulf %13, %413 : vector<8x256xf32>
    %415 = arith.addf %411, %414 : vector<8x256xf32>
    %c48 = arith.constant 48 : index
    %416 = memref.load %arg3[%c48] : memref<144xf32, #tpu.memory_space<smem>>
    %417 = vector.broadcast %416 : f32 to vector<8x256xf32>
    %418 = arith.mulf %17, %417 : vector<8x256xf32>
    %419 = arith.addf %415, %418 : vector<8x256xf32>
    %c49 = arith.constant 49 : index
    %420 = memref.load %arg3[%c49] : memref<144xf32, #tpu.memory_space<smem>>
    %421 = vector.broadcast %420 : f32 to vector<8x256xf32>
    %422 = arith.mulf %1, %421 : vector<8x256xf32>
    %423 = arith.addf %419, %422 : vector<8x256xf32>
    %c50 = arith.constant 50 : index
    %424 = memref.load %arg3[%c50] : memref<144xf32, #tpu.memory_space<smem>>
    %425 = vector.broadcast %424 : f32 to vector<8x256xf32>
    %426 = arith.mulf %21, %425 : vector<8x256xf32>
    %427 = arith.addf %423, %426 : vector<8x256xf32>
    %c51 = arith.constant 51 : index
    %428 = memref.load %arg3[%c51] : memref<144xf32, #tpu.memory_space<smem>>
    %429 = vector.broadcast %428 : f32 to vector<8x256xf32>
    %430 = arith.mulf %25, %429 : vector<8x256xf32>
    %431 = arith.addf %427, %430 : vector<8x256xf32>
    %c52 = arith.constant 52 : index
    %432 = memref.load %arg3[%c52] : memref<144xf32, #tpu.memory_space<smem>>
    %433 = vector.broadcast %432 : f32 to vector<8x256xf32>
    %434 = arith.mulf %29, %433 : vector<8x256xf32>
    %435 = arith.addf %431, %434 : vector<8x256xf32>
    %c53 = arith.constant 53 : index
    %436 = memref.load %arg3[%c53] : memref<144xf32, #tpu.memory_space<smem>>
    %437 = vector.broadcast %436 : f32 to vector<8x256xf32>
    %438 = arith.mulf %33, %437 : vector<8x256xf32>
    %439 = arith.addf %435, %438 : vector<8x256xf32>
    %c5_81 = arith.constant 5 : index
    %440 = memref.load %arg4[%c5_81] : memref<16xf32, #tpu.memory_space<smem>>
    %441 = vector.broadcast %440 : f32 to vector<8x256xf32>
    %442 = arith.addf %439, %441 : vector<8x256xf32>
    %cst_82 = arith.constant 0.000000e+00 : f32
    %443 = vector.broadcast %cst_82 : f32 to vector<8x256xf32>
    %444 = arith.maximumf %442, %443 : vector<8x256xf32>
    %c45_83 = arith.constant 45 : index
    %445 = memref.load %arg5[%c45_83] : memref<144xf32, #tpu.memory_space<smem>>
    %446 = vector.broadcast %445 : f32 to vector<8x256xf32>
    %447 = arith.mulf %444, %446 : vector<8x256xf32>
    %448 = arith.addf %372, %447 : vector<8x256xf32>
    %c46_84 = arith.constant 46 : index
    %449 = memref.load %arg5[%c46_84] : memref<144xf32, #tpu.memory_space<smem>>
    %450 = vector.broadcast %449 : f32 to vector<8x256xf32>
    %451 = arith.mulf %444, %450 : vector<8x256xf32>
    %452 = arith.addf %376, %451 : vector<8x256xf32>
    %c47_85 = arith.constant 47 : index
    %453 = memref.load %arg5[%c47_85] : memref<144xf32, #tpu.memory_space<smem>>
    %454 = vector.broadcast %453 : f32 to vector<8x256xf32>
    %455 = arith.mulf %444, %454 : vector<8x256xf32>
    %456 = arith.addf %380, %455 : vector<8x256xf32>
    %c48_86 = arith.constant 48 : index
    %457 = memref.load %arg5[%c48_86] : memref<144xf32, #tpu.memory_space<smem>>
    %458 = vector.broadcast %457 : f32 to vector<8x256xf32>
    %459 = arith.mulf %444, %458 : vector<8x256xf32>
    %460 = arith.addf %384, %459 : vector<8x256xf32>
    %c49_87 = arith.constant 49 : index
    %461 = memref.load %arg5[%c49_87] : memref<144xf32, #tpu.memory_space<smem>>
    %462 = vector.broadcast %461 : f32 to vector<8x256xf32>
    %463 = arith.mulf %444, %462 : vector<8x256xf32>
    %464 = arith.addf %388, %463 : vector<8x256xf32>
    %c50_88 = arith.constant 50 : index
    %465 = memref.load %arg5[%c50_88] : memref<144xf32, #tpu.memory_space<smem>>
    %466 = vector.broadcast %465 : f32 to vector<8x256xf32>
    %467 = arith.mulf %444, %466 : vector<8x256xf32>
    %468 = arith.addf %392, %467 : vector<8x256xf32>
    %c51_89 = arith.constant 51 : index
    %469 = memref.load %arg5[%c51_89] : memref<144xf32, #tpu.memory_space<smem>>
    %470 = vector.broadcast %469 : f32 to vector<8x256xf32>
    %471 = arith.mulf %444, %470 : vector<8x256xf32>
    %472 = arith.addf %396, %471 : vector<8x256xf32>
    %c52_90 = arith.constant 52 : index
    %473 = memref.load %arg5[%c52_90] : memref<144xf32, #tpu.memory_space<smem>>
    %474 = vector.broadcast %473 : f32 to vector<8x256xf32>
    %475 = arith.mulf %444, %474 : vector<8x256xf32>
    %476 = arith.addf %400, %475 : vector<8x256xf32>
    %c53_91 = arith.constant 53 : index
    %477 = memref.load %arg5[%c53_91] : memref<144xf32, #tpu.memory_space<smem>>
    %478 = vector.broadcast %477 : f32 to vector<8x256xf32>
    %479 = arith.mulf %444, %478 : vector<8x256xf32>
    %480 = arith.addf %404, %479 : vector<8x256xf32>
    %c54 = arith.constant 54 : index
    %481 = memref.load %arg3[%c54] : memref<144xf32, #tpu.memory_space<smem>>
    %482 = vector.broadcast %481 : f32 to vector<8x256xf32>
    %483 = arith.mulf %5, %482 : vector<8x256xf32>
    %c55 = arith.constant 55 : index
    %484 = memref.load %arg3[%c55] : memref<144xf32, #tpu.memory_space<smem>>
    %485 = vector.broadcast %484 : f32 to vector<8x256xf32>
    %486 = arith.mulf %9, %485 : vector<8x256xf32>
    %487 = arith.addf %483, %486 : vector<8x256xf32>
    %c56 = arith.constant 56 : index
    %488 = memref.load %arg3[%c56] : memref<144xf32, #tpu.memory_space<smem>>
    %489 = vector.broadcast %488 : f32 to vector<8x256xf32>
    %490 = arith.mulf %13, %489 : vector<8x256xf32>
    %491 = arith.addf %487, %490 : vector<8x256xf32>
    %c57 = arith.constant 57 : index
    %492 = memref.load %arg3[%c57] : memref<144xf32, #tpu.memory_space<smem>>
    %493 = vector.broadcast %492 : f32 to vector<8x256xf32>
    %494 = arith.mulf %17, %493 : vector<8x256xf32>
    %495 = arith.addf %491, %494 : vector<8x256xf32>
    %c58 = arith.constant 58 : index
    %496 = memref.load %arg3[%c58] : memref<144xf32, #tpu.memory_space<smem>>
    %497 = vector.broadcast %496 : f32 to vector<8x256xf32>
    %498 = arith.mulf %1, %497 : vector<8x256xf32>
    %499 = arith.addf %495, %498 : vector<8x256xf32>
    %c59 = arith.constant 59 : index
    %500 = memref.load %arg3[%c59] : memref<144xf32, #tpu.memory_space<smem>>
    %501 = vector.broadcast %500 : f32 to vector<8x256xf32>
    %502 = arith.mulf %21, %501 : vector<8x256xf32>
    %503 = arith.addf %499, %502 : vector<8x256xf32>
    %c60 = arith.constant 60 : index
    %504 = memref.load %arg3[%c60] : memref<144xf32, #tpu.memory_space<smem>>
    %505 = vector.broadcast %504 : f32 to vector<8x256xf32>
    %506 = arith.mulf %25, %505 : vector<8x256xf32>
    %507 = arith.addf %503, %506 : vector<8x256xf32>
    %c61 = arith.constant 61 : index
    %508 = memref.load %arg3[%c61] : memref<144xf32, #tpu.memory_space<smem>>
    %509 = vector.broadcast %508 : f32 to vector<8x256xf32>
    %510 = arith.mulf %29, %509 : vector<8x256xf32>
    %511 = arith.addf %507, %510 : vector<8x256xf32>
    %c62 = arith.constant 62 : index
    %512 = memref.load %arg3[%c62] : memref<144xf32, #tpu.memory_space<smem>>
    %513 = vector.broadcast %512 : f32 to vector<8x256xf32>
    %514 = arith.mulf %33, %513 : vector<8x256xf32>
    %515 = arith.addf %511, %514 : vector<8x256xf32>
    %c6_92 = arith.constant 6 : index
    %516 = memref.load %arg4[%c6_92] : memref<16xf32, #tpu.memory_space<smem>>
    %517 = vector.broadcast %516 : f32 to vector<8x256xf32>
    %518 = arith.addf %515, %517 : vector<8x256xf32>
    %cst_93 = arith.constant 0.000000e+00 : f32
    %519 = vector.broadcast %cst_93 : f32 to vector<8x256xf32>
    %520 = arith.maximumf %518, %519 : vector<8x256xf32>
    %c54_94 = arith.constant 54 : index
    %521 = memref.load %arg5[%c54_94] : memref<144xf32, #tpu.memory_space<smem>>
    %522 = vector.broadcast %521 : f32 to vector<8x256xf32>
    %523 = arith.mulf %520, %522 : vector<8x256xf32>
    %524 = arith.addf %448, %523 : vector<8x256xf32>
    %c55_95 = arith.constant 55 : index
    %525 = memref.load %arg5[%c55_95] : memref<144xf32, #tpu.memory_space<smem>>
    %526 = vector.broadcast %525 : f32 to vector<8x256xf32>
    %527 = arith.mulf %520, %526 : vector<8x256xf32>
    %528 = arith.addf %452, %527 : vector<8x256xf32>
    %c56_96 = arith.constant 56 : index
    %529 = memref.load %arg5[%c56_96] : memref<144xf32, #tpu.memory_space<smem>>
    %530 = vector.broadcast %529 : f32 to vector<8x256xf32>
    %531 = arith.mulf %520, %530 : vector<8x256xf32>
    %532 = arith.addf %456, %531 : vector<8x256xf32>
    %c57_97 = arith.constant 57 : index
    %533 = memref.load %arg5[%c57_97] : memref<144xf32, #tpu.memory_space<smem>>
    %534 = vector.broadcast %533 : f32 to vector<8x256xf32>
    %535 = arith.mulf %520, %534 : vector<8x256xf32>
    %536 = arith.addf %460, %535 : vector<8x256xf32>
    %c58_98 = arith.constant 58 : index
    %537 = memref.load %arg5[%c58_98] : memref<144xf32, #tpu.memory_space<smem>>
    %538 = vector.broadcast %537 : f32 to vector<8x256xf32>
    %539 = arith.mulf %520, %538 : vector<8x256xf32>
    %540 = arith.addf %464, %539 : vector<8x256xf32>
    %c59_99 = arith.constant 59 : index
    %541 = memref.load %arg5[%c59_99] : memref<144xf32, #tpu.memory_space<smem>>
    %542 = vector.broadcast %541 : f32 to vector<8x256xf32>
    %543 = arith.mulf %520, %542 : vector<8x256xf32>
    %544 = arith.addf %468, %543 : vector<8x256xf32>
    %c60_100 = arith.constant 60 : index
    %545 = memref.load %arg5[%c60_100] : memref<144xf32, #tpu.memory_space<smem>>
    %546 = vector.broadcast %545 : f32 to vector<8x256xf32>
    %547 = arith.mulf %520, %546 : vector<8x256xf32>
    %548 = arith.addf %472, %547 : vector<8x256xf32>
    %c61_101 = arith.constant 61 : index
    %549 = memref.load %arg5[%c61_101] : memref<144xf32, #tpu.memory_space<smem>>
    %550 = vector.broadcast %549 : f32 to vector<8x256xf32>
    %551 = arith.mulf %520, %550 : vector<8x256xf32>
    %552 = arith.addf %476, %551 : vector<8x256xf32>
    %c62_102 = arith.constant 62 : index
    %553 = memref.load %arg5[%c62_102] : memref<144xf32, #tpu.memory_space<smem>>
    %554 = vector.broadcast %553 : f32 to vector<8x256xf32>
    %555 = arith.mulf %520, %554 : vector<8x256xf32>
    %556 = arith.addf %480, %555 : vector<8x256xf32>
    %c63 = arith.constant 63 : index
    %557 = memref.load %arg3[%c63] : memref<144xf32, #tpu.memory_space<smem>>
    %558 = vector.broadcast %557 : f32 to vector<8x256xf32>
    %559 = arith.mulf %5, %558 : vector<8x256xf32>
    %c64 = arith.constant 64 : index
    %560 = memref.load %arg3[%c64] : memref<144xf32, #tpu.memory_space<smem>>
    %561 = vector.broadcast %560 : f32 to vector<8x256xf32>
    %562 = arith.mulf %9, %561 : vector<8x256xf32>
    %563 = arith.addf %559, %562 : vector<8x256xf32>
    %c65 = arith.constant 65 : index
    %564 = memref.load %arg3[%c65] : memref<144xf32, #tpu.memory_space<smem>>
    %565 = vector.broadcast %564 : f32 to vector<8x256xf32>
    %566 = arith.mulf %13, %565 : vector<8x256xf32>
    %567 = arith.addf %563, %566 : vector<8x256xf32>
    %c66 = arith.constant 66 : index
    %568 = memref.load %arg3[%c66] : memref<144xf32, #tpu.memory_space<smem>>
    %569 = vector.broadcast %568 : f32 to vector<8x256xf32>
    %570 = arith.mulf %17, %569 : vector<8x256xf32>
    %571 = arith.addf %567, %570 : vector<8x256xf32>
    %c67 = arith.constant 67 : index
    %572 = memref.load %arg3[%c67] : memref<144xf32, #tpu.memory_space<smem>>
    %573 = vector.broadcast %572 : f32 to vector<8x256xf32>
    %574 = arith.mulf %1, %573 : vector<8x256xf32>
    %575 = arith.addf %571, %574 : vector<8x256xf32>
    %c68 = arith.constant 68 : index
    %576 = memref.load %arg3[%c68] : memref<144xf32, #tpu.memory_space<smem>>
    %577 = vector.broadcast %576 : f32 to vector<8x256xf32>
    %578 = arith.mulf %21, %577 : vector<8x256xf32>
    %579 = arith.addf %575, %578 : vector<8x256xf32>
    %c69 = arith.constant 69 : index
    %580 = memref.load %arg3[%c69] : memref<144xf32, #tpu.memory_space<smem>>
    %581 = vector.broadcast %580 : f32 to vector<8x256xf32>
    %582 = arith.mulf %25, %581 : vector<8x256xf32>
    %583 = arith.addf %579, %582 : vector<8x256xf32>
    %c70 = arith.constant 70 : index
    %584 = memref.load %arg3[%c70] : memref<144xf32, #tpu.memory_space<smem>>
    %585 = vector.broadcast %584 : f32 to vector<8x256xf32>
    %586 = arith.mulf %29, %585 : vector<8x256xf32>
    %587 = arith.addf %583, %586 : vector<8x256xf32>
    %c71 = arith.constant 71 : index
    %588 = memref.load %arg3[%c71] : memref<144xf32, #tpu.memory_space<smem>>
    %589 = vector.broadcast %588 : f32 to vector<8x256xf32>
    %590 = arith.mulf %33, %589 : vector<8x256xf32>
    %591 = arith.addf %587, %590 : vector<8x256xf32>
    %c7_103 = arith.constant 7 : index
    %592 = memref.load %arg4[%c7_103] : memref<16xf32, #tpu.memory_space<smem>>
    %593 = vector.broadcast %592 : f32 to vector<8x256xf32>
    %594 = arith.addf %591, %593 : vector<8x256xf32>
    %cst_104 = arith.constant 0.000000e+00 : f32
    %595 = vector.broadcast %cst_104 : f32 to vector<8x256xf32>
    %596 = arith.maximumf %594, %595 : vector<8x256xf32>
    %c63_105 = arith.constant 63 : index
    %597 = memref.load %arg5[%c63_105] : memref<144xf32, #tpu.memory_space<smem>>
    %598 = vector.broadcast %597 : f32 to vector<8x256xf32>
    %599 = arith.mulf %596, %598 : vector<8x256xf32>
    %600 = arith.addf %524, %599 : vector<8x256xf32>
    %c64_106 = arith.constant 64 : index
    %601 = memref.load %arg5[%c64_106] : memref<144xf32, #tpu.memory_space<smem>>
    %602 = vector.broadcast %601 : f32 to vector<8x256xf32>
    %603 = arith.mulf %596, %602 : vector<8x256xf32>
    %604 = arith.addf %528, %603 : vector<8x256xf32>
    %c65_107 = arith.constant 65 : index
    %605 = memref.load %arg5[%c65_107] : memref<144xf32, #tpu.memory_space<smem>>
    %606 = vector.broadcast %605 : f32 to vector<8x256xf32>
    %607 = arith.mulf %596, %606 : vector<8x256xf32>
    %608 = arith.addf %532, %607 : vector<8x256xf32>
    %c66_108 = arith.constant 66 : index
    %609 = memref.load %arg5[%c66_108] : memref<144xf32, #tpu.memory_space<smem>>
    %610 = vector.broadcast %609 : f32 to vector<8x256xf32>
    %611 = arith.mulf %596, %610 : vector<8x256xf32>
    %612 = arith.addf %536, %611 : vector<8x256xf32>
    %c67_109 = arith.constant 67 : index
    %613 = memref.load %arg5[%c67_109] : memref<144xf32, #tpu.memory_space<smem>>
    %614 = vector.broadcast %613 : f32 to vector<8x256xf32>
    %615 = arith.mulf %596, %614 : vector<8x256xf32>
    %616 = arith.addf %540, %615 : vector<8x256xf32>
    %c68_110 = arith.constant 68 : index
    %617 = memref.load %arg5[%c68_110] : memref<144xf32, #tpu.memory_space<smem>>
    %618 = vector.broadcast %617 : f32 to vector<8x256xf32>
    %619 = arith.mulf %596, %618 : vector<8x256xf32>
    %620 = arith.addf %544, %619 : vector<8x256xf32>
    %c69_111 = arith.constant 69 : index
    %621 = memref.load %arg5[%c69_111] : memref<144xf32, #tpu.memory_space<smem>>
    %622 = vector.broadcast %621 : f32 to vector<8x256xf32>
    %623 = arith.mulf %596, %622 : vector<8x256xf32>
    %624 = arith.addf %548, %623 : vector<8x256xf32>
    %c70_112 = arith.constant 70 : index
    %625 = memref.load %arg5[%c70_112] : memref<144xf32, #tpu.memory_space<smem>>
    %626 = vector.broadcast %625 : f32 to vector<8x256xf32>
    %627 = arith.mulf %596, %626 : vector<8x256xf32>
    %628 = arith.addf %552, %627 : vector<8x256xf32>
    %c71_113 = arith.constant 71 : index
    %629 = memref.load %arg5[%c71_113] : memref<144xf32, #tpu.memory_space<smem>>
    %630 = vector.broadcast %629 : f32 to vector<8x256xf32>
    %631 = arith.mulf %596, %630 : vector<8x256xf32>
    %632 = arith.addf %556, %631 : vector<8x256xf32>
    %c72 = arith.constant 72 : index
    %633 = memref.load %arg3[%c72] : memref<144xf32, #tpu.memory_space<smem>>
    %634 = vector.broadcast %633 : f32 to vector<8x256xf32>
    %635 = arith.mulf %5, %634 : vector<8x256xf32>
    %c73 = arith.constant 73 : index
    %636 = memref.load %arg3[%c73] : memref<144xf32, #tpu.memory_space<smem>>
    %637 = vector.broadcast %636 : f32 to vector<8x256xf32>
    %638 = arith.mulf %9, %637 : vector<8x256xf32>
    %639 = arith.addf %635, %638 : vector<8x256xf32>
    %c74 = arith.constant 74 : index
    %640 = memref.load %arg3[%c74] : memref<144xf32, #tpu.memory_space<smem>>
    %641 = vector.broadcast %640 : f32 to vector<8x256xf32>
    %642 = arith.mulf %13, %641 : vector<8x256xf32>
    %643 = arith.addf %639, %642 : vector<8x256xf32>
    %c75 = arith.constant 75 : index
    %644 = memref.load %arg3[%c75] : memref<144xf32, #tpu.memory_space<smem>>
    %645 = vector.broadcast %644 : f32 to vector<8x256xf32>
    %646 = arith.mulf %17, %645 : vector<8x256xf32>
    %647 = arith.addf %643, %646 : vector<8x256xf32>
    %c76 = arith.constant 76 : index
    %648 = memref.load %arg3[%c76] : memref<144xf32, #tpu.memory_space<smem>>
    %649 = vector.broadcast %648 : f32 to vector<8x256xf32>
    %650 = arith.mulf %1, %649 : vector<8x256xf32>
    %651 = arith.addf %647, %650 : vector<8x256xf32>
    %c77 = arith.constant 77 : index
    %652 = memref.load %arg3[%c77] : memref<144xf32, #tpu.memory_space<smem>>
    %653 = vector.broadcast %652 : f32 to vector<8x256xf32>
    %654 = arith.mulf %21, %653 : vector<8x256xf32>
    %655 = arith.addf %651, %654 : vector<8x256xf32>
    %c78 = arith.constant 78 : index
    %656 = memref.load %arg3[%c78] : memref<144xf32, #tpu.memory_space<smem>>
    %657 = vector.broadcast %656 : f32 to vector<8x256xf32>
    %658 = arith.mulf %25, %657 : vector<8x256xf32>
    %659 = arith.addf %655, %658 : vector<8x256xf32>
    %c79 = arith.constant 79 : index
    %660 = memref.load %arg3[%c79] : memref<144xf32, #tpu.memory_space<smem>>
    %661 = vector.broadcast %660 : f32 to vector<8x256xf32>
    %662 = arith.mulf %29, %661 : vector<8x256xf32>
    %663 = arith.addf %659, %662 : vector<8x256xf32>
    %c80 = arith.constant 80 : index
    %664 = memref.load %arg3[%c80] : memref<144xf32, #tpu.memory_space<smem>>
    %665 = vector.broadcast %664 : f32 to vector<8x256xf32>
    %666 = arith.mulf %33, %665 : vector<8x256xf32>
    %667 = arith.addf %663, %666 : vector<8x256xf32>
    %c8_114 = arith.constant 8 : index
    %668 = memref.load %arg4[%c8_114] : memref<16xf32, #tpu.memory_space<smem>>
    %669 = vector.broadcast %668 : f32 to vector<8x256xf32>
    %670 = arith.addf %667, %669 : vector<8x256xf32>
    %cst_115 = arith.constant 0.000000e+00 : f32
    %671 = vector.broadcast %cst_115 : f32 to vector<8x256xf32>
    %672 = arith.maximumf %670, %671 : vector<8x256xf32>
    %c72_116 = arith.constant 72 : index
    %673 = memref.load %arg5[%c72_116] : memref<144xf32, #tpu.memory_space<smem>>
    %674 = vector.broadcast %673 : f32 to vector<8x256xf32>
    %675 = arith.mulf %672, %674 : vector<8x256xf32>
    %676 = arith.addf %600, %675 : vector<8x256xf32>
    %c73_117 = arith.constant 73 : index
    %677 = memref.load %arg5[%c73_117] : memref<144xf32, #tpu.memory_space<smem>>
    %678 = vector.broadcast %677 : f32 to vector<8x256xf32>
    %679 = arith.mulf %672, %678 : vector<8x256xf32>
    %680 = arith.addf %604, %679 : vector<8x256xf32>
    %c74_118 = arith.constant 74 : index
    %681 = memref.load %arg5[%c74_118] : memref<144xf32, #tpu.memory_space<smem>>
    %682 = vector.broadcast %681 : f32 to vector<8x256xf32>
    %683 = arith.mulf %672, %682 : vector<8x256xf32>
    %684 = arith.addf %608, %683 : vector<8x256xf32>
    %c75_119 = arith.constant 75 : index
    %685 = memref.load %arg5[%c75_119] : memref<144xf32, #tpu.memory_space<smem>>
    %686 = vector.broadcast %685 : f32 to vector<8x256xf32>
    %687 = arith.mulf %672, %686 : vector<8x256xf32>
    %688 = arith.addf %612, %687 : vector<8x256xf32>
    %c76_120 = arith.constant 76 : index
    %689 = memref.load %arg5[%c76_120] : memref<144xf32, #tpu.memory_space<smem>>
    %690 = vector.broadcast %689 : f32 to vector<8x256xf32>
    %691 = arith.mulf %672, %690 : vector<8x256xf32>
    %692 = arith.addf %616, %691 : vector<8x256xf32>
    %c77_121 = arith.constant 77 : index
    %693 = memref.load %arg5[%c77_121] : memref<144xf32, #tpu.memory_space<smem>>
    %694 = vector.broadcast %693 : f32 to vector<8x256xf32>
    %695 = arith.mulf %672, %694 : vector<8x256xf32>
    %696 = arith.addf %620, %695 : vector<8x256xf32>
    %c78_122 = arith.constant 78 : index
    %697 = memref.load %arg5[%c78_122] : memref<144xf32, #tpu.memory_space<smem>>
    %698 = vector.broadcast %697 : f32 to vector<8x256xf32>
    %699 = arith.mulf %672, %698 : vector<8x256xf32>
    %700 = arith.addf %624, %699 : vector<8x256xf32>
    %c79_123 = arith.constant 79 : index
    %701 = memref.load %arg5[%c79_123] : memref<144xf32, #tpu.memory_space<smem>>
    %702 = vector.broadcast %701 : f32 to vector<8x256xf32>
    %703 = arith.mulf %672, %702 : vector<8x256xf32>
    %704 = arith.addf %628, %703 : vector<8x256xf32>
    %c80_124 = arith.constant 80 : index
    %705 = memref.load %arg5[%c80_124] : memref<144xf32, #tpu.memory_space<smem>>
    %706 = vector.broadcast %705 : f32 to vector<8x256xf32>
    %707 = arith.mulf %672, %706 : vector<8x256xf32>
    %708 = arith.addf %632, %707 : vector<8x256xf32>
    %c81 = arith.constant 81 : index
    %709 = memref.load %arg3[%c81] : memref<144xf32, #tpu.memory_space<smem>>
    %710 = vector.broadcast %709 : f32 to vector<8x256xf32>
    %711 = arith.mulf %5, %710 : vector<8x256xf32>
    %c82 = arith.constant 82 : index
    %712 = memref.load %arg3[%c82] : memref<144xf32, #tpu.memory_space<smem>>
    %713 = vector.broadcast %712 : f32 to vector<8x256xf32>
    %714 = arith.mulf %9, %713 : vector<8x256xf32>
    %715 = arith.addf %711, %714 : vector<8x256xf32>
    %c83 = arith.constant 83 : index
    %716 = memref.load %arg3[%c83] : memref<144xf32, #tpu.memory_space<smem>>
    %717 = vector.broadcast %716 : f32 to vector<8x256xf32>
    %718 = arith.mulf %13, %717 : vector<8x256xf32>
    %719 = arith.addf %715, %718 : vector<8x256xf32>
    %c84 = arith.constant 84 : index
    %720 = memref.load %arg3[%c84] : memref<144xf32, #tpu.memory_space<smem>>
    %721 = vector.broadcast %720 : f32 to vector<8x256xf32>
    %722 = arith.mulf %17, %721 : vector<8x256xf32>
    %723 = arith.addf %719, %722 : vector<8x256xf32>
    %c85 = arith.constant 85 : index
    %724 = memref.load %arg3[%c85] : memref<144xf32, #tpu.memory_space<smem>>
    %725 = vector.broadcast %724 : f32 to vector<8x256xf32>
    %726 = arith.mulf %1, %725 : vector<8x256xf32>
    %727 = arith.addf %723, %726 : vector<8x256xf32>
    %c86 = arith.constant 86 : index
    %728 = memref.load %arg3[%c86] : memref<144xf32, #tpu.memory_space<smem>>
    %729 = vector.broadcast %728 : f32 to vector<8x256xf32>
    %730 = arith.mulf %21, %729 : vector<8x256xf32>
    %731 = arith.addf %727, %730 : vector<8x256xf32>
    %c87 = arith.constant 87 : index
    %732 = memref.load %arg3[%c87] : memref<144xf32, #tpu.memory_space<smem>>
    %733 = vector.broadcast %732 : f32 to vector<8x256xf32>
    %734 = arith.mulf %25, %733 : vector<8x256xf32>
    %735 = arith.addf %731, %734 : vector<8x256xf32>
    %c88 = arith.constant 88 : index
    %736 = memref.load %arg3[%c88] : memref<144xf32, #tpu.memory_space<smem>>
    %737 = vector.broadcast %736 : f32 to vector<8x256xf32>
    %738 = arith.mulf %29, %737 : vector<8x256xf32>
    %739 = arith.addf %735, %738 : vector<8x256xf32>
    %c89 = arith.constant 89 : index
    %740 = memref.load %arg3[%c89] : memref<144xf32, #tpu.memory_space<smem>>
    %741 = vector.broadcast %740 : f32 to vector<8x256xf32>
    %742 = arith.mulf %33, %741 : vector<8x256xf32>
    %743 = arith.addf %739, %742 : vector<8x256xf32>
    %c9_125 = arith.constant 9 : index
    %744 = memref.load %arg4[%c9_125] : memref<16xf32, #tpu.memory_space<smem>>
    %745 = vector.broadcast %744 : f32 to vector<8x256xf32>
    %746 = arith.addf %743, %745 : vector<8x256xf32>
    %cst_126 = arith.constant 0.000000e+00 : f32
    %747 = vector.broadcast %cst_126 : f32 to vector<8x256xf32>
    %748 = arith.maximumf %746, %747 : vector<8x256xf32>
    %c81_127 = arith.constant 81 : index
    %749 = memref.load %arg5[%c81_127] : memref<144xf32, #tpu.memory_space<smem>>
    %750 = vector.broadcast %749 : f32 to vector<8x256xf32>
    %751 = arith.mulf %748, %750 : vector<8x256xf32>
    %752 = arith.addf %676, %751 : vector<8x256xf32>
    %c82_128 = arith.constant 82 : index
    %753 = memref.load %arg5[%c82_128] : memref<144xf32, #tpu.memory_space<smem>>
    %754 = vector.broadcast %753 : f32 to vector<8x256xf32>
    %755 = arith.mulf %748, %754 : vector<8x256xf32>
    %756 = arith.addf %680, %755 : vector<8x256xf32>
    %c83_129 = arith.constant 83 : index
    %757 = memref.load %arg5[%c83_129] : memref<144xf32, #tpu.memory_space<smem>>
    %758 = vector.broadcast %757 : f32 to vector<8x256xf32>
    %759 = arith.mulf %748, %758 : vector<8x256xf32>
    %760 = arith.addf %684, %759 : vector<8x256xf32>
    %c84_130 = arith.constant 84 : index
    %761 = memref.load %arg5[%c84_130] : memref<144xf32, #tpu.memory_space<smem>>
    %762 = vector.broadcast %761 : f32 to vector<8x256xf32>
    %763 = arith.mulf %748, %762 : vector<8x256xf32>
    %764 = arith.addf %688, %763 : vector<8x256xf32>
    %c85_131 = arith.constant 85 : index
    %765 = memref.load %arg5[%c85_131] : memref<144xf32, #tpu.memory_space<smem>>
    %766 = vector.broadcast %765 : f32 to vector<8x256xf32>
    %767 = arith.mulf %748, %766 : vector<8x256xf32>
    %768 = arith.addf %692, %767 : vector<8x256xf32>
    %c86_132 = arith.constant 86 : index
    %769 = memref.load %arg5[%c86_132] : memref<144xf32, #tpu.memory_space<smem>>
    %770 = vector.broadcast %769 : f32 to vector<8x256xf32>
    %771 = arith.mulf %748, %770 : vector<8x256xf32>
    %772 = arith.addf %696, %771 : vector<8x256xf32>
    %c87_133 = arith.constant 87 : index
    %773 = memref.load %arg5[%c87_133] : memref<144xf32, #tpu.memory_space<smem>>
    %774 = vector.broadcast %773 : f32 to vector<8x256xf32>
    %775 = arith.mulf %748, %774 : vector<8x256xf32>
    %776 = arith.addf %700, %775 : vector<8x256xf32>
    %c88_134 = arith.constant 88 : index
    %777 = memref.load %arg5[%c88_134] : memref<144xf32, #tpu.memory_space<smem>>
    %778 = vector.broadcast %777 : f32 to vector<8x256xf32>
    %779 = arith.mulf %748, %778 : vector<8x256xf32>
    %780 = arith.addf %704, %779 : vector<8x256xf32>
    %c89_135 = arith.constant 89 : index
    %781 = memref.load %arg5[%c89_135] : memref<144xf32, #tpu.memory_space<smem>>
    %782 = vector.broadcast %781 : f32 to vector<8x256xf32>
    %783 = arith.mulf %748, %782 : vector<8x256xf32>
    %784 = arith.addf %708, %783 : vector<8x256xf32>
    %c90 = arith.constant 90 : index
    %785 = memref.load %arg3[%c90] : memref<144xf32, #tpu.memory_space<smem>>
    %786 = vector.broadcast %785 : f32 to vector<8x256xf32>
    %787 = arith.mulf %5, %786 : vector<8x256xf32>
    %c91 = arith.constant 91 : index
    %788 = memref.load %arg3[%c91] : memref<144xf32, #tpu.memory_space<smem>>
    %789 = vector.broadcast %788 : f32 to vector<8x256xf32>
    %790 = arith.mulf %9, %789 : vector<8x256xf32>
    %791 = arith.addf %787, %790 : vector<8x256xf32>
    %c92 = arith.constant 92 : index
    %792 = memref.load %arg3[%c92] : memref<144xf32, #tpu.memory_space<smem>>
    %793 = vector.broadcast %792 : f32 to vector<8x256xf32>
    %794 = arith.mulf %13, %793 : vector<8x256xf32>
    %795 = arith.addf %791, %794 : vector<8x256xf32>
    %c93 = arith.constant 93 : index
    %796 = memref.load %arg3[%c93] : memref<144xf32, #tpu.memory_space<smem>>
    %797 = vector.broadcast %796 : f32 to vector<8x256xf32>
    %798 = arith.mulf %17, %797 : vector<8x256xf32>
    %799 = arith.addf %795, %798 : vector<8x256xf32>
    %c94 = arith.constant 94 : index
    %800 = memref.load %arg3[%c94] : memref<144xf32, #tpu.memory_space<smem>>
    %801 = vector.broadcast %800 : f32 to vector<8x256xf32>
    %802 = arith.mulf %1, %801 : vector<8x256xf32>
    %803 = arith.addf %799, %802 : vector<8x256xf32>
    %c95 = arith.constant 95 : index
    %804 = memref.load %arg3[%c95] : memref<144xf32, #tpu.memory_space<smem>>
    %805 = vector.broadcast %804 : f32 to vector<8x256xf32>
    %806 = arith.mulf %21, %805 : vector<8x256xf32>
    %807 = arith.addf %803, %806 : vector<8x256xf32>
    %c96 = arith.constant 96 : index
    %808 = memref.load %arg3[%c96] : memref<144xf32, #tpu.memory_space<smem>>
    %809 = vector.broadcast %808 : f32 to vector<8x256xf32>
    %810 = arith.mulf %25, %809 : vector<8x256xf32>
    %811 = arith.addf %807, %810 : vector<8x256xf32>
    %c97 = arith.constant 97 : index
    %812 = memref.load %arg3[%c97] : memref<144xf32, #tpu.memory_space<smem>>
    %813 = vector.broadcast %812 : f32 to vector<8x256xf32>
    %814 = arith.mulf %29, %813 : vector<8x256xf32>
    %815 = arith.addf %811, %814 : vector<8x256xf32>
    %c98 = arith.constant 98 : index
    %816 = memref.load %arg3[%c98] : memref<144xf32, #tpu.memory_space<smem>>
    %817 = vector.broadcast %816 : f32 to vector<8x256xf32>
    %818 = arith.mulf %33, %817 : vector<8x256xf32>
    %819 = arith.addf %815, %818 : vector<8x256xf32>
    %c10_136 = arith.constant 10 : index
    %820 = memref.load %arg4[%c10_136] : memref<16xf32, #tpu.memory_space<smem>>
    %821 = vector.broadcast %820 : f32 to vector<8x256xf32>
    %822 = arith.addf %819, %821 : vector<8x256xf32>
    %cst_137 = arith.constant 0.000000e+00 : f32
    %823 = vector.broadcast %cst_137 : f32 to vector<8x256xf32>
    %824 = arith.maximumf %822, %823 : vector<8x256xf32>
    %c90_138 = arith.constant 90 : index
    %825 = memref.load %arg5[%c90_138] : memref<144xf32, #tpu.memory_space<smem>>
    %826 = vector.broadcast %825 : f32 to vector<8x256xf32>
    %827 = arith.mulf %824, %826 : vector<8x256xf32>
    %828 = arith.addf %752, %827 : vector<8x256xf32>
    %c91_139 = arith.constant 91 : index
    %829 = memref.load %arg5[%c91_139] : memref<144xf32, #tpu.memory_space<smem>>
    %830 = vector.broadcast %829 : f32 to vector<8x256xf32>
    %831 = arith.mulf %824, %830 : vector<8x256xf32>
    %832 = arith.addf %756, %831 : vector<8x256xf32>
    %c92_140 = arith.constant 92 : index
    %833 = memref.load %arg5[%c92_140] : memref<144xf32, #tpu.memory_space<smem>>
    %834 = vector.broadcast %833 : f32 to vector<8x256xf32>
    %835 = arith.mulf %824, %834 : vector<8x256xf32>
    %836 = arith.addf %760, %835 : vector<8x256xf32>
    %c93_141 = arith.constant 93 : index
    %837 = memref.load %arg5[%c93_141] : memref<144xf32, #tpu.memory_space<smem>>
    %838 = vector.broadcast %837 : f32 to vector<8x256xf32>
    %839 = arith.mulf %824, %838 : vector<8x256xf32>
    %840 = arith.addf %764, %839 : vector<8x256xf32>
    %c94_142 = arith.constant 94 : index
    %841 = memref.load %arg5[%c94_142] : memref<144xf32, #tpu.memory_space<smem>>
    %842 = vector.broadcast %841 : f32 to vector<8x256xf32>
    %843 = arith.mulf %824, %842 : vector<8x256xf32>
    %844 = arith.addf %768, %843 : vector<8x256xf32>
    %c95_143 = arith.constant 95 : index
    %845 = memref.load %arg5[%c95_143] : memref<144xf32, #tpu.memory_space<smem>>
    %846 = vector.broadcast %845 : f32 to vector<8x256xf32>
    %847 = arith.mulf %824, %846 : vector<8x256xf32>
    %848 = arith.addf %772, %847 : vector<8x256xf32>
    %c96_144 = arith.constant 96 : index
    %849 = memref.load %arg5[%c96_144] : memref<144xf32, #tpu.memory_space<smem>>
    %850 = vector.broadcast %849 : f32 to vector<8x256xf32>
    %851 = arith.mulf %824, %850 : vector<8x256xf32>
    %852 = arith.addf %776, %851 : vector<8x256xf32>
    %c97_145 = arith.constant 97 : index
    %853 = memref.load %arg5[%c97_145] : memref<144xf32, #tpu.memory_space<smem>>
    %854 = vector.broadcast %853 : f32 to vector<8x256xf32>
    %855 = arith.mulf %824, %854 : vector<8x256xf32>
    %856 = arith.addf %780, %855 : vector<8x256xf32>
    %c98_146 = arith.constant 98 : index
    %857 = memref.load %arg5[%c98_146] : memref<144xf32, #tpu.memory_space<smem>>
    %858 = vector.broadcast %857 : f32 to vector<8x256xf32>
    %859 = arith.mulf %824, %858 : vector<8x256xf32>
    %860 = arith.addf %784, %859 : vector<8x256xf32>
    %c99 = arith.constant 99 : index
    %861 = memref.load %arg3[%c99] : memref<144xf32, #tpu.memory_space<smem>>
    %862 = vector.broadcast %861 : f32 to vector<8x256xf32>
    %863 = arith.mulf %5, %862 : vector<8x256xf32>
    %c100 = arith.constant 100 : index
    %864 = memref.load %arg3[%c100] : memref<144xf32, #tpu.memory_space<smem>>
    %865 = vector.broadcast %864 : f32 to vector<8x256xf32>
    %866 = arith.mulf %9, %865 : vector<8x256xf32>
    %867 = arith.addf %863, %866 : vector<8x256xf32>
    %c101 = arith.constant 101 : index
    %868 = memref.load %arg3[%c101] : memref<144xf32, #tpu.memory_space<smem>>
    %869 = vector.broadcast %868 : f32 to vector<8x256xf32>
    %870 = arith.mulf %13, %869 : vector<8x256xf32>
    %871 = arith.addf %867, %870 : vector<8x256xf32>
    %c102 = arith.constant 102 : index
    %872 = memref.load %arg3[%c102] : memref<144xf32, #tpu.memory_space<smem>>
    %873 = vector.broadcast %872 : f32 to vector<8x256xf32>
    %874 = arith.mulf %17, %873 : vector<8x256xf32>
    %875 = arith.addf %871, %874 : vector<8x256xf32>
    %c103 = arith.constant 103 : index
    %876 = memref.load %arg3[%c103] : memref<144xf32, #tpu.memory_space<smem>>
    %877 = vector.broadcast %876 : f32 to vector<8x256xf32>
    %878 = arith.mulf %1, %877 : vector<8x256xf32>
    %879 = arith.addf %875, %878 : vector<8x256xf32>
    %c104 = arith.constant 104 : index
    %880 = memref.load %arg3[%c104] : memref<144xf32, #tpu.memory_space<smem>>
    %881 = vector.broadcast %880 : f32 to vector<8x256xf32>
    %882 = arith.mulf %21, %881 : vector<8x256xf32>
    %883 = arith.addf %879, %882 : vector<8x256xf32>
    %c105 = arith.constant 105 : index
    %884 = memref.load %arg3[%c105] : memref<144xf32, #tpu.memory_space<smem>>
    %885 = vector.broadcast %884 : f32 to vector<8x256xf32>
    %886 = arith.mulf %25, %885 : vector<8x256xf32>
    %887 = arith.addf %883, %886 : vector<8x256xf32>
    %c106 = arith.constant 106 : index
    %888 = memref.load %arg3[%c106] : memref<144xf32, #tpu.memory_space<smem>>
    %889 = vector.broadcast %888 : f32 to vector<8x256xf32>
    %890 = arith.mulf %29, %889 : vector<8x256xf32>
    %891 = arith.addf %887, %890 : vector<8x256xf32>
    %c107 = arith.constant 107 : index
    %892 = memref.load %arg3[%c107] : memref<144xf32, #tpu.memory_space<smem>>
    %893 = vector.broadcast %892 : f32 to vector<8x256xf32>
    %894 = arith.mulf %33, %893 : vector<8x256xf32>
    %895 = arith.addf %891, %894 : vector<8x256xf32>
    %c11_147 = arith.constant 11 : index
    %896 = memref.load %arg4[%c11_147] : memref<16xf32, #tpu.memory_space<smem>>
    %897 = vector.broadcast %896 : f32 to vector<8x256xf32>
    %898 = arith.addf %895, %897 : vector<8x256xf32>
    %cst_148 = arith.constant 0.000000e+00 : f32
    %899 = vector.broadcast %cst_148 : f32 to vector<8x256xf32>
    %900 = arith.maximumf %898, %899 : vector<8x256xf32>
    %c99_149 = arith.constant 99 : index
    %901 = memref.load %arg5[%c99_149] : memref<144xf32, #tpu.memory_space<smem>>
    %902 = vector.broadcast %901 : f32 to vector<8x256xf32>
    %903 = arith.mulf %900, %902 : vector<8x256xf32>
    %904 = arith.addf %828, %903 : vector<8x256xf32>
    %c100_150 = arith.constant 100 : index
    %905 = memref.load %arg5[%c100_150] : memref<144xf32, #tpu.memory_space<smem>>
    %906 = vector.broadcast %905 : f32 to vector<8x256xf32>
    %907 = arith.mulf %900, %906 : vector<8x256xf32>
    %908 = arith.addf %832, %907 : vector<8x256xf32>
    %c101_151 = arith.constant 101 : index
    %909 = memref.load %arg5[%c101_151] : memref<144xf32, #tpu.memory_space<smem>>
    %910 = vector.broadcast %909 : f32 to vector<8x256xf32>
    %911 = arith.mulf %900, %910 : vector<8x256xf32>
    %912 = arith.addf %836, %911 : vector<8x256xf32>
    %c102_152 = arith.constant 102 : index
    %913 = memref.load %arg5[%c102_152] : memref<144xf32, #tpu.memory_space<smem>>
    %914 = vector.broadcast %913 : f32 to vector<8x256xf32>
    %915 = arith.mulf %900, %914 : vector<8x256xf32>
    %916 = arith.addf %840, %915 : vector<8x256xf32>
    %c103_153 = arith.constant 103 : index
    %917 = memref.load %arg5[%c103_153] : memref<144xf32, #tpu.memory_space<smem>>
    %918 = vector.broadcast %917 : f32 to vector<8x256xf32>
    %919 = arith.mulf %900, %918 : vector<8x256xf32>
    %920 = arith.addf %844, %919 : vector<8x256xf32>
    %c104_154 = arith.constant 104 : index
    %921 = memref.load %arg5[%c104_154] : memref<144xf32, #tpu.memory_space<smem>>
    %922 = vector.broadcast %921 : f32 to vector<8x256xf32>
    %923 = arith.mulf %900, %922 : vector<8x256xf32>
    %924 = arith.addf %848, %923 : vector<8x256xf32>
    %c105_155 = arith.constant 105 : index
    %925 = memref.load %arg5[%c105_155] : memref<144xf32, #tpu.memory_space<smem>>
    %926 = vector.broadcast %925 : f32 to vector<8x256xf32>
    %927 = arith.mulf %900, %926 : vector<8x256xf32>
    %928 = arith.addf %852, %927 : vector<8x256xf32>
    %c106_156 = arith.constant 106 : index
    %929 = memref.load %arg5[%c106_156] : memref<144xf32, #tpu.memory_space<smem>>
    %930 = vector.broadcast %929 : f32 to vector<8x256xf32>
    %931 = arith.mulf %900, %930 : vector<8x256xf32>
    %932 = arith.addf %856, %931 : vector<8x256xf32>
    %c107_157 = arith.constant 107 : index
    %933 = memref.load %arg5[%c107_157] : memref<144xf32, #tpu.memory_space<smem>>
    %934 = vector.broadcast %933 : f32 to vector<8x256xf32>
    %935 = arith.mulf %900, %934 : vector<8x256xf32>
    %936 = arith.addf %860, %935 : vector<8x256xf32>
    %c108 = arith.constant 108 : index
    %937 = memref.load %arg3[%c108] : memref<144xf32, #tpu.memory_space<smem>>
    %938 = vector.broadcast %937 : f32 to vector<8x256xf32>
    %939 = arith.mulf %5, %938 : vector<8x256xf32>
    %c109 = arith.constant 109 : index
    %940 = memref.load %arg3[%c109] : memref<144xf32, #tpu.memory_space<smem>>
    %941 = vector.broadcast %940 : f32 to vector<8x256xf32>
    %942 = arith.mulf %9, %941 : vector<8x256xf32>
    %943 = arith.addf %939, %942 : vector<8x256xf32>
    %c110 = arith.constant 110 : index
    %944 = memref.load %arg3[%c110] : memref<144xf32, #tpu.memory_space<smem>>
    %945 = vector.broadcast %944 : f32 to vector<8x256xf32>
    %946 = arith.mulf %13, %945 : vector<8x256xf32>
    %947 = arith.addf %943, %946 : vector<8x256xf32>
    %c111 = arith.constant 111 : index
    %948 = memref.load %arg3[%c111] : memref<144xf32, #tpu.memory_space<smem>>
    %949 = vector.broadcast %948 : f32 to vector<8x256xf32>
    %950 = arith.mulf %17, %949 : vector<8x256xf32>
    %951 = arith.addf %947, %950 : vector<8x256xf32>
    %c112 = arith.constant 112 : index
    %952 = memref.load %arg3[%c112] : memref<144xf32, #tpu.memory_space<smem>>
    %953 = vector.broadcast %952 : f32 to vector<8x256xf32>
    %954 = arith.mulf %1, %953 : vector<8x256xf32>
    %955 = arith.addf %951, %954 : vector<8x256xf32>
    %c113 = arith.constant 113 : index
    %956 = memref.load %arg3[%c113] : memref<144xf32, #tpu.memory_space<smem>>
    %957 = vector.broadcast %956 : f32 to vector<8x256xf32>
    %958 = arith.mulf %21, %957 : vector<8x256xf32>
    %959 = arith.addf %955, %958 : vector<8x256xf32>
    %c114 = arith.constant 114 : index
    %960 = memref.load %arg3[%c114] : memref<144xf32, #tpu.memory_space<smem>>
    %961 = vector.broadcast %960 : f32 to vector<8x256xf32>
    %962 = arith.mulf %25, %961 : vector<8x256xf32>
    %963 = arith.addf %959, %962 : vector<8x256xf32>
    %c115 = arith.constant 115 : index
    %964 = memref.load %arg3[%c115] : memref<144xf32, #tpu.memory_space<smem>>
    %965 = vector.broadcast %964 : f32 to vector<8x256xf32>
    %966 = arith.mulf %29, %965 : vector<8x256xf32>
    %967 = arith.addf %963, %966 : vector<8x256xf32>
    %c116 = arith.constant 116 : index
    %968 = memref.load %arg3[%c116] : memref<144xf32, #tpu.memory_space<smem>>
    %969 = vector.broadcast %968 : f32 to vector<8x256xf32>
    %970 = arith.mulf %33, %969 : vector<8x256xf32>
    %971 = arith.addf %967, %970 : vector<8x256xf32>
    %c12_158 = arith.constant 12 : index
    %972 = memref.load %arg4[%c12_158] : memref<16xf32, #tpu.memory_space<smem>>
    %973 = vector.broadcast %972 : f32 to vector<8x256xf32>
    %974 = arith.addf %971, %973 : vector<8x256xf32>
    %cst_159 = arith.constant 0.000000e+00 : f32
    %975 = vector.broadcast %cst_159 : f32 to vector<8x256xf32>
    %976 = arith.maximumf %974, %975 : vector<8x256xf32>
    %c108_160 = arith.constant 108 : index
    %977 = memref.load %arg5[%c108_160] : memref<144xf32, #tpu.memory_space<smem>>
    %978 = vector.broadcast %977 : f32 to vector<8x256xf32>
    %979 = arith.mulf %976, %978 : vector<8x256xf32>
    %980 = arith.addf %904, %979 : vector<8x256xf32>
    %c109_161 = arith.constant 109 : index
    %981 = memref.load %arg5[%c109_161] : memref<144xf32, #tpu.memory_space<smem>>
    %982 = vector.broadcast %981 : f32 to vector<8x256xf32>
    %983 = arith.mulf %976, %982 : vector<8x256xf32>
    %984 = arith.addf %908, %983 : vector<8x256xf32>
    %c110_162 = arith.constant 110 : index
    %985 = memref.load %arg5[%c110_162] : memref<144xf32, #tpu.memory_space<smem>>
    %986 = vector.broadcast %985 : f32 to vector<8x256xf32>
    %987 = arith.mulf %976, %986 : vector<8x256xf32>
    %988 = arith.addf %912, %987 : vector<8x256xf32>
    %c111_163 = arith.constant 111 : index
    %989 = memref.load %arg5[%c111_163] : memref<144xf32, #tpu.memory_space<smem>>
    %990 = vector.broadcast %989 : f32 to vector<8x256xf32>
    %991 = arith.mulf %976, %990 : vector<8x256xf32>
    %992 = arith.addf %916, %991 : vector<8x256xf32>
    %c112_164 = arith.constant 112 : index
    %993 = memref.load %arg5[%c112_164] : memref<144xf32, #tpu.memory_space<smem>>
    %994 = vector.broadcast %993 : f32 to vector<8x256xf32>
    %995 = arith.mulf %976, %994 : vector<8x256xf32>
    %996 = arith.addf %920, %995 : vector<8x256xf32>
    %c113_165 = arith.constant 113 : index
    %997 = memref.load %arg5[%c113_165] : memref<144xf32, #tpu.memory_space<smem>>
    %998 = vector.broadcast %997 : f32 to vector<8x256xf32>
    %999 = arith.mulf %976, %998 : vector<8x256xf32>
    %1000 = arith.addf %924, %999 : vector<8x256xf32>
    %c114_166 = arith.constant 114 : index
    %1001 = memref.load %arg5[%c114_166] : memref<144xf32, #tpu.memory_space<smem>>
    %1002 = vector.broadcast %1001 : f32 to vector<8x256xf32>
    %1003 = arith.mulf %976, %1002 : vector<8x256xf32>
    %1004 = arith.addf %928, %1003 : vector<8x256xf32>
    %c115_167 = arith.constant 115 : index
    %1005 = memref.load %arg5[%c115_167] : memref<144xf32, #tpu.memory_space<smem>>
    %1006 = vector.broadcast %1005 : f32 to vector<8x256xf32>
    %1007 = arith.mulf %976, %1006 : vector<8x256xf32>
    %1008 = arith.addf %932, %1007 : vector<8x256xf32>
    %c116_168 = arith.constant 116 : index
    %1009 = memref.load %arg5[%c116_168] : memref<144xf32, #tpu.memory_space<smem>>
    %1010 = vector.broadcast %1009 : f32 to vector<8x256xf32>
    %1011 = arith.mulf %976, %1010 : vector<8x256xf32>
    %1012 = arith.addf %936, %1011 : vector<8x256xf32>
    %c117 = arith.constant 117 : index
    %1013 = memref.load %arg3[%c117] : memref<144xf32, #tpu.memory_space<smem>>
    %1014 = vector.broadcast %1013 : f32 to vector<8x256xf32>
    %1015 = arith.mulf %5, %1014 : vector<8x256xf32>
    %c118 = arith.constant 118 : index
    %1016 = memref.load %arg3[%c118] : memref<144xf32, #tpu.memory_space<smem>>
    %1017 = vector.broadcast %1016 : f32 to vector<8x256xf32>
    %1018 = arith.mulf %9, %1017 : vector<8x256xf32>
    %1019 = arith.addf %1015, %1018 : vector<8x256xf32>
    %c119 = arith.constant 119 : index
    %1020 = memref.load %arg3[%c119] : memref<144xf32, #tpu.memory_space<smem>>
    %1021 = vector.broadcast %1020 : f32 to vector<8x256xf32>
    %1022 = arith.mulf %13, %1021 : vector<8x256xf32>
    %1023 = arith.addf %1019, %1022 : vector<8x256xf32>
    %c120 = arith.constant 120 : index
    %1024 = memref.load %arg3[%c120] : memref<144xf32, #tpu.memory_space<smem>>
    %1025 = vector.broadcast %1024 : f32 to vector<8x256xf32>
    %1026 = arith.mulf %17, %1025 : vector<8x256xf32>
    %1027 = arith.addf %1023, %1026 : vector<8x256xf32>
    %c121 = arith.constant 121 : index
    %1028 = memref.load %arg3[%c121] : memref<144xf32, #tpu.memory_space<smem>>
    %1029 = vector.broadcast %1028 : f32 to vector<8x256xf32>
    %1030 = arith.mulf %1, %1029 : vector<8x256xf32>
    %1031 = arith.addf %1027, %1030 : vector<8x256xf32>
    %c122 = arith.constant 122 : index
    %1032 = memref.load %arg3[%c122] : memref<144xf32, #tpu.memory_space<smem>>
    %1033 = vector.broadcast %1032 : f32 to vector<8x256xf32>
    %1034 = arith.mulf %21, %1033 : vector<8x256xf32>
    %1035 = arith.addf %1031, %1034 : vector<8x256xf32>
    %c123 = arith.constant 123 : index
    %1036 = memref.load %arg3[%c123] : memref<144xf32, #tpu.memory_space<smem>>
    %1037 = vector.broadcast %1036 : f32 to vector<8x256xf32>
    %1038 = arith.mulf %25, %1037 : vector<8x256xf32>
    %1039 = arith.addf %1035, %1038 : vector<8x256xf32>
    %c124 = arith.constant 124 : index
    %1040 = memref.load %arg3[%c124] : memref<144xf32, #tpu.memory_space<smem>>
    %1041 = vector.broadcast %1040 : f32 to vector<8x256xf32>
    %1042 = arith.mulf %29, %1041 : vector<8x256xf32>
    %1043 = arith.addf %1039, %1042 : vector<8x256xf32>
    %c125 = arith.constant 125 : index
    %1044 = memref.load %arg3[%c125] : memref<144xf32, #tpu.memory_space<smem>>
    %1045 = vector.broadcast %1044 : f32 to vector<8x256xf32>
    %1046 = arith.mulf %33, %1045 : vector<8x256xf32>
    %1047 = arith.addf %1043, %1046 : vector<8x256xf32>
    %c13_169 = arith.constant 13 : index
    %1048 = memref.load %arg4[%c13_169] : memref<16xf32, #tpu.memory_space<smem>>
    %1049 = vector.broadcast %1048 : f32 to vector<8x256xf32>
    %1050 = arith.addf %1047, %1049 : vector<8x256xf32>
    %cst_170 = arith.constant 0.000000e+00 : f32
    %1051 = vector.broadcast %cst_170 : f32 to vector<8x256xf32>
    %1052 = arith.maximumf %1050, %1051 : vector<8x256xf32>
    %c117_171 = arith.constant 117 : index
    %1053 = memref.load %arg5[%c117_171] : memref<144xf32, #tpu.memory_space<smem>>
    %1054 = vector.broadcast %1053 : f32 to vector<8x256xf32>
    %1055 = arith.mulf %1052, %1054 : vector<8x256xf32>
    %1056 = arith.addf %980, %1055 : vector<8x256xf32>
    %c118_172 = arith.constant 118 : index
    %1057 = memref.load %arg5[%c118_172] : memref<144xf32, #tpu.memory_space<smem>>
    %1058 = vector.broadcast %1057 : f32 to vector<8x256xf32>
    %1059 = arith.mulf %1052, %1058 : vector<8x256xf32>
    %1060 = arith.addf %984, %1059 : vector<8x256xf32>
    %c119_173 = arith.constant 119 : index
    %1061 = memref.load %arg5[%c119_173] : memref<144xf32, #tpu.memory_space<smem>>
    %1062 = vector.broadcast %1061 : f32 to vector<8x256xf32>
    %1063 = arith.mulf %1052, %1062 : vector<8x256xf32>
    %1064 = arith.addf %988, %1063 : vector<8x256xf32>
    %c120_174 = arith.constant 120 : index
    %1065 = memref.load %arg5[%c120_174] : memref<144xf32, #tpu.memory_space<smem>>
    %1066 = vector.broadcast %1065 : f32 to vector<8x256xf32>
    %1067 = arith.mulf %1052, %1066 : vector<8x256xf32>
    %1068 = arith.addf %992, %1067 : vector<8x256xf32>
    %c121_175 = arith.constant 121 : index
    %1069 = memref.load %arg5[%c121_175] : memref<144xf32, #tpu.memory_space<smem>>
    %1070 = vector.broadcast %1069 : f32 to vector<8x256xf32>
    %1071 = arith.mulf %1052, %1070 : vector<8x256xf32>
    %1072 = arith.addf %996, %1071 : vector<8x256xf32>
    %c122_176 = arith.constant 122 : index
    %1073 = memref.load %arg5[%c122_176] : memref<144xf32, #tpu.memory_space<smem>>
    %1074 = vector.broadcast %1073 : f32 to vector<8x256xf32>
    %1075 = arith.mulf %1052, %1074 : vector<8x256xf32>
    %1076 = arith.addf %1000, %1075 : vector<8x256xf32>
    %c123_177 = arith.constant 123 : index
    %1077 = memref.load %arg5[%c123_177] : memref<144xf32, #tpu.memory_space<smem>>
    %1078 = vector.broadcast %1077 : f32 to vector<8x256xf32>
    %1079 = arith.mulf %1052, %1078 : vector<8x256xf32>
    %1080 = arith.addf %1004, %1079 : vector<8x256xf32>
    %c124_178 = arith.constant 124 : index
    %1081 = memref.load %arg5[%c124_178] : memref<144xf32, #tpu.memory_space<smem>>
    %1082 = vector.broadcast %1081 : f32 to vector<8x256xf32>
    %1083 = arith.mulf %1052, %1082 : vector<8x256xf32>
    %1084 = arith.addf %1008, %1083 : vector<8x256xf32>
    %c125_179 = arith.constant 125 : index
    %1085 = memref.load %arg5[%c125_179] : memref<144xf32, #tpu.memory_space<smem>>
    %1086 = vector.broadcast %1085 : f32 to vector<8x256xf32>
    %1087 = arith.mulf %1052, %1086 : vector<8x256xf32>
    %1088 = arith.addf %1012, %1087 : vector<8x256xf32>
    %c126 = arith.constant 126 : index
    %1089 = memref.load %arg3[%c126] : memref<144xf32, #tpu.memory_space<smem>>
    %1090 = vector.broadcast %1089 : f32 to vector<8x256xf32>
    %1091 = arith.mulf %5, %1090 : vector<8x256xf32>
    %c127 = arith.constant 127 : index
    %1092 = memref.load %arg3[%c127] : memref<144xf32, #tpu.memory_space<smem>>
    %1093 = vector.broadcast %1092 : f32 to vector<8x256xf32>
    %1094 = arith.mulf %9, %1093 : vector<8x256xf32>
    %1095 = arith.addf %1091, %1094 : vector<8x256xf32>
    %c128 = arith.constant 128 : index
    %1096 = memref.load %arg3[%c128] : memref<144xf32, #tpu.memory_space<smem>>
    %1097 = vector.broadcast %1096 : f32 to vector<8x256xf32>
    %1098 = arith.mulf %13, %1097 : vector<8x256xf32>
    %1099 = arith.addf %1095, %1098 : vector<8x256xf32>
    %c129 = arith.constant 129 : index
    %1100 = memref.load %arg3[%c129] : memref<144xf32, #tpu.memory_space<smem>>
    %1101 = vector.broadcast %1100 : f32 to vector<8x256xf32>
    %1102 = arith.mulf %17, %1101 : vector<8x256xf32>
    %1103 = arith.addf %1099, %1102 : vector<8x256xf32>
    %c130 = arith.constant 130 : index
    %1104 = memref.load %arg3[%c130] : memref<144xf32, #tpu.memory_space<smem>>
    %1105 = vector.broadcast %1104 : f32 to vector<8x256xf32>
    %1106 = arith.mulf %1, %1105 : vector<8x256xf32>
    %1107 = arith.addf %1103, %1106 : vector<8x256xf32>
    %c131 = arith.constant 131 : index
    %1108 = memref.load %arg3[%c131] : memref<144xf32, #tpu.memory_space<smem>>
    %1109 = vector.broadcast %1108 : f32 to vector<8x256xf32>
    %1110 = arith.mulf %21, %1109 : vector<8x256xf32>
    %1111 = arith.addf %1107, %1110 : vector<8x256xf32>
    %c132 = arith.constant 132 : index
    %1112 = memref.load %arg3[%c132] : memref<144xf32, #tpu.memory_space<smem>>
    %1113 = vector.broadcast %1112 : f32 to vector<8x256xf32>
    %1114 = arith.mulf %25, %1113 : vector<8x256xf32>
    %1115 = arith.addf %1111, %1114 : vector<8x256xf32>
    %c133 = arith.constant 133 : index
    %1116 = memref.load %arg3[%c133] : memref<144xf32, #tpu.memory_space<smem>>
    %1117 = vector.broadcast %1116 : f32 to vector<8x256xf32>
    %1118 = arith.mulf %29, %1117 : vector<8x256xf32>
    %1119 = arith.addf %1115, %1118 : vector<8x256xf32>
    %c134 = arith.constant 134 : index
    %1120 = memref.load %arg3[%c134] : memref<144xf32, #tpu.memory_space<smem>>
    %1121 = vector.broadcast %1120 : f32 to vector<8x256xf32>
    %1122 = arith.mulf %33, %1121 : vector<8x256xf32>
    %1123 = arith.addf %1119, %1122 : vector<8x256xf32>
    %c14_180 = arith.constant 14 : index
    %1124 = memref.load %arg4[%c14_180] : memref<16xf32, #tpu.memory_space<smem>>
    %1125 = vector.broadcast %1124 : f32 to vector<8x256xf32>
    %1126 = arith.addf %1123, %1125 : vector<8x256xf32>
    %cst_181 = arith.constant 0.000000e+00 : f32
    %1127 = vector.broadcast %cst_181 : f32 to vector<8x256xf32>
    %1128 = arith.maximumf %1126, %1127 : vector<8x256xf32>
    %c126_182 = arith.constant 126 : index
    %1129 = memref.load %arg5[%c126_182] : memref<144xf32, #tpu.memory_space<smem>>
    %1130 = vector.broadcast %1129 : f32 to vector<8x256xf32>
    %1131 = arith.mulf %1128, %1130 : vector<8x256xf32>
    %1132 = arith.addf %1056, %1131 : vector<8x256xf32>
    %c127_183 = arith.constant 127 : index
    %1133 = memref.load %arg5[%c127_183] : memref<144xf32, #tpu.memory_space<smem>>
    %1134 = vector.broadcast %1133 : f32 to vector<8x256xf32>
    %1135 = arith.mulf %1128, %1134 : vector<8x256xf32>
    %1136 = arith.addf %1060, %1135 : vector<8x256xf32>
    %c128_184 = arith.constant 128 : index
    %1137 = memref.load %arg5[%c128_184] : memref<144xf32, #tpu.memory_space<smem>>
    %1138 = vector.broadcast %1137 : f32 to vector<8x256xf32>
    %1139 = arith.mulf %1128, %1138 : vector<8x256xf32>
    %1140 = arith.addf %1064, %1139 : vector<8x256xf32>
    %c129_185 = arith.constant 129 : index
    %1141 = memref.load %arg5[%c129_185] : memref<144xf32, #tpu.memory_space<smem>>
    %1142 = vector.broadcast %1141 : f32 to vector<8x256xf32>
    %1143 = arith.mulf %1128, %1142 : vector<8x256xf32>
    %1144 = arith.addf %1068, %1143 : vector<8x256xf32>
    %c130_186 = arith.constant 130 : index
    %1145 = memref.load %arg5[%c130_186] : memref<144xf32, #tpu.memory_space<smem>>
    %1146 = vector.broadcast %1145 : f32 to vector<8x256xf32>
    %1147 = arith.mulf %1128, %1146 : vector<8x256xf32>
    %1148 = arith.addf %1072, %1147 : vector<8x256xf32>
    %c131_187 = arith.constant 131 : index
    %1149 = memref.load %arg5[%c131_187] : memref<144xf32, #tpu.memory_space<smem>>
    %1150 = vector.broadcast %1149 : f32 to vector<8x256xf32>
    %1151 = arith.mulf %1128, %1150 : vector<8x256xf32>
    %1152 = arith.addf %1076, %1151 : vector<8x256xf32>
    %c132_188 = arith.constant 132 : index
    %1153 = memref.load %arg5[%c132_188] : memref<144xf32, #tpu.memory_space<smem>>
    %1154 = vector.broadcast %1153 : f32 to vector<8x256xf32>
    %1155 = arith.mulf %1128, %1154 : vector<8x256xf32>
    %1156 = arith.addf %1080, %1155 : vector<8x256xf32>
    %c133_189 = arith.constant 133 : index
    %1157 = memref.load %arg5[%c133_189] : memref<144xf32, #tpu.memory_space<smem>>
    %1158 = vector.broadcast %1157 : f32 to vector<8x256xf32>
    %1159 = arith.mulf %1128, %1158 : vector<8x256xf32>
    %1160 = arith.addf %1084, %1159 : vector<8x256xf32>
    %c134_190 = arith.constant 134 : index
    %1161 = memref.load %arg5[%c134_190] : memref<144xf32, #tpu.memory_space<smem>>
    %1162 = vector.broadcast %1161 : f32 to vector<8x256xf32>
    %1163 = arith.mulf %1128, %1162 : vector<8x256xf32>
    %1164 = arith.addf %1088, %1163 : vector<8x256xf32>
    %c135 = arith.constant 135 : index
    %1165 = memref.load %arg3[%c135] : memref<144xf32, #tpu.memory_space<smem>>
    %1166 = vector.broadcast %1165 : f32 to vector<8x256xf32>
    %1167 = arith.mulf %5, %1166 : vector<8x256xf32>
    %c136 = arith.constant 136 : index
    %1168 = memref.load %arg3[%c136] : memref<144xf32, #tpu.memory_space<smem>>
    %1169 = vector.broadcast %1168 : f32 to vector<8x256xf32>
    %1170 = arith.mulf %9, %1169 : vector<8x256xf32>
    %1171 = arith.addf %1167, %1170 : vector<8x256xf32>
    %c137 = arith.constant 137 : index
    %1172 = memref.load %arg3[%c137] : memref<144xf32, #tpu.memory_space<smem>>
    %1173 = vector.broadcast %1172 : f32 to vector<8x256xf32>
    %1174 = arith.mulf %13, %1173 : vector<8x256xf32>
    %1175 = arith.addf %1171, %1174 : vector<8x256xf32>
    %c138 = arith.constant 138 : index
    %1176 = memref.load %arg3[%c138] : memref<144xf32, #tpu.memory_space<smem>>
    %1177 = vector.broadcast %1176 : f32 to vector<8x256xf32>
    %1178 = arith.mulf %17, %1177 : vector<8x256xf32>
    %1179 = arith.addf %1175, %1178 : vector<8x256xf32>
    %c139 = arith.constant 139 : index
    %1180 = memref.load %arg3[%c139] : memref<144xf32, #tpu.memory_space<smem>>
    %1181 = vector.broadcast %1180 : f32 to vector<8x256xf32>
    %1182 = arith.mulf %1, %1181 : vector<8x256xf32>
    %1183 = arith.addf %1179, %1182 : vector<8x256xf32>
    %c140 = arith.constant 140 : index
    %1184 = memref.load %arg3[%c140] : memref<144xf32, #tpu.memory_space<smem>>
    %1185 = vector.broadcast %1184 : f32 to vector<8x256xf32>
    %1186 = arith.mulf %21, %1185 : vector<8x256xf32>
    %1187 = arith.addf %1183, %1186 : vector<8x256xf32>
    %c141 = arith.constant 141 : index
    %1188 = memref.load %arg3[%c141] : memref<144xf32, #tpu.memory_space<smem>>
    %1189 = vector.broadcast %1188 : f32 to vector<8x256xf32>
    %1190 = arith.mulf %25, %1189 : vector<8x256xf32>
    %1191 = arith.addf %1187, %1190 : vector<8x256xf32>
    %c142 = arith.constant 142 : index
    %1192 = memref.load %arg3[%c142] : memref<144xf32, #tpu.memory_space<smem>>
    %1193 = vector.broadcast %1192 : f32 to vector<8x256xf32>
    %1194 = arith.mulf %29, %1193 : vector<8x256xf32>
    %1195 = arith.addf %1191, %1194 : vector<8x256xf32>
    %c143 = arith.constant 143 : index
    %1196 = memref.load %arg3[%c143] : memref<144xf32, #tpu.memory_space<smem>>
    %1197 = vector.broadcast %1196 : f32 to vector<8x256xf32>
    %1198 = arith.mulf %33, %1197 : vector<8x256xf32>
    %1199 = arith.addf %1195, %1198 : vector<8x256xf32>
    %c15_191 = arith.constant 15 : index
    %1200 = memref.load %arg4[%c15_191] : memref<16xf32, #tpu.memory_space<smem>>
    %1201 = vector.broadcast %1200 : f32 to vector<8x256xf32>
    %1202 = arith.addf %1199, %1201 : vector<8x256xf32>
    %cst_192 = arith.constant 0.000000e+00 : f32
    %1203 = vector.broadcast %cst_192 : f32 to vector<8x256xf32>
    %1204 = arith.maximumf %1202, %1203 : vector<8x256xf32>
    %c135_193 = arith.constant 135 : index
    %1205 = memref.load %arg5[%c135_193] : memref<144xf32, #tpu.memory_space<smem>>
    %1206 = vector.broadcast %1205 : f32 to vector<8x256xf32>
    %1207 = arith.mulf %1204, %1206 : vector<8x256xf32>
    %1208 = arith.addf %1132, %1207 : vector<8x256xf32>
    %c136_194 = arith.constant 136 : index
    %1209 = memref.load %arg5[%c136_194] : memref<144xf32, #tpu.memory_space<smem>>
    %1210 = vector.broadcast %1209 : f32 to vector<8x256xf32>
    %1211 = arith.mulf %1204, %1210 : vector<8x256xf32>
    %1212 = arith.addf %1136, %1211 : vector<8x256xf32>
    %c137_195 = arith.constant 137 : index
    %1213 = memref.load %arg5[%c137_195] : memref<144xf32, #tpu.memory_space<smem>>
    %1214 = vector.broadcast %1213 : f32 to vector<8x256xf32>
    %1215 = arith.mulf %1204, %1214 : vector<8x256xf32>
    %1216 = arith.addf %1140, %1215 : vector<8x256xf32>
    %c138_196 = arith.constant 138 : index
    %1217 = memref.load %arg5[%c138_196] : memref<144xf32, #tpu.memory_space<smem>>
    %1218 = vector.broadcast %1217 : f32 to vector<8x256xf32>
    %1219 = arith.mulf %1204, %1218 : vector<8x256xf32>
    %1220 = arith.addf %1144, %1219 : vector<8x256xf32>
    %c139_197 = arith.constant 139 : index
    %1221 = memref.load %arg5[%c139_197] : memref<144xf32, #tpu.memory_space<smem>>
    %1222 = vector.broadcast %1221 : f32 to vector<8x256xf32>
    %1223 = arith.mulf %1204, %1222 : vector<8x256xf32>
    %1224 = arith.addf %1148, %1223 : vector<8x256xf32>
    %c140_198 = arith.constant 140 : index
    %1225 = memref.load %arg5[%c140_198] : memref<144xf32, #tpu.memory_space<smem>>
    %1226 = vector.broadcast %1225 : f32 to vector<8x256xf32>
    %1227 = arith.mulf %1204, %1226 : vector<8x256xf32>
    %1228 = arith.addf %1152, %1227 : vector<8x256xf32>
    %c141_199 = arith.constant 141 : index
    %1229 = memref.load %arg5[%c141_199] : memref<144xf32, #tpu.memory_space<smem>>
    %1230 = vector.broadcast %1229 : f32 to vector<8x256xf32>
    %1231 = arith.mulf %1204, %1230 : vector<8x256xf32>
    %1232 = arith.addf %1156, %1231 : vector<8x256xf32>
    %c142_200 = arith.constant 142 : index
    %1233 = memref.load %arg5[%c142_200] : memref<144xf32, #tpu.memory_space<smem>>
    %1234 = vector.broadcast %1233 : f32 to vector<8x256xf32>
    %1235 = arith.mulf %1204, %1234 : vector<8x256xf32>
    %1236 = arith.addf %1160, %1235 : vector<8x256xf32>
    %c143_201 = arith.constant 143 : index
    %1237 = memref.load %arg5[%c143_201] : memref<144xf32, #tpu.memory_space<smem>>
    %1238 = vector.broadcast %1237 : f32 to vector<8x256xf32>
    %1239 = arith.mulf %1204, %1238 : vector<8x256xf32>
    %1240 = arith.addf %1164, %1239 : vector<8x256xf32>
    %c17_i32_202 = arith.constant 17 : i32
    %1241 = tpu.dynamic_rotate %1208 by %c17_i32_202 dim 1 : vector<8x256xf32>, i32 -> vector<8x256xf32>
    %c0_203 = arith.constant 0 : index
    %c0_204 = arith.constant 0 : index
    %c0_205 = arith.constant 0 : index
    %1242 = vector.load %arg2[%c0_203, %c0_204, %c0_205] : memref<9x8x256xf32, #tpu.memory_space<vmem>>, vector<1x8x256xf32>
    %1243 = vector.shape_cast %1242 : vector<1x8x256xf32> to vector<8x256xf32>
    %1244 = arith.mulf %1241, %1243 : vector<8x256xf32>
    %1245 = arith.addf %1224, %1244 : vector<8x256xf32>
    %c16_i32_206 = arith.constant 16 : i32
    %1246 = tpu.dynamic_rotate %1212 by %c16_i32_206 dim 1 : vector<8x256xf32>, i32 -> vector<8x256xf32>
    %c1_207 = arith.constant 1 : index
    %c0_208 = arith.constant 0 : index
    %c0_209 = arith.constant 0 : index
    %1247 = vector.load %arg2[%c1_207, %c0_208, %c0_209] : memref<9x8x256xf32, #tpu.memory_space<vmem>>, vector<1x8x256xf32>
    %1248 = vector.shape_cast %1247 : vector<1x8x256xf32> to vector<8x256xf32>
    %1249 = arith.mulf %1246, %1248 : vector<8x256xf32>
    %1250 = arith.addf %1245, %1249 : vector<8x256xf32>
    %c15_i32_210 = arith.constant 15 : i32
    %1251 = tpu.dynamic_rotate %1216 by %c15_i32_210 dim 1 : vector<8x256xf32>, i32 -> vector<8x256xf32>
    %c2_211 = arith.constant 2 : index
    %c0_212 = arith.constant 0 : index
    %c0_213 = arith.constant 0 : index
    %1252 = vector.load %arg2[%c2_211, %c0_212, %c0_213] : memref<9x8x256xf32, #tpu.memory_space<vmem>>, vector<1x8x256xf32>
    %1253 = vector.shape_cast %1252 : vector<1x8x256xf32> to vector<8x256xf32>
    %1254 = arith.mulf %1251, %1253 : vector<8x256xf32>
    %1255 = arith.addf %1250, %1254 : vector<8x256xf32>
    %c1_i32_214 = arith.constant 1 : i32
    %1256 = tpu.dynamic_rotate %1220 by %c1_i32_214 dim 1 : vector<8x256xf32>, i32 -> vector<8x256xf32>
    %c3_215 = arith.constant 3 : index
    %c0_216 = arith.constant 0 : index
    %c0_217 = arith.constant 0 : index
    %1257 = vector.load %arg2[%c3_215, %c0_216, %c0_217] : memref<9x8x256xf32, #tpu.memory_space<vmem>>, vector<1x8x256xf32>
    %1258 = vector.shape_cast %1257 : vector<1x8x256xf32> to vector<8x256xf32>
    %1259 = arith.mulf %1256, %1258 : vector<8x256xf32>
    %1260 = arith.addf %1255, %1259 : vector<8x256xf32>
    %c255_i32_218 = arith.constant 255 : i32
    %1261 = tpu.dynamic_rotate %1228 by %c255_i32_218 dim 1 : vector<8x256xf32>, i32 -> vector<8x256xf32>
    %c5_219 = arith.constant 5 : index
    %c0_220 = arith.constant 0 : index
    %c0_221 = arith.constant 0 : index
    %1262 = vector.load %arg2[%c5_219, %c0_220, %c0_221] : memref<9x8x256xf32, #tpu.memory_space<vmem>>, vector<1x8x256xf32>
    %1263 = vector.shape_cast %1262 : vector<1x8x256xf32> to vector<8x256xf32>
    %1264 = arith.mulf %1261, %1263 : vector<8x256xf32>
    %1265 = arith.addf %1260, %1264 : vector<8x256xf32>
    %c241_i32_222 = arith.constant 241 : i32
    %1266 = tpu.dynamic_rotate %1232 by %c241_i32_222 dim 1 : vector<8x256xf32>, i32 -> vector<8x256xf32>
    %c6_223 = arith.constant 6 : index
    %c0_224 = arith.constant 0 : index
    %c0_225 = arith.constant 0 : index
    %1267 = vector.load %arg2[%c6_223, %c0_224, %c0_225] : memref<9x8x256xf32, #tpu.memory_space<vmem>>, vector<1x8x256xf32>
    %1268 = vector.shape_cast %1267 : vector<1x8x256xf32> to vector<8x256xf32>
    %1269 = arith.mulf %1266, %1268 : vector<8x256xf32>
    %1270 = arith.addf %1265, %1269 : vector<8x256xf32>
    %c240_i32_226 = arith.constant 240 : i32
    %1271 = tpu.dynamic_rotate %1236 by %c240_i32_226 dim 1 : vector<8x256xf32>, i32 -> vector<8x256xf32>
    %c7_227 = arith.constant 7 : index
    %c0_228 = arith.constant 0 : index
    %c0_229 = arith.constant 0 : index
    %1272 = vector.load %arg2[%c7_227, %c0_228, %c0_229] : memref<9x8x256xf32, #tpu.memory_space<vmem>>, vector<1x8x256xf32>
    %1273 = vector.shape_cast %1272 : vector<1x8x256xf32> to vector<8x256xf32>
    %1274 = arith.mulf %1271, %1273 : vector<8x256xf32>
    %1275 = arith.addf %1270, %1274 : vector<8x256xf32>
    %c239_i32_230 = arith.constant 239 : i32
    %1276 = tpu.dynamic_rotate %1240 by %c239_i32_230 dim 1 : vector<8x256xf32>, i32 -> vector<8x256xf32>
    %c8_231 = arith.constant 8 : index
    %c0_232 = arith.constant 0 : index
    %c0_233 = arith.constant 0 : index
    %1277 = vector.load %arg2[%c8_231, %c0_232, %c0_233] : memref<9x8x256xf32, #tpu.memory_space<vmem>>, vector<1x8x256xf32>
    %1278 = vector.shape_cast %1277 : vector<1x8x256xf32> to vector<8x256xf32>
    %1279 = arith.mulf %1276, %1278 : vector<8x256xf32>
    %1280 = arith.addf %1275, %1279 : vector<8x256xf32>
    %1281 = vector.broadcast %0 : f32 to vector<8x256xf32>
    %1282 = arith.addf %1280, %1281 : vector<8x256xf32>
    %c0_234 = arith.constant 0 : index
    %c0_235 = arith.constant 0 : index
    %1283 = vector.load %arg7[%c0_234, %c0_235] : memref<8x256xf32, #tpu.memory_space<vmem>>, vector<8x256xf32>
    tpu.vector_store %arg7[%c0_234, %c0_235], %1282 {strides = array<i32>} : memref<8x256xf32, #tpu.memory_space<vmem>>, vector<8x256xf32>,
    return
  }
  func.func @transform_0(%arg0: i32) -> (i32, i32) {
    %c0_i32 = arith.constant 0 : i32
    %c0_i32_0 = arith.constant 0 : i32
    return %arg0, %c0_i32 : i32, i32
  }
  func.func @transform_1(%arg0: i32) -> (i32, i32, i32) {
    %c0_i32 = arith.constant 0 : i32
    %c0_i32_0 = arith.constant 0 : i32
    %c0_i32_1 = arith.constant 0 : i32
    %c0_i32_2 = arith.constant 0 : i32
    return %c0_i32, %c0_i32_0, %c0_i32_1 : i32, i32, i32
  }
  func.func @transform_2(%arg0: i32) -> i32 {
    %c0_i32 = arith.constant 0 : i32
    %c0_i32_0 = arith.constant 0 : i32
    return %c0_i32 : i32
  }
  func.func @transform_3(%arg0: i32) -> i32 {
    %c0_i32 = arith.constant 0 : i32
    %c0_i32_0 = arith.constant 0 : i32
    return %c0_i32 : i32
  }
  func.func @transform_4(%arg0: i32) -> i32 {
    %c0_i32 = arith.constant 0 : i32
    %c0_i32_0 = arith.constant 0 : i32
    return %c0_i32 : i32
  }
  func.func @transform_5(%arg0: i32) -> i32 {
    %c0_i32 = arith.constant 0 : i32
    %c0_i32_0 = arith.constant 0 : i32
    return %c0_i32 : i32
  }
  func.func @transform_6(%arg0: i32) -> (i32, i32) {
    %c0_i32 = arith.constant 0 : i32
    %c0_i32_0 = arith.constant 0 : i32
    return %arg0, %c0_i32 : i32, i32
  }
}

</mosaic_0001>

<bundles_post_ra>
// kernel: tpu_custom_call.1
= control target key start
LH: loop header
LB: loop body
LE: loop exit
PB: predicated region body
PF: predicated region fallthrough
CT: control target
= control target key end

     0   :  { %s6054_s0 = inlined_call_operand.hbm [shape: f32[16,256], index: 0, kind: input, shape index: {}]   ;;  %s6055_s1 = inlined_call_operand.hbm [shape: f32[9,8,256], index: 1, kind: input, shape index: {}]   ;;  %s6056_s2 = inlined_call_operand.vmem [shape: f32[144], index: 2, kind: input, shape index: {}]   ;;  %s6057_s3 = inlined_call_operand.vmem [shape: f32[16], index: 3, kind: input, shape index: {}]   ;;  %s6058_s4 = inlined_call_operand.vmem [shape: f32[144], index: 4, kind: input, shape index: {}]   ;;  %s6059_s5 = inlined_call_operand.<no memory space> [shape: f32[1], index: 5, kind: input, shape index: {}]   ;;  %s6060_s6 = inlined_call_operand.hbm [shape: f32[16,256], index: 6, kind: output, shape index: {}]  }
   0x1   :  { %6403 = sst [smem:[#allocation183_spill]] %s6054_s0 }
   0x2   :  { %6404 = sst [smem:[#allocation184_spill]] %s6055_s1 }
   0x3   :  { %6405 = sst [smem:[#allocation185_spill]] %s6056_s2 }
   0x4   :  { %6406 = sst [smem:[#allocation186_spill]] %s6057_s3 }
   0x5   :  { %6407 = sst [smem:[#allocation187_spill]] %s6058_s4 }
   0x6   :  { %6408 = sst [smem:[#allocation188_spill]] %s6060_s6 }
   0x7   :  { %11 = sst [smem:[#allocation2]] %s6059_s5 }
   0x8   :  { %12 = vsyncpa [#allocation4], 0 }
   0x9   :  { %14 = vsyncpa [#allocation4 + $0x1], 0 }
   0xa   :  { %15 = vsyncpa [#allocation8], 0 }
   0xb   :  { %16 = vsyncpa [#allocation6], 0 }
   0xc   :  { %17 = vsyncpa [#allocation11], 0 }
   0xd   :  { %18 = vsyncpa [#allocation5], 0 }
   0xe   :  { %20 = vsyncpa [#allocation5 + $0x1], 0  ;;  %s3079_s23 = smov 0   ;;  %s3081_s24 = smov 0  }
   0xf   :  { %s3083_s25 = smov 0   ;;  %s3085_s26 = smov 0  }
  0x10 LB: > { %6409 = sst [smem:[#allocation19_spill]] %s3011_s23  ;;  %s3103_s29 = sadd.s32 4294967295, %s3023_s26   ;;  %s3023_s26 = sphi %s3085_s26, %s7173_s26   ;;  %s3019_s25 = sphi %s3083_s25, %s7176_s25   ;;  %s3015_s24 = sphi %s3081_s24, %s7175_s24   ;;  %s3011_s23 = sphi %s3079_s23, %s7174_s23  }
  0x11   : > { %6410 = sst [smem:[#allocation20_spill]] %s3015_s24  ;;  %p2409_p0 = scmp.ge.s32.totalorder %s3023_s26, 1 }
  0x12   : > { %6411 = sst [smem:[#allocation21_spill]] %s3019_s25  ;;  %p6061_p1 = scmp.eq.s32.totalorder %s3103_s29, 0 }
  0x13   : > { %6412 = sst [smem:[#allocation22_spill]] %s3023_s26  ;;  %p188_p2 = scmp.lt.s32.totalorder %s3023_s26, 3 }
  0x14   : > { %s6413_s3 = sld [smem:[#allocation186_spill]]  ;;  %s3025_s7 = smov [#allocation7]  }
  0x15   : > { %6414 = sst [smem:[#allocation23_spill]] %s3103_s29  ;;  %p3108_p3 = pnand %p2409_p0, %p188_p2 }
  0x16   : > { %s200_s8 = sshll.u32 %s3025_s7, 4  ;;  %s6417_s2 = sld [smem:[#allocation185_spill]]  ;;  %s3115_s8 = int_to_ptr.vmem [resolvable:$true] %s200_s8 }
  0x17   : > { %s6415_s30 = scalar_select %p3108_p3, 1, 0 }
  0x18   : > { %p2753_p5 = pneg %p3108_p3  ;;  %s6418_s4 = sld [smem:[#allocation187_spill]] }
  0x1a   : > { %s225_s28 = sshll.u32 %s6413_s3, 4  ;;  %p3119_p6 = pnand %p2753_p5, %p6061_p1  ;;  %s226_s28 = int_to_ptr.vmem [resolvable:$true] %s225_s28 }
  0x1b   : > { %s2848_s16 = scalar_lea.vmem %s226_s28, 16  ;;  %p2856_p11 = scmp.lt.s32.totalorder %s226_s28, %s226_s28 }
  0x1c   : > { %s214_s12 = sshll.u32 %s6417_s2, 4  ;;  %p2849_p7 = scmp.ne.s32.totalorder %s226_s28, %s2848_s16  ;;  %s3126_s12 = int_to_ptr.vmem [resolvable:$true] %s214_s12 }
  0x1d   : > { %p2850_p8 = pneg %p3119_p6  ;;  %p2857_p12 = scmp.lt.s32.totalorder %s2848_s16, %s2848_s16 }
  0x1e   : > { %s236_s15 = sshll.u32 %s6418_s4, 4  ;;  %s237_s15 = int_to_ptr.vmem [resolvable:$true] %s236_s15 }
  0x1f   : > { %p2851_p9 = pnand %p2850_p8, %p2849_p7  ;;  %p2858_p13 = por %p2857_p12, %p2856_p11 }
  0x21   : > { %p2852_p10 = pneg %p2851_p9 }
  0x23   : > { %p2859_p0 = pnand %p2858_p13, %p2852_p10 }
  0x25   : > { %2862 = shalt.err (!%p2859_p0)
}
  0x26   : > { %s3026_s17 = smov [#allocation10]   ;;  %s2874_s18 = scalar_lea.vmem %s3115_s8, 2304 }
  0x27   : > { %2762 = dma.vmem_to_smem (!%p3119_p6), %s226_s28, 16, %s3026_s17, [#allocation11]  }
  0x28   : > { %p2875_p2 = scmp.ne.s32.totalorder %s3115_s8, %s2874_s18  ;;  %p2882_p9 = scmp.lt.s32.totalorder %s3115_s8, %s3115_s8 }
  0x29   : > { %p2883_p4 = scmp.lt.s32.totalorder %s2874_s18, %s2874_s18 }
  0x2a   : > { %p2877_p5 = pnand %p2875_p2, %p2850_p8 }
  0x2b   : > { %p2884_p11 = por %p2883_p4, %p2882_p9 }
  0x2c   : > { %p2878_p7 = pneg %p2877_p5 }
  0x2e   : > { %p2885_p10 = pnand %p2884_p11, %p2878_p7 }
  0x30   : > { %2888 = shalt.err (!%p2885_p10)
}
  0x31   : > { %s3027_s19 = smov 256   ;;  %s3028_s20 = smov 16  }
  0x32   : > { %s6419_s1 = sld [smem:[#allocation184_spill]]  ;;  %s2889_s5 = scalar_lea.vmem %s3126_s12, 32 }
  0x33   : > { %p2890_p12 = scmp.ne.s32.totalorder %s3126_s12, %s2889_s5  ;;  %p2897_p0 = scmp.lt.s32.totalorder %s3126_s12, %s3126_s12 }
  0x34   : > { %p2898_p2 = scmp.lt.s32.totalorder %s2889_s5, %s2889_s5 }
  0x35   : > { %p2892_p4 = pnand %p2890_p12, %p2850_p8 }
  0x36   : > { %p2899_p5 = por %p2898_p2, %p2897_p0 }
  0x37   : > { %p2893_p13 = pneg %p2892_p4 }
  0x38   : > { %2756 = dma.hbm_to_vmem [thread:$0]  (!%p3119_p6), %s6419_s1, 2304, %s3115_s8, [#allocation8], %s3027_s19, %s3027_s19, %s3028_s20  }
  0x39   : > { %p2900_p7 = pnand %p2899_p5, %p2893_p13 }
  0x3b   : > { %2903 = shalt.err (!%p2900_p7)
}
  0x3c   : > { %s3029_s27 = smov [#allocation9]   ;;  %s2904_s8 = scalar_lea.vmem %s237_s15, 32 }
  0x3d   : > { %2759 = dma.vmem_to_smem (!%p3119_p6), %s3126_s12, 32, %s3029_s27, [#allocation6]  }
  0x3e   : > { %p2905_p9 = scmp.ne.s32.totalorder %s237_s15, %s2904_s8  ;;  %p2912_p12 = scmp.lt.s32.totalorder %s237_s15, %s237_s15 }
  0x3f   : > { %p2913_p4 = scmp.lt.s32.totalorder %s2904_s8, %s2904_s8 }
  0x40   : > { %p2907_p11 = pnand %p2905_p9, %p2850_p8 }
  0x41   : > { %p2914_p13 = por %p2913_p4, %p2912_p12 }
  0x42   : > { %p2908_p10 = pneg %p2907_p11 }
  0x44   : > { %p2915_p0 = pnand %p2914_p13, %p2908_p10 }
  0x46   : > { %2918 = shalt.err (!%p2915_p0)
}
  0x47   : > { %s3030_s10 = smov [#allocation12]   ;;  %s2408_s11 = sadd.s32 4294967294, %s3023_s26  }
  0x48   : > { %2765 = dma.vmem_to_smem (!%p3119_p6), %s237_s15, 32, %s3030_s10, [#allocation11]  }
  0x49   : > { %s3172_s12 = sadd.s32 1, %s3023_s26   ;;  %s33_s13 = sadd.s32 1, %s3019_s25 }
  0x4a   : > { %6420 = sst [smem:[#allocation24_spill]] %s3172_s12  ;;  %s30_s9 = ssub.s32 %s3023_s26, %s3172_s12 }
  0x4b   : > { %p31_p8 = scmp.eq.s32.totalorder %s30_s9, 0  ;;  %p40_p2 = scmp.ne.s32.totalorder %s3019_s25, %s3015_s24 }
  0x4c   : > { %p41_p5 = scmp.eq.s32.totalorder %s3023_s26, 0  ;;  %p46_p7 = scmp.ne.s32.totalorder %s3015_s24, %s3011_s23 }
  0x4d   : > { %s3183_s14 = scalar_select %p31_p8, %s3019_s25, %s33_s13  }
  0x4e   : > { %p3185_p9 = por %p41_p5, %p40_p2  ;;  %p3191_p6 = por %p6061_p1, %p46_p7 }
  0x4f   : > { %6421 = sst [smem:[#allocation25_spill]] %s3183_s14  ;;  %p175_p11 = scmp.eq.s32.totalorder %s3103_s29, 1 }
  0x50   : > { %s6423_s15 = scalar_select %p3191_p6, 1, 0 }
  0x51   : > { %p181_p10 = scmp.eq.s32.totalorder %s2408_s11, 1  ;;  %p2778_p12 = scmp.lt.s32.totalorder %s3023_s26, 2 }
  0x52   : > { %s250_s17 = sand.u32 1, %s3019_s25   ;;  %p3198_p4 = por %p175_p11, %p40_p2 }
  0x53   : > { %p3202_p13 = por %p181_p10, %p46_p7  ;;  %s2415_s20 = sshll.u32 %s250_s17, 4 }
  0x54   : > { %s6424_s18 = scalar_select %p3198_p4, 1, 0 }
  0x55   : > { %s6426_s19 = scalar_select %p3202_p13, 1, 0 }
  0x56   : > { %6425 = sst [smem:[#allocation26_spill]] %s6424_s18  ;;  %s2731_s21 = sshll.u32 %s3023_s26, 8 }
  0x57   : > { %6427 = sst [smem:[#allocation27_spill]] %s6426_s19  ;;  %s254_s28 = scalar_lea.vmem [#allocation3], %s2415_s20 }
  0x58   : > { %s6428_s0 = sld [smem:[#allocation183_spill]]  ;;  %s262_s7 = sshll.u32 %s254_s28, 4  ;;  %s263_s7 = int_to_ptr.vmem [resolvable:$true] %s262_s7 }
  0x59   : > { %p3214_p0 = pnand %p2778_p12, %p3185_p9  ;;  %s251_s10 = scalar_lea.sflag [#allocation4], %s250_s17 }
  0x5b   : > { %p2921_p2 = pneg %p3214_p0 }
  0x5e   : > { %s3210_s27 = scalar_lea.hbm %s6428_s0, %s2731_s21  ;;  %s2924_s21 = scalar_lea.hbm %s6428_s0, 512 }
  0x5f   : > { %s2919_s11 = scalar_lea.hbm %s3210_s27, 256  ;;  %p2925_p11 = scmp.lt.s32.totalorder %s3210_s27, %s6428_s0 }
  0x60   : > { %p2920_p8 = scmp.ne.s32.totalorder %s3210_s27, %s2919_s11  ;;  %p2926_p9 = scmp.lt.s32.totalorder %s2924_s21, %s2919_s11 }
  0x62   : > { %p2922_p5 = pnand %p2921_p2, %p2920_p8  ;;  %p2927_p10 = por %p2926_p9, %p2925_p11 }
  0x64   : > { %p2923_p7 = pneg %p2922_p5 }
  0x66   : > { %p2928_p12 = pnand %p2927_p10, %p2923_p7 }
  0x68   : > { %2931 = shalt.err (!%p2928_p12)
}
  0x69   : > { %s2932_s16 = scalar_lea.vmem %s263_s7, 256  ;;  %s3031_s17 = smov [#allocation3]  }
  0x6a   : > { %p2933_p1 = scmp.ne.s32.totalorder %s263_s7, %s2932_s16  ;;  %s2937_s5 = sshll.u32 %s3031_s17, 4  ;;  %s2938_s5 = int_to_ptr.vmem [resolvable:$false] %s2937_s5 }
  0x6b   : > { %s2939_s28 = scalar_lea.vmem %s2938_s5, 512  ;;  %p2940_p8 = scmp.lt.s32.totalorder %s263_s7, %s2938_s5 }
  0x6c   : > { %p2935_p13 = pnand %p2933_p1, %p2921_p2  ;;  %p2941_p5 = scmp.lt.s32.totalorder %s2939_s28, %s2932_s16 }
  0x6e   : > { %p2936_p4 = pneg %p2935_p13  ;;  %p2942_p6 = por %p2941_p5, %p2940_p8 }
  0x70   : > { %p2943_p3 = pnand %p2942_p6, %p2936_p4 }
  0x72   : > { %2946 = shalt.err (!%p2943_p3)
}
  0x73   : > { %2769 = dma.hbm_to_vmem [thread:$0]  (!%p3214_p0), %s3210_s27, 256, %s263_s7, %s251_s10  }
  0x74   : > { %p6430_p7 = scmp.ne.s32.totalorder %s6415_s30, 0 }
  0x76   : > { %271 = sbr.rel (%p6430_p7) target bundleno = 1014 (0x3f6), region = 44 }
  0x7b   : > { %s3235_s11 = sand.u32 1, %s3015_s24   ;;  %p6433_p1 = scmp.ne.s32.totalorder %s6423_s15, 0 }
  0x7c   : > { %6431 = sst [smem:[#allocation28_spill]] %s3235_s11  ;;  %s6065_s9 = sshll.u32 %s3235_s11, 4 }
  0x7d   : > { %s274_s13 = scalar_lea.sflag [#allocation4], %s3235_s11  ;;  %s3241_s21 = scalar_lea.vmem [#allocation3], %s6065_s9 }
  0x7e   : > { %6432 = sst [smem:[#allocation29_spill]] %s3241_s21 }
  0x7f   : > { %2990 = dma.done.wait (%p6433_p1), %s274_s13, 256  }
  0x80   : > { %2992 = vsyncadd (%p6433_p1), %s274_s13, 4294967040  ;;  %p6434_p3 = scmp.eq.s32.totalorder %s3103_s29, 0 }
  0x82   : > { %2994 = dma.done.wait (%p6434_p3), [#allocation8], 2304   ;;  %p6435_p6 = pmov %p6434_p3 }
  0x83   : > { %p6436_p4 = pmov %p6434_p3 }
  0x84   : > { %2996 = vsyncadd (%p6435_p6), [#allocation8], 4294964992 }
  0x85   : > { %2998 = dma.done.wait (%p6436_p4), [#allocation6], 32   ;;  %p6437_p13 = pmov %p6434_p3 }
  0x86   : > { %p6438_p0 = pmov %p6434_p3 }
  0x87   : > { %3000 = vsyncadd (%p6437_p13), [#allocation6], 4294967264 }
  0x88   : > { %3002 = dma.done.wait (%p6438_p0), [#allocation11], 48   ;;  %p6439_p2 = pmov %p6438_p0 }
  0x8a   : > { %3004 = vsyncadd (%p6439_p2), [#allocation11], 4294967248 }
  0x8b   : > { %298 = sfence }
  0x8c   : > { %v3260_v0 = vld [vmem:[%s3241_s21] sm:$0xff]  ;;  %s6068_s30 = smov 16   ;;  %s6070_s15 = smov 17   ;;  %v3267_v1 = vld [vmem:[%s3241_s21 + $0x8] sm:$0xff]  ;;  %v330_v2 = vlaneseq }
  0x8d   : > { %339 = vrot.lane.b32.xlu1 %v3260_v0, %s6068_s30  ;;  %326 = vrot.lane.b32.xlu0 %v3260_v0, %s6070_s15  ;;  %s3273_s27 = sld [smem:[#allocation9]]  ;;  %s6066_s20 = smov 15   ;;  %v336_v50 = vld [vmem:[#allocation7 + $0x8] sm:$0xff]  ;;  %v347_v37 = vld [vmem:[#allocation7 + $0x10] sm:$0xff] }
  0x8e   : > { %s3275_s7 = sld [smem:[#allocation9 + $0x1]]  ;;  %s6072_s28 = smov 1   ;;  %v3468_v4 = vand.u32 127, %v330_v2 }
  0x8f   : > { %s3277_s8 = sld [smem:[#allocation9 + $0x2]]  ;;  %s6081_s3 = smov 113  }
  0x90   : > { %s3279_s10 = sld [smem:[#allocation9 + $0x3]]  ;;  %s6088_s24 = smov 112   ;;  %vm343_vm0 = vcmp.lt.s32.totalorder %v3468_v4, 16  ;;  %vm332_vm1 = vcmp.lt.s32.totalorder %v3468_v4, 17  ;;  %vm355_vm2 = vcmp.lt.s32.totalorder %v3468_v4, 15  ;;  %vm367_vm3 = vcmp.lt.s32.totalorder %v3468_v4, 1 }
  0x91   : > { %341 = vrot.lane.b32.xlu1 %v3267_v1, %s6068_s30  ;;  %328 = vrot.lane.b32.xlu0 %v3267_v1, %s6070_s15  ;;  %s3285_s22 = sld [smem:[#allocation9 + $0x4]]  ;;  %s6074_s15 = smov 127   ;;  %vm379_vm4 = vcmp.lt.s32.totalorder %v3468_v4, 127  ;;  %vm391_vm5 = vcmp.lt.s32.totalorder %v3468_v4, 113  ;;  %vm403_vm6 = vcmp.lt.s32.totalorder %v3468_v4, 112  ;;  %vm415_vm7 = vcmp.lt.s32.totalorder %v3468_v4, 111 }
  0x92   : > { %s3287_s16 = sld [smem:[#allocation9 + $0x5]]  ;;  %s6099_s23 = smov 111  }
  0x93   : > { %6440 = sst [smem:[#allocation30_spill]] %s3273_s27  ;;  %v6232_v5 = vstv %s3273_s27 }
  0x94   : > { %6441 = sst [smem:[#allocation31_spill]] %s3275_s7  ;;  %v6233_v6 = vstv %s3275_s7 }
  0x95   : > { %6442 = sst [smem:[#allocation32_spill]] %s3277_s8  ;;  %353 = vrot.lane.b32.xlu1 %v3267_v1, %s6066_s20  ;;  %351 = vrot.lane.b32.xlu0 %v3260_v0, %s6066_s20  ;;  %v6248_v7 = vstv %s3277_s8 }
  0x96   : > { %6443 = sst [smem:[#allocation33_spill]] %s3279_s10  ;;  %v440_v8 = vstv %s3279_s10 }
  0x97   : > { %6444 = sst [smem:[#allocation34_spill]] %s3285_s22  ;;  %v446_v3 = vstv %s3285_s22 }
  0x98   : > { %6445 = sst [smem:[#allocation35_spill]] %s3287_s16  ;;  %v3479_v9 = vmul.f32 %v446_v3, %v3267_v1  ;;  %v452_v11 = vstv %s3287_s16 }
  0x99   : > { %s3289_s17 = sld [smem:[#allocation9 + $0x6]]  ;;  %365 = vrot.lane.b32.xlu1 %v3267_v1, %s6072_s28  ;;  %363 = vrot.lane.b32.xlu0 %v3260_v0, %s6072_s28 }
  0x9a   : > { %s3291_s5 = sld [smem:[#allocation9 + $0x7]] }
  0x9b   : > { %s3297_s13 = sld [smem:[#allocation9 + $0x8]] }
  0x9c   : > { %s3299_s9 = sld [smem:[#allocation9 + $0x9]] }
  0x9d   : > { %s3301_s20 = sld [smem:[#allocation9 + $0xa]]  ;;  %377 = vrot.lane.b32.xlu1 %v3267_v1, %s6074_s15  ;;  %375 = vrot.lane.b32.xlu0 %v3260_v0, %s6074_s15 }
  0x9e   : > { %s3303_s30 = sld [smem:[#allocation9 + $0xb]] }
  0x9f   : > { %6446 = sst [smem:[#allocation36_spill]] %s3289_s17  ;;  %v458_v12 = vstv %s3289_s17 }
  0xa0   : > { %6447 = sst [smem:[#allocation37_spill]] %s3291_s5 }
  0xa1   : > { %6448 = sst [smem:[#allocation38_spill]] %s3297_s13  ;;  %389 = vrot.lane.b32.xlu1 %v3267_v1, %s6081_s3  ;;  %387 = vrot.lane.b32.xlu0 %v3260_v0, %s6081_s3 }
  0xa2   : > { %6449 = sst [smem:[#allocation39_spill]] %s3299_s9  ;;  %v6234_v16 = vstv %s3299_s9 }
  0xa3   : > { %6450 = sst [smem:[#allocation40_spill]] %s3301_s20  ;;  %v6235_v17 = vstv %s3301_s20 }
  0xa4   : > { %6451 = sst [smem:[#allocation41_spill]] %s3303_s30  ;;  %v6247_v18 = vstv %s3303_s30 }
  0xa5   : > { %s3309_s0 = sld [smem:[#allocation10]]  ;;  %401 = vrot.lane.b32.xlu1 %v3267_v1, %s6088_s24  ;;  %399 = vrot.lane.b32.xlu0 %v3260_v0, %s6088_s24 }
  0xa6   : > { %s3311_s1 = sld [smem:[#allocation9 + $0xc]] }
  0xa7   : > { %s3313_s28 = sld [smem:[#allocation9 + $0xd]] }
  0xa8   : > { %s3315_s2 = sld [smem:[#allocation9 + $0xe]] }
  0xa9   : > { %s3321_s4 = sld [smem:[#allocation12]]  ;;  %413 = vrot.lane.b32.xlu1 %v3267_v1, %s6099_s23  ;;  %411 = vrot.lane.b32.xlu0 %v3260_v0, %s6099_s23 }
  0xaa   : > { %s3323_s14 = sld [smem:[#allocation9 + $0xf]] }
  0xab   : > { %6452 = sst [smem:[#allocation42_spill]] %s3309_s0 }
  0xac   : > { %6453 = sst [smem:[#allocation43_spill]] %s3311_s1  ;;  %v6286_v19 = vstv %s3311_s1 }
  0xad   : > { %6454 = sst [smem:[#allocation44_spill]] %s3313_s28  ;;  %v540_v10 = vstv %s3313_s28 }
  0xae   : > { %6455 = sst [smem:[#allocation45_spill]] %s3315_s2  ;;  %v3500_v20 = vmul.f32 %v540_v10, %v3267_v1  ;;  %v6267_v21 = vstv %s3315_s2 }
  0xaf   : > { %6456 = sst [smem:[#allocation46_spill]] %s3321_s4 }
  0xb0   : > { %6457 = sst [smem:[#allocation47_spill]] %s3323_s14  ;;  %v6266_v24 = vstv %s3323_s14 }
  0xb1   : > { %s3325_s15 = sld [smem:[#allocation9 + $0x10]] }
  0xb2   : > { %s3327_s25 = sld [smem:[#allocation9 + $0x11]] }
  0xb3   : > { %s3333_s12 = sld [smem:[#allocation10 + $0x1]] }
  0xb4   : > { %s3335_s26 = sld [smem:[#allocation12 + $0x9]] }
  0xb5   : > { %s3337_s3 = sld [smem:[#allocation9 + $0x12]] }
  0xb6   : > { %s3339_s19 = sld [smem:[#allocation9 + $0x13]] }
  0xb7   : > { %6458 = sst [smem:[#allocation48_spill]] %s3325_s15 }
  0xb8   : > { %6459 = sst [smem:[#allocation49_spill]] %s3327_s25 }
  0xb9   : > { %6460 = sst [smem:[#allocation50_spill]] %s3333_s12 }
  0xba   : > { %6461 = sst [smem:[#allocation51_spill]] %s3335_s26 }
  0xbb   : > { %6462 = sst [smem:[#allocation52_spill]] %s3337_s3 }
  0xbc   : > { %6463 = sst [smem:[#allocation53_spill]] %s3339_s19 }
  0xbd   : > { %s3345_s6 = sld [smem:[#allocation9 + $0x14]] }
  0xbe   : > { %s3347_s18 = sld [smem:[#allocation9 + $0x15]] }
  0xbf   : > { %s3349_s24 = sld [smem:[#allocation9 + $0x16]] }
  0xc0   : > { %s3351_s11 = sld [smem:[#allocation9 + $0x17]] }
  0xc1   : > { %s3353_s29 = sld [smem:[#allocation9 + $0x18]] }
  0xc2   : > { %s3355_s21 = sld [smem:[#allocation9 + $0x19]] }
  0xc3   : > { %6464 = sst [smem:[#allocation54_spill]] %s3345_s6 }
  0xc4   : > { %6465 = sst [smem:[#allocation55_spill]] %s3347_s18 }
  0xc5   : > { %6466 = sst [smem:[#allocation56_spill]] %s3349_s24  ;;  %v652_v22 = vstv %s3349_s24 }
  0xc6   : > { %6467 = sst [smem:[#allocation57_spill]] %s3351_s11  ;;  %v3523_v33 = vmul.f32 %v652_v22, %v3267_v1 }
  0xc7   : > { %6468 = sst [smem:[#allocation58_spill]] %s3353_s29 }
  0xc8   : > { %6469 = sst [smem:[#allocation59_spill]] %s3355_s21 }
  0xc9   : > { %s3357_s19 = sld [smem:[#allocation9 + $0x1a]] }
  0xca   : > { %s3359_s3 = sld [smem:[#allocation10 + $0x2]] }
  0xcb   : > { %s3361_s26 = sld [smem:[#allocation12 + $0x12]] }
  0xcc   : > { %s3363_s12 = sld [smem:[#allocation9 + $0x1b]] }
  0xcd   : > { %s3365_s23 = sld [smem:[#allocation9 + $0x1c]] }
  0xce   : > { %s3367_s6 = sld [smem:[#allocation9 + $0x1d]] }
  0xcf   : > { %6470 = sst [smem:[#allocation60_spill]] %s3357_s19 }
  0xd0   : > { %6471 = sst [smem:[#allocation61_spill]] %s3359_s3 }
  0xd1   : > { %6472 = sst [smem:[#allocation62_spill]] %s3361_s26 }
  0xd2   : > { %6473 = sst [smem:[#allocation63_spill]] %s3363_s12 }
  0xd3   : > { %6474 = sst [smem:[#allocation64_spill]] %s3365_s23 }
  0xd4   : > { %6475 = sst [smem:[#allocation65_spill]] %s3367_s6 }
  0xd5   : > { %s3369_s18 = sld [smem:[#allocation9 + $0x1e]] }
  0xd6   : > { %s3371_s25 = sld [smem:[#allocation9 + $0x1f]] }
  0xd7   : > { %s3373_s11 = sld [smem:[#allocation9 + $0x20]] }
  0xd8   : > { %s3375_s29 = sld [smem:[#allocation9 + $0x21]] }
  0xd9   : > { %s3377_s21 = sld [smem:[#allocation9 + $0x22]] }
  0xda   : > { %s3379_s19 = sld [smem:[#allocation9 + $0x23]] }
  0xdb   : > { %6476 = sst [smem:[#allocation66_spill]] %s3369_s18 }
  0xdc   : > { %6477 = sst [smem:[#allocation67_spill]] %s3371_s25 }
  0xdd   : > { %6478 = sst [smem:[#allocation68_spill]] %s3373_s11 }
  0xde   : > { %6479 = sst [smem:[#allocation69_spill]] %s3375_s29 }
  0xdf   : > { %6480 = sst [smem:[#allocation70_spill]] %s3377_s21 }
  0xe0   : > { %6481 = sst [smem:[#allocation71_spill]] %s3379_s19 }
  0xe1   : > { %s3381_s3 = sld [smem:[#allocation10 + $0x3]] }
  0xe2   : > { %s3383_s26 = sld [smem:[#allocation12 + $0x1b]] }
  0xe3   : > { %s3385_s12 = sld [smem:[#allocation9 + $0x24]] }
  0xe4   : > { %s3387_s23 = sld [smem:[#allocation9 + $0x25]] }
  0xe5   : > { %s3389_s6 = sld [smem:[#allocation9 + $0x26]] }
  0xe6   : > { %s3391_s18 = sld [smem:[#allocation9 + $0x27]] }
  0xe7   : > { %6482 = sst [smem:[#allocation72_spill]] %s3381_s3 }
  0xe8   : > { %6483 = sst [smem:[#allocation73_spill]] %s3383_s26 }
  0xe9   : > { %6484 = sst [smem:[#allocation74_spill]] %s3385_s12 }
  0xea   : > { %6485 = sst [smem:[#allocation75_spill]] %s3387_s23 }
  0xeb   : > { %6486 = sst [smem:[#allocation76_spill]] %s3389_s6 }
  0xec   : > { %6487 = sst [smem:[#allocation77_spill]] %s3391_s18 }
  0xed   : > { %s3393_s25 = sld [smem:[#allocation9 + $0x28]] }
  0xee   : > { %s3395_s11 = sld [smem:[#allocation9 + $0x29]] }
  0xef   : > { %s3397_s29 = sld [smem:[#allocation9 + $0x2a]] }
  0xf0   : > { %s3399_s21 = sld [smem:[#allocation9 + $0x2b]] }
  0xf1   : > { %s3401_s19 = sld [smem:[#allocation9 + $0x2c]] }
  0xf2   : > { %s3403_s3 = sld [smem:[#allocation10 + $0x4]] }
  0xf3   : > { %6488 = sst [smem:[#allocation78_spill]] %s3393_s25 }
  0xf4   : > { %6489 = sst [smem:[#allocation79_spill]] %s3395_s11 }
  0xf5   : > { %6490 = sst [smem:[#allocation80_spill]] %s3397_s29 }
  0xf6   : > { %6491 = sst [smem:[#allocation81_spill]] %s3399_s21 }
  0xf7   : > { %6492 = sst [smem:[#allocation82_spill]] %s3401_s19 }
  0xf8   : > { %6493 = sst [smem:[#allocation83_spill]] %s3403_s3 }
  0xf9   : > { %s3405_s26 = sld [smem:[#allocation12 + $0x24]] }
  0xfa   : > { %s3407_s12 = sld [smem:[#allocation9 + $0x2d]] }
  0xfb   : > { %s3409_s23 = sld [smem:[#allocation9 + $0x2e]] }
  0xfc   : > { %s3411_s6 = sld [smem:[#allocation9 + $0x2f]] }
  0xfd   : > { %s3413_s18 = sld [smem:[#allocation9 + $0x30]] }
  0xfe   : > { %s3415_s25 = sld [smem:[#allocation9 + $0x31]] }
  0xff   : > { %6494 = sst [smem:[#allocation84_spill]] %s3405_s26  ;;  %v340_v15 = vpop.permute.xlu1 %339  ;;  %v327_v26 = vpop.permute.xlu0 %326 }
 0x100   : > { %6495 = sst [smem:[#allocation85_spill]] %s3407_s12 }
 0x101   : > { %6496 = sst [smem:[#allocation86_spill]] %s3409_s23 }
 0x102   : > { %6497 = sst [smem:[#allocation87_spill]] %s3411_s6 }
 0x103   : > { %6498 = sst [smem:[#allocation88_spill]] %s3413_s18  ;;  %v329_v25 = vpop.permute.xlu0 %328 }
 0x104   : > { %6499 = sst [smem:[#allocation89_spill]] %s3415_s25  ;;  %v6204_v58 = vstv %s3415_s25  ;;  %v333_v61 = vsel %vm332_vm1, %v327_v26, %v329_v25  ;;  %v334_v27 = vsel %vm332_vm1, %v329_v25, %v327_v26  ;;  %v335_v25 = vld [vmem:[#allocation7] sm:$0xff] }
 0x105   : > { %s3417_s11 = sld [smem:[#allocation9 + $0x32]]  ;;  %v3589_v51 = vmul.f32 %v6204_v58, %v3267_v1  ;;  %v342_v58 = vpop.permute.xlu1 %341 }
 0x106   : > { %s3419_s29 = sld [smem:[#allocation9 + $0x33]]  ;;  %v344_v49 = vsel %vm343_vm0, %v340_v15, %v342_v58 }
 0x107   : > { %s3421_s21 = sld [smem:[#allocation9 + $0x34]] }
 0x108   : > { %s3423_s19 = sld [smem:[#allocation9 + $0x35]] }
 0x109   : > { %s3425_s3 = sld [smem:[#allocation10 + $0x5]] }
 0x10a   : > { %s3427_s26 = sld [smem:[#allocation12 + $0x2d]] }
 0x10b   : > { %6500 = sst [smem:[#allocation90_spill]] %s3417_s11 }
 0x10c   : > { %6501 = sst [smem:[#allocation91_spill]] %s3419_s29 }
 0x10d   : > { %6502 = sst [smem:[#allocation92_spill]] %s3421_s21 }
 0x10e   : > { %6503 = sst [smem:[#allocation93_spill]] %s3423_s19 }
 0x10f   : > { %6504 = sst [smem:[#allocation94_spill]] %s3425_s3 }
 0x110   : > { %6505 = sst [smem:[#allocation95_spill]] %s3427_s26 }
 0x111   : > { %s3429_s12 = sld [smem:[#allocation9 + $0x36]] }
 0x112   : > { %s3431_s23 = sld [smem:[#allocation9 + $0x37]] }
 0x113   : > { %s3433_s6 = sld [smem:[#allocation9 + $0x38]] }
 0x114   : > { %s3435_s18 = sld [smem:[#allocation9 + $0x39]] }
 0x115   : > { %s3437_s11 = sld [smem:[#allocation9 + $0x3a]] }
 0x116   : > { %s3439_s29 = sld [smem:[#allocation9 + $0x3b]] }
 0x117   : > { %6506 = sst [smem:[#allocation96_spill]] %s3429_s12 }
 0x118   : > { %6507 = sst [smem:[#allocation97_spill]] %s3431_s23 }
 0x119   : > { %6508 = sst [smem:[#allocation98_spill]] %s3433_s6 }
 0x11a   : > { %6509 = sst [smem:[#allocation99_spill]] %s3435_s18 }
 0x11b   : > { %6510 = sst [smem:[#allocation100_spill]] %s3437_s11  ;;  %v6208_v39 = vstv %s3437_s11 }
 0x11c   : > { %6511 = sst [smem:[#allocation101_spill]] %s3439_s29  ;;  %v3613_v28 = vmul.f32 %v6208_v39, %v3267_v1  ;;  %v3667_v39 = vmul.f32 %v446_v3, %v3260_v0  ;;  %v3684_v3 = vmul.f32 %v652_v22, %v3260_v0  ;;  %v345_v22 = vsel %vm343_vm0, %v342_v58, %v340_v15 }
 0x11d   : > { %s3441_s21 = sld [smem:[#allocation9 + $0x3c]]  ;;  %v3715_v58 = vmul.f32 %v347_v37, %v345_v22 }
 0x11e   : > { %s3443_s19 = sld [smem:[#allocation9 + $0x3d]] }
 0x11f   : > { %s3445_s26 = sld [smem:[#allocation9 + $0x3e]] }
 0x120   : > { %s3447_s12 = sld [smem:[#allocation10 + $0x6]] }
 0x121   : > { %s3449_s23 = sld [smem:[#allocation12 + $0x36]] }
 0x122   : > { %s3451_s6 = sld [smem:[#allocation9 + $0x3f]] }
 0x123   : > { %6512 = sst [smem:[#allocation102_spill]] %s3441_s21 }
 0x124   : > { %6513 = sst [smem:[#allocation103_spill]] %s3443_s19 }
 0x125   : > { %6514 = sst [smem:[#allocation104_spill]] %s3445_s26 }
 0x126   : > { %6515 = sst [smem:[#allocation105_spill]] %s3447_s12 }
 0x127   : > { %6516 = sst [smem:[#allocation106_spill]] %s3449_s23 }
 0x128   : > { %6517 = sst [smem:[#allocation107_spill]] %s3451_s6 }
 0x129   : > { %s3453_s18 = sld [smem:[#allocation9 + $0x40]] }
 0x12a   : > { %s3455_s29 = sld [smem:[#allocation9 + $0x41]] }
 0x12b   : > { %s3457_s21 = sld [smem:[#allocation9 + $0x42]] }
 0x12c   : > { %s3459_s26 = sld [smem:[#allocation9 + $0x43]] }
 0x12d   : > { %s3461_s12 = sld [smem:[#allocation9 + $0x44]] }
 0x12e   : > { %s3464_s23 = sld [smem:[#allocation9 + $0x45]] }
 0x12f   : > { %6518 = sst [smem:[#allocation108_spill]] %s3453_s18 }
 0x130   : > { %6519 = sst [smem:[#allocation109_spill]] %s3455_s29 }
 0x131   : > { %6520 = sst [smem:[#allocation110_spill]] %s3457_s21 }
 0x132   : > { %6521 = sst [smem:[#allocation111_spill]] %s3459_s26  ;;  %v6213_v23 = vstv %s3459_s26 }
 0x133   : > { %6522 = sst [smem:[#allocation112_spill]] %s3461_s12  ;;  %v3635_v63 = vmul.f32 %v6213_v23, %v3267_v1  ;;  %v348_v23 = vld [vmem:[#allocation7 + $0x18] sm:$0xff] }
 0x134   : > { %6523 = sst [smem:[#allocation113_spill]] %s3464_s23 }
 0x135   : > { %s3466_s6 = sld [smem:[#allocation9 + $0x46]] }
 0x136   : > { %s3472_s21 = sld [smem:[#allocation9 + $0x47]] }
 0x137   : > { %s3488_s8 = sld [smem:[#allocation12 + $0x3f]] }
 0x138   : > { %s6531_s22 = sld [smem:[#allocation52_spill]] }
 0x139   : > { %s3494_s23 = sld [smem:[#allocation9 + $0x48]] }
 0x13a   : > { %s6535_s17 = sld [smem:[#allocation55_spill]] }
 0x13b   : > { %6524 = sst [smem:[#allocation114_spill]] %s3466_s6 }
 0x13c   : > { %6525 = sst [smem:[#allocation115_spill]] %s3472_s21 }
 0x13d   : > { %s3482_s6 = sld [smem:[#allocation10 + $0x7]] }
 0x13e   : > { %6528 = sst [smem:[#allocation117_spill]] %s3488_s8  ;;  %v6240_v29 = vstv %s6531_s22 }
 0x13f   : > { %s6532_s21 = sld [smem:[#allocation53_spill]] }
 0x140   : > { %6533 = sst [smem:[#allocation118_spill]] %s3494_s23  ;;  %v6252_v32 = vstv %s6535_s17 }
 0x141   : > { %s6536_s13 = sld [smem:[#allocation67_spill]] }
 0x142   : > { %s3504_s0 = sld [smem:[#allocation9 + $0x49]] }
 0x143   : > { %6526 = sst [smem:[#allocation116_spill]] %s3482_s6 }
 0x144   : > { %s6534_s6 = sld [smem:[#allocation54_spill]] }
 0x145   : > { %s6538_s5 = sld [smem:[#allocation57_spill]]  ;;  %v6246_v30 = vstv %s6532_s21 }
 0x146   : > { %s6539_s16 = sld [smem:[#allocation58_spill]] }
 0x147   : > { %s3510_s1 = sld [smem:[#allocation9 + $0x4a]]  ;;  %v764_v34 = vstv %s6536_s13 }
 0x148   : > { %6537 = sst [smem:[#allocation119_spill]] %s3504_s0  ;;  %v3545_v45 = vmul.f32 %v764_v34, %v3267_v1  ;;  %v3713_v15 = vmul.f32 %v764_v34, %v3260_v0 }
 0x149   : > { %s6545_s23 = sld [smem:[#allocation63_spill]] }
 0x14a   : > { %s6546_s2 = sld [smem:[#allocation64_spill]]  ;;  %v6245_v31 = vstv %s6534_s6 }
 0x14b   : > { %s3516_s8 = sld [smem:[#allocation9 + $0x4b]]  ;;  %v6265_v35 = vstv %s6538_s5 }
 0x14c   : > { %s6548_s0 = sld [smem:[#allocation65_spill]]  ;;  %v6260_v36 = vstv %s6539_s16 }
 0x14d   : > { %6542 = sst [smem:[#allocation120_spill]] %s3510_s1 }
 0x14e   : > { %s6549_s4 = sld [smem:[#allocation66_spill]] }
 0x14f   : > { %s6550_s7 = sld [smem:[#allocation78_spill]]  ;;  %v6243_v41 = vstv %s6545_s23 }
 0x150   : > { %s3526_s10 = sld [smem:[#allocation9 + $0x4c]]  ;;  %v6242_v42 = vstv %s6546_s2 }
 0x151   : > { %6547 = sst [smem:[#allocation121_spill]] %s3516_s8 }
 0x152   : > { %s6552_s27 = sld [smem:[#allocation68_spill]]  ;;  %v6244_v43 = vstv %s6548_s0 }
 0x153   : > { %s6553_s15 = sld [smem:[#allocation69_spill]] }
 0x154   : > { %s3532_s6 = sld [smem:[#allocation9 + $0x4d]]  ;;  %v6251_v44 = vstv %s6549_s4 }
 0x155   : > { %s6559_s24 = sld [smem:[#allocation74_spill]]  ;;  %v876_v46 = vstv %s6550_s7 }
 0x156   : > { %6551 = sst [smem:[#allocation122_spill]] %s3526_s10  ;;  %v3567_v57 = vmul.f32 %v876_v46, %v3267_v1  ;;  %v6218_v2 = vstv %s3526_s10 }
 0x157   : > { %s6560_s8 = sld [smem:[#allocation75_spill]]  ;;  %v3658_v38 = vmul.f32 %v6218_v2, %v3267_v1  ;;  %v3676_v2 = vmul.f32 %v540_v10, %v3260_v0  ;;  %v352_v10 = vpop.permute.xlu0 %351 }
 0x158   : > { %s3538_s1 = sld [smem:[#allocation9 + $0x4e]]  ;;  %v6259_v47 = vstv %s6552_s27 }
 0x159   : > { %s6562_s12 = sld [smem:[#allocation76_spill]]  ;;  %v6253_v48 = vstv %s6553_s15 }
 0x15a   : > { %6556 = sst [smem:[#allocation123_spill]] %s3532_s6 }
 0x15b   : > { %s6563_s5 = sld [smem:[#allocation77_spill]]  ;;  %v6241_v53 = vstv %s6559_s24 }
 0x15c   : > { %s3548_s9 = sld [smem:[#allocation9 + $0x4f]] }
 0x15d   : > { %s6565_s28 = sld [smem:[#allocation79_spill]]  ;;  %v6250_v54 = vstv %s6560_s8 }
 0x15e   : > { %6561 = sst [smem:[#allocation124_spill]] %s3538_s1 }
 0x15f   : > { %s3554_s0 = sld [smem:[#allocation9 + $0x50]]  ;;  %v6249_v55 = vstv %s6562_s12 }
 0x160   : > { %s6572_s23 = sld [smem:[#allocation85_spill]] }
 0x161   : > { %s3560_s1 = sld [smem:[#allocation10 + $0x8]]  ;;  %v6254_v56 = vstv %s6563_s5 }
 0x162   : > { %6564 = sst [smem:[#allocation125_spill]] %s3548_s9 }
 0x163   : > { %s3570_s17 = sld [smem:[#allocation12 + $0x48]]  ;;  %v6255_v59 = vstv %s6565_s28 }
 0x164   : > { %s3576_s12 = sld [smem:[#allocation9 + $0x51]] }
 0x165   : > { %6569 = sst [smem:[#allocation126_spill]] %s3554_s0 }
 0x166   : > { %v6258_v52 = vstv %s6572_s23  ;;  %s3582_s24 = sld [smem:[#allocation9 + $0x52]] }
 0x167   : > { %6574 = sst [smem:[#allocation127_spill]] %s3560_s1 }
 0x168   : > { %s3592_s30 = sld [smem:[#allocation9 + $0x53]] }
 0x169   : > { %6577 = sst [smem:[#allocation128_spill]] %s3570_s17 }
 0x16a   : > { %6582 = sst [smem:[#allocation129_spill]] %s3576_s12 }
 0x16b   : > { %s6590_s2 = sld [smem:[#allocation101_spill]] }
 0x16c   : > { %6586 = sst [smem:[#allocation130_spill]] %s3582_s24 }
 0x16d   : > { %s3598_s9 = sld [smem:[#allocation9 + $0x54]] }
 0x16e   : > { %6589 = sst [smem:[#allocation131_spill]] %s3592_s30 }
 0x16f   : > { %s6596_s23 = sld [smem:[#allocation107_spill]] }
 0x170   : > { %s3604_s28 = sld [smem:[#allocation9 + $0x55]] }
 0x171   : > { %s3616_s7 = sld [smem:[#allocation9 + $0x56]] }
 0x172   : > { %s6600_s3 = sld [smem:[#allocation112_spill]] }
 0x173   : > { %6592 = sst [smem:[#allocation132_spill]] %s3598_s9 }
 0x174   : > { %s6601_s14 = sld [smem:[#allocation113_spill]] }
 0x175   : > { %s6602_s8 = sld [smem:[#allocation114_spill]] }
 0x176   : > { %6597 = sst [smem:[#allocation107_spill]] %s3604_s28  ;;  %v6220_v14 = vstv %s3604_s28 }
 0x177   : > { %6599 = sst [smem:[#allocation133_spill]] %s3616_s7  ;;  %v3690_v40 = vmul.f32 %v6220_v14, %v3267_v1  ;;  %v3702_v1 = vmul.f32 %v348_v23, %v344_v49  ;;  %v3704_v14 = vmul.f32 %v336_v50, %v333_v61  ;;  %v360_v23 = vld [vmem:[#allocation7 + $0x28] sm:$0xff]  ;;  %v354_v61 = vpop.permute.xlu1 %353 }
 0x178   : > { %s6603_s5 = sld [smem:[#allocation115_spill]]  ;;  %v356_v22 = vsel %vm355_vm2, %v352_v10, %v354_v61  ;;  %v3736_v50 = vsel %vm355_vm2, %v354_v61, %v352_v10  ;;  %v372_v10 = vld [vmem:[#allocation7 + $0x38] sm:$0xff] }
 0x179   : > { %s3622_s20 = sld [smem:[#allocation9 + $0x57]]  ;;  %v426_v62 = vmul.f32 %v6232_v5, %v3704_v14  ;;  %v430_v13 = vmul.f32 %v6233_v6, %v3702_v1  ;;  %v520_v34 = vmul.f32 %v6234_v16, %v3704_v14  ;;  %v524_v37 = vmul.f32 %v6235_v17, %v3702_v1 }
 0x17a   : > { %s6607_s21 = sld [smem:[#allocation118_spill]]  ;;  %v632_v5 = vmul.f32 %v6240_v29, %v3704_v14  ;;  %v636_v6 = vmul.f32 %v6246_v30, %v3702_v1  ;;  %v3744_v16 = vmul.f32 %v335_v25, %v334_v27  ;;  %v3746_v49 = vmul.f32 %v360_v23, %v356_v22 }
 0x17b   : > { %s6608_s22 = sld [smem:[#allocation119_spill]]  ;;  %v432_v17 = vadd.f32 %v430_v13, %v426_v62  ;;  %v526_v26 = vadd.f32 %v524_v37, %v520_v34  ;;  %v744_v29 = vmul.f32 %v6243_v41, %v3704_v14  ;;  %v748_v27 = vmul.f32 %v6242_v42, %v3702_v1  ;;  %v366_v23 = vpop.permute.xlu1 %365  ;;  %v364_v13 = vpop.permute.xlu0 %363 }
 0x17c   : > { %s3628_s9 = sld [smem:[#allocation9 + $0x58]]  ;;  %v638_v61 = vadd.f32 %v636_v6, %v632_v5  ;;  %v856_v25 = vmul.f32 %v6241_v53, %v3704_v14  ;;  %v436_v62 = vmul.f32 %v6248_v7, %v3746_v49  ;;  %v530_v5 = vmul.f32 %v6247_v18, %v3746_v49  ;;  %v384_v18 = vld [vmem:[#allocation7 + $0x58] sm:$0xff] }
 0x17d   : > { %s6610_s27 = sld [smem:[#allocation120_spill]]  ;;  %v642_v6 = vmul.f32 %v6245_v31, %v3746_v49  ;;  %v754_v34 = vmul.f32 %v6244_v43, %v3746_v49  ;;  %v368_v37 = vsel %vm367_vm3, %v364_v13, %v366_v23  ;;  %v3778_v22 = vsel %vm367_vm3, %v366_v23, %v364_v13 }
 0x17e   : > { %s6611_s19 = sld [smem:[#allocation121_spill]]  ;;  %v750_v53 = vadd.f32 %v748_v27, %v744_v29  ;;  %v860_v42 = vmul.f32 %v6250_v54, %v3702_v1  ;;  %v3783_v41 = vmul.f32 %v372_v10, %v368_v37  ;;  %v438_v43 = vadd.f32 %v436_v62, %v432_v17  ;;  %v396_v54 = vld [vmem:[#allocation7 + $0x68] sm:$0xff] }
 0x17f   : > { %6604 = sst [smem:[#allocation134_spill]] %s3622_s20  ;;  %v532_v31 = vadd.f32 %v530_v5, %v526_v26  ;;  %v644_v7 = vadd.f32 %v642_v6, %v638_v61  ;;  %v866_v29 = vmul.f32 %v6249_v55, %v3746_v49  ;;  %v378_v27 = vpop.permute.xlu1 %377  ;;  %v376_v13 = vpop.permute.xlu0 %375  ;;  %v359_v55 = vld [vmem:[#allocation7 + $0x20] sm:$0xff] }
 0x180   : > { %s3638_s4 = sld [smem:[#allocation9 + $0x59]]  ;;  %v756_v60 = vadd.f32 %v754_v34, %v750_v53  ;;  %v862_v23 = vadd.f32 %v860_v42, %v856_v25  ;;  %v442_v10 = vmul.f32 %v440_v8, %v3783_v41  ;;  %v536_v37 = vmul.f32 %v6286_v19, %v3783_v41 }
 0x181   : > { %s6613_s13 = sld [smem:[#allocation124_spill]]  ;;  %v648_v17 = vmul.f32 %v6252_v32, %v3783_v41  ;;  %v760_v53 = vmul.f32 %v6251_v44, %v3783_v41  ;;  %v3804_v42 = vsel %vm379_vm4, %v376_v13, %v378_v27  ;;  %v381_v26 = vsel %vm379_vm4, %v378_v27, %v376_v13 }
 0x182   : > { %6609 = sst [smem:[#allocation135_spill]] %s3628_s9  ;;  %v868_v61 = vadd.f32 %v866_v29, %v862_v23  ;;  %v872_v25 = vmul.f32 %v6254_v56, %v3783_v41  ;;  %v3811_v62 = vmul.f32 %v384_v18, %v381_v26  ;;  %v444_v5 = vadd.f32 %v442_v10, %v438_v43 }
 0x183   : > { %s6614_s25 = sld [smem:[#allocation125_spill]]  ;;  %v538_v6 = vadd.f32 %v536_v37, %v532_v31  ;;  %v650_v44 = vadd.f32 %v648_v17, %v644_v7  ;;  %v762_v32 = vadd.f32 %v760_v53, %v756_v60  ;;  %v390_v29 = vpop.permute.xlu1 %389  ;;  %v388_v13 = vpop.permute.xlu0 %387  ;;  %v3842_v53 = vmul.f32 %v876_v46, %v3260_v0 }
 0x184   : > { %s3645_s26 = sld [smem:[#allocation10 + $0x9]]  ;;  %v874_v27 = vadd.f32 %v872_v25, %v868_v61  ;;  %v450_v18 = vadd.f32 %v3479_v9, %v444_v5  ;;  %v454_v26 = vmul.f32 %v452_v11, %v3811_v62  ;;  %v548_v31 = vmul.f32 %v6267_v21, %v3811_v62  ;;  %v408_v61 = vld [vmem:[#allocation7 + $0x78] sm:$0xff] }
 0x185   : > { %s3651_s18 = sld [smem:[#allocation12 + $0x51]]  ;;  %v544_v43 = vadd.f32 %v3500_v20, %v538_v6  ;;  %v3826_v7 = vsel %vm391_vm5, %v388_v13, %v390_v29  ;;  %v393_v60 = vsel %vm391_vm5, %v390_v29, %v388_v13  ;;  %v656_v10 = vadd.f32 %v3523_v33, %v650_v44 }
 0x186   : > { %6612 = sst [smem:[#allocation136_spill]] %s3638_s4  ;;  %v660_v9 = vmul.f32 %v6265_v35, %v3811_v62  ;;  %v3835_v20 = vmul.f32 %v359_v55, %v3736_v50  ;;  %v3837_v37 = vmul.f32 %v396_v54, %v393_v60  ;;  %v456_v17 = vadd.f32 %v454_v26, %v450_v18 }
 0x187   : > { %s6620_s11 = sld [smem:[#allocation132_spill]]  ;;  %v550_v25 = vadd.f32 %v548_v31, %v544_v43  ;;  %v768_v33 = vadd.f32 %v3545_v45, %v762_v32  ;;  %v772_v44 = vmul.f32 %v6259_v47, %v3811_v62  ;;  %v880_v55 = vadd.f32 %v3567_v57, %v874_v27  ;;  %v402_v50 = vpop.permute.xlu1 %401  ;;  %v400_v54 = vpop.permute.xlu0 %399  ;;  %v371_v43 = vld [vmem:[#allocation7 + $0x30] sm:$0xff]  ;;  %v420_v31 = vld [vmem:[#allocation7 + $0x88] sm:$0xff] }
 0x188   : > { %s3708_s17 = sld [smem:[#allocation9 + $0x5a]]  ;;  %v460_v5 = vmul.f32 %v458_v12, %v3837_v37  ;;  %v554_v6 = vmul.f32 %v6266_v24, %v3837_v37  ;;  %v662_v0 = vadd.f32 %v660_v9, %v656_v10  ;;  %v666_v46 = vmul.f32 %v6260_v36, %v3837_v37 }
 0x189   : > { %s3760_s20 = sld [smem:[#allocation9 + $0x5c]]  ;;  %v3860_v32 = vsel %vm403_vm6, %v400_v54, %v402_v50  ;;  %v405_v45 = vsel %vm403_vm6, %v402_v50, %v400_v54  ;;  %v778_v57 = vmul.f32 %v6253_v48, %v3837_v37  ;;  %v884_v27 = vmul.f32 %v6255_v59, %v3811_v62 }
 0x18a   : > { %6616 = sst [smem:[#allocation34_spill]] %s3645_s26  ;;  %v3870_v29 = vmul.f32 %v408_v61, %v405_v45  ;;  %v462_v13 = vadd.f32 %v460_v5, %v456_v17  ;;  %v774_v18 = vadd.f32 %v772_v44, %v768_v33  ;;  %v968_v26 = vmul.f32 %v6258_v52, %v3704_v14 }
 0x18b   : > { %6618 = sst [smem:[#allocation44_spill]] %s3651_s18  ;;  %v556_v60 = vadd.f32 %v554_v6, %v550_v25  ;;  %v668_v10 = vadd.f32 %v666_v46, %v662_v0  ;;  %v886_v9 = vadd.f32 %v884_v27, %v880_v55  ;;  %v414_v48 = vpop.permute.xlu1 %413  ;;  %v412_v56 = vpop.permute.xlu0 %411  ;;  %v3896_v27 = vmul.f32 %v371_v43, %v3778_v22 }
 0x18c   : > { %s3749_s18 = sld [smem:[#allocation9 + $0x5b]]  ;;  %v417_v55 = vsel %vm415_vm7, %v414_v48, %v412_v56  ;;  %v780_v6 = vadd.f32 %v778_v57, %v774_v18 }
 0x18d   : > { %s6656_s1 = sld [smem:[#allocation80_spill]] }
 0x18e   : > { %6626 = sst [smem:[#allocation56_spill]] %s3708_s17  ;;  %v1526_v30 = vstv %s3708_s17 }
 0x18f   : > { %6638 = sst [smem:[#allocation137_spill]] %s3760_s20  ;;  %v1536_v23 = vstv %s3760_s20 }
 0x190   : > { %s6657_s29 = sld [smem:[#allocation37_spill]] }
 0x191   : > { %s6658_s15 = sld [smem:[#allocation48_spill]] }
 0x192   : > { %6636 = sst [smem:[#allocation67_spill]] %s3749_s18  ;;  %v1530_v34 = vstv %s3749_s18 }
 0x193   : > { %s6659_s28 = sld [smem:[#allocation59_spill]]  ;;  %v6662_v50 = vstv %s6656_s1 }
 0x194   : > { %s6660_s16 = sld [smem:[#allocation70_spill]]  ;;  %v890_v54 = vmul.f32 %v6662_v50, %v3837_v37  ;;  %v3898_v50 = vmul.f32 %v420_v31, %v417_v55 }
 0x195   : > { %s6661_s9 = sld [smem:[#allocation81_spill]] }
 0x196   : > { %v6663_v59 = vstv %s6657_s29  ;;  %s6664_s7 = sld [smem:[#allocation86_spill]]  ;;  %v892_v0 = vadd.f32 %v890_v54, %v886_v9  ;;  %v383_v9 = vld [vmem:[#allocation7 + $0x50] sm:$0xff]  ;;  %v395_v54 = vld [vmem:[#allocation7 + $0x60] sm:$0xff] }
 0x197   : > { %v466_v61 = vmul.f32 %v6663_v59, %v3870_v29  ;;  %v6665_v17 = vstv %s6658_s15  ;;  %s6668_s10 = sld [smem:[#allocation38_spill]] }
 0x198   : > { %v560_v33 = vmul.f32 %v6665_v17, %v3870_v29  ;;  %s6669_s1 = sld [smem:[#allocation49_spill]] }
 0x199   : > { %v6666_v44 = vstv %s6659_s28  ;;  %s6670_s26 = sld [smem:[#allocation60_spill]]  ;;  %v468_v17 = vadd.f32 %v466_v61, %v462_v13 }
 0x19a   : > { %v672_v5 = vmul.f32 %v6666_v44, %v3870_v29  ;;  %v6667_v45 = vstv %s6660_s16  ;;  %s6671_s4 = sld [smem:[#allocation71_spill]]  ;;  %v562_v44 = vadd.f32 %v560_v33, %v556_v60 }
 0x19b   : > { %v784_v25 = vmul.f32 %v6667_v45, %v3870_v29  ;;  %v6672_v59 = vstv %s6661_s9  ;;  %s6673_s29 = sld [smem:[#allocation82_spill]] }
 0x19c   : > { %v896_v46 = vmul.f32 %v6672_v59, %v3870_v29  ;;  %s6674_s28 = sld [smem:[#allocation87_spill]]  ;;  %v674_v45 = vadd.f32 %v672_v5, %v668_v10  ;;  %v6676_v57 = vstv %s6664_s7 }
 0x19d   : > { %s6675_s16 = sld [smem:[#allocation88_spill]]  ;;  %v786_v52 = vadd.f32 %v784_v25, %v780_v6  ;;  %v972_v18 = vmul.f32 %v6676_v57, %v3702_v1  ;;  %v6677_v36 = vstv %s6668_s10 }
 0x19e   : > { %v898_v47 = vadd.f32 %v896_v46, %v892_v0  ;;  %v472_v59 = vmul.f32 %v6677_v36, %v3898_v50  ;;  %v6678_v22 = vstv %s6669_s1  ;;  %s6679_s9 = sld [smem:[#allocation42_spill]] }
 0x19f   : > { %v566_v43 = vmul.f32 %v6678_v22, %v3898_v50  ;;  %v6680_v31 = vstv %s6670_s26  ;;  %s6681_s15 = sld [smem:[#allocation50_spill]]  ;;  %v974_v5 = vadd.f32 %v972_v18, %v968_v26 }
 0x1a0   : > { %v678_v13 = vmul.f32 %v6680_v31, %v3898_v50  ;;  %v6682_v60 = vstv %s6671_s4  ;;  %s6683_s20 = sld [smem:[#allocation61_spill]]  ;;  %v474_v0 = vadd.f32 %v472_v59, %v468_v17  ;;  %v3925_v31 = vmul.f32 %v383_v9, %v3804_v42 }
 0x1a1   : > { %v790_v10 = vmul.f32 %v6682_v60, %v3898_v50  ;;  %v6684_v61 = vstv %s6673_s29  ;;  %s6685_s7 = sld [smem:[#allocation72_spill]]  ;;  %v568_v46 = vadd.f32 %v566_v43, %v562_v44  ;;  %v3928_v60 = vmul.f32 %v395_v54, %v3826_v7 }
 0x1a2   : > { %v902_v33 = vmul.f32 %v6684_v61, %v3898_v50  ;;  %s6686_s18 = sld [smem:[#allocation83_spill]]  ;;  %v6687_v36 = vstv %s6674_s28  ;;  %v680_v57 = vadd.f32 %v678_v13, %v674_v45 }
 0x1a3   : > { %v978_v25 = vmul.f32 %v6687_v36, %v3746_v49  ;;  %v6688_v55 = vstv %s6675_s16  ;;  %s6689_s1 = sld [smem:[#allocation90_spill]]  ;;  %v792_v22 = vadd.f32 %v790_v10, %v786_v52 }
 0x1a4   : > { %v984_v6 = vmul.f32 %v6688_v55, %v3783_v41  ;;  %s6690_s26 = sld [smem:[#allocation91_spill]]  ;;  %v904_v61 = vadd.f32 %v902_v33, %v898_v47  ;;  %v6691_v18 = vstv %s6679_s9 }
 0x1a5   : > { %v980_v26 = vadd.f32 %v978_v25, %v974_v5  ;;  %s6692_s29 = sld [smem:[#allocation96_spill]]  ;;  %v478_v36 = vadd.f32 %v6691_v18, %v474_v0  ;;  %v6693_v35 = vstv %s6681_s15 }
 0x1a6   : > { %s6694_s16 = sld [smem:[#allocation97_spill]]  ;;  %v572_v24 = vadd.f32 %v6693_v35, %v568_v46  ;;  %v6695_v55 = vstv %s6683_s20 }
 0x1a7   : > { %v684_v21 = vadd.f32 %v6695_v55, %v680_v57  ;;  %v6696_v17 = vstv %s6685_s7  ;;  %s6698_s28 = sld [smem:[#allocation46_spill]]  ;;  %v986_v42 = vadd.f32 %v984_v6, %v980_v26  ;;  %v3946_v59 = vmax.f32 %v478_v36, 0.0 }
 0x1a8   : > { %v796_v44 = vadd.f32 %v6696_v17, %v792_v22  ;;  %v6697_v45 = vstv %s6686_s18  ;;  %s6699_s4 = sld [smem:[#allocation51_spill]]  ;;  %v3948_v35 = vmax.f32 %v572_v24, 0.0 }
 0x1a9   : > { %v908_v52 = vadd.f32 %v6697_v45, %v904_v61  ;;  %v6700_v7 = vstv %s6689_s1  ;;  %s6701_s10 = sld [smem:[#allocation92_spill]]  ;;  %v3950_v43 = vmax.f32 %v684_v21, 0.0  ;;  %v992_v33 = vadd.f32 %v3589_v51, %v986_v42 }
 0x1aa   : > { %v996_v47 = vmul.f32 %v6700_v7, %v3811_v62  ;;  %v6702_v9 = vstv %s6690_s26  ;;  %s6703_s15 = sld [smem:[#allocation93_spill]]  ;;  %v3952_v13 = vmax.f32 %v796_v44, 0.0  ;;  %v3969_v21 = vsel %vm415_vm7, %v412_v56, %v414_v48 }
 0x1ab   : > { %v1002_v54 = vmul.f32 %v6702_v9, %v3837_v37  ;;  %s6704_s7 = sld [smem:[#allocation98_spill]]  ;;  %v3956_v10 = vmax.f32 %v908_v52, 0.0  ;;  %v6707_v5 = vstv %s6692_s29 }
 0x1ac   : > { %s3954_s18 = sld [smem:[#allocation9 + $0x5d]]  ;;  %v1080_v25 = vmul.f32 %v6707_v5, %v3704_v14  ;;  %v6709_v6 = vstv %s6694_s16  ;;  %v998_v26 = vadd.f32 %v996_v47, %v992_v33 }
 0x1ad   : > { %s6706_s1 = sld [smem:[#allocation62_spill]]  ;;  %v1084_v24 = vmul.f32 %v6709_v6, %v3702_v1  ;;  %v6713_v0 = vstv %s6698_s28  ;;  %v6730_v6 = vstv %s6590_s2 }
 0x1ae   : > { %s6708_s26 = sld [smem:[#allocation73_spill]]  ;;  %v484_v46 = vmul.f32 %v6713_v0, %v3946_v59  ;;  %v6714_v51 = vstv %s6699_s4  ;;  %v1004_v5 = vadd.f32 %v1002_v54, %v998_v26 }
 0x1af   : > { %s6710_s20 = sld [smem:[#allocation99_spill]]  ;;  %v578_v57 = vmul.f32 %v6714_v51, %v3948_v35  ;;  %v6715_v22 = vstv %s6701_s10  ;;  %v1086_v48 = vadd.f32 %v1084_v24, %v1080_v25  ;;  %v1108_v24 = vmul.f32 %v6730_v6, %v3811_v62 }
 0x1b0   : > { %s3965_s9 = sld [smem:[#allocation9 + $0x5e]]  ;;  %v1008_v61 = vmul.f32 %v6715_v22, %v3870_v29  ;;  %v6717_v18 = vstv %s6703_s15  ;;  %v6744_v6 = vstv %s6600_s3 }
 0x1b1   : > { %s6712_s17 = sld [smem:[#allocation84_spill]]  ;;  %v1014_v36 = vmul.f32 %v6717_v18, %v3898_v50  ;;  %v6719_v56 = vstv %s6704_s7  ;;  %v580_v17 = vadd.f32 %v578_v57, %v484_v46  ;;  %v6733_v46 = vstv %s6596_s23 }
 0x1b2   : > { %6705 = sst [smem:[#allocation78_spill]] %s3954_s18  ;;  %v1090_v55 = vmul.f32 %v6719_v56, %v3746_v49  ;;  %v1192_v51 = vmul.f32 %v6733_v46, %v3704_v14  ;;  %v1010_v54 = vadd.f32 %v1008_v61, %v1004_v5  ;;  %v1220_v46 = vmul.f32 %v6744_v6, %v3811_v62 }
 0x1b3   : > { %s3980_s16 = sld [smem:[#allocation9 + $0x5f]]  ;;  %v6722_v44 = vstv %s6706_s1 }
 0x1b4   : > { %s6718_s29 = sld [smem:[#allocation108_spill]]  ;;  %v690_v45 = vmul.f32 %v6722_v44, %v3950_v43  ;;  %v6723_v52 = vstv %s6708_s26  ;;  %v1092_v25 = vadd.f32 %v1090_v55, %v1086_v48  ;;  %v1016_v5 = vadd.f32 %v1014_v36, %v1010_v54 }
 0x1b5   : > { %s6720_s28 = sld [smem:[#allocation109_spill]]  ;;  %v802_v42 = vmul.f32 %v6723_v52, %v3952_v13  ;;  %v6725_v7 = vstv %s6710_s20  ;;  %v6749_v36 = vstv %s6610_s27 }
 0x1b6   : > { %6711 = sst [smem:[#allocation99_spill]] %s3965_s9  ;;  %v1096_v47 = vmul.f32 %v6725_v7, %v3783_v41  ;;  %v692_v0 = vadd.f32 %v690_v45, %v580_v17 }
 0x1b7   : > { %s3988_s9 = sld [smem:[#allocation9 + $0x60]]  ;;  %v6728_v9 = vstv %s6712_s17 }
 0x1b8   : > { %s6724_s10 = sld [smem:[#allocation102_spill]]  ;;  %v914_v33 = vmul.f32 %v6728_v9, %v3956_v10  ;;  %v1098_v26 = vadd.f32 %v1096_v47, %v1092_v25  ;;  %v804_v45 = vadd.f32 %v802_v42, %v692_v0 }
 0x1b9   : > { %6716 = sst [smem:[#allocation138_spill]] %s3980_s16 }
 0x1ba   : > { %s6726_s15 = sld [smem:[#allocation103_spill]]  ;;  %v6734_v57 = vstv %s6718_s29  ;;  %v1104_v25 = vadd.f32 %v3613_v28, %v1098_v26  ;;  %v1314_v28 = vmul.f32 %v6749_v36, %v3746_v49  ;;  %v916_v6 = vadd.f32 %v914_v33, %v804_v45 }
 0x1bb   : > { %s3999_s4 = sld [smem:[#allocation9 + $0x61]]  ;;  %v1196_v22 = vmul.f32 %v6734_v57, %v3702_v1  ;;  %v6735_v18 = vstv %s6720_s28  ;;  %v6745_v57 = vstv %s6607_s21  ;;  %v6757_v36 = vstv %s3532_s6 }
 0x1bc   : > { %s6729_s7 = sld [smem:[#allocation104_spill]]  ;;  %v1202_v56 = vmul.f32 %v6735_v18, %v3746_v49  ;;  %v1304_v42 = vmul.f32 %v6745_v57, %v3704_v14  ;;  %v6748_v18 = vstv %s6608_s22 }
 0x1bd   : > { %6721 = sst [smem:[#allocation139_spill]] %s3988_s9  ;;  %v1198_v9 = vadd.f32 %v1196_v22, %v1192_v51  ;;  %v6747_v51 = vstv %s6601_s14 }
 0x1be   : > { %s6731_s1 = sld [smem:[#allocation110_spill]]  ;;  %v6737_v48 = vstv %s6724_s10  ;;  %v1226_v22 = vmul.f32 %v6747_v51, %v3837_v37 }
 0x1bf   : > { %s4007_s9 = sld [smem:[#allocation9 + $0x62]]  ;;  %v1114_v55 = vmul.f32 %v6737_v48, %v3837_v37  ;;  %v1204_v0 = vadd.f32 %v1202_v56, %v1198_v9  ;;  %v1308_v48 = vmul.f32 %v6748_v18, %v3702_v1  ;;  %v6753_v9 = vstv %s6603_s5 }
 0x1c0   : > { %s4018_s17 = sld [smem:[#allocation10 + $0xa]]  ;;  %v6738_v17 = vstv %s6726_s15  ;;  %v6755_v18 = vstv %s6611_s19 }
 0x1c1   : > { %6727 = sst [smem:[#allocation140_spill]] %s3999_s4  ;;  %v1120_v44 = vmul.f32 %v6738_v17, %v3870_v29  ;;  %v1110_v17 = vadd.f32 %v1108_v24, %v1104_v25  ;;  %v1310_v51 = vadd.f32 %v1308_v48, %v1304_v42  ;;  %v6760_v42 = vstv %s3582_s24 }
 0x1c2   : > { %s4026_s26 = sld [smem:[#allocation12 + $0x5a]]  ;;  %v6741_v52 = vstv %s6729_s7  ;;  %v6762_v48 = vstv %s3592_s30 }
 0x1c3   : > { %s6740_s2 = sld [smem:[#allocation94_spill]]  ;;  %v1126_v7 = vmul.f32 %v6741_v52, %v3898_v50  ;;  %v6752_v52 = vstv %s6602_s8  ;;  %v1116_v25 = vadd.f32 %v1114_v55, %v1110_v17  ;;  %v1426_v55 = vmul.f32 %v6762_v48, %v3746_v49 }
 0x1c4   : > { %v6742_v61 = vstv %s6731_s1  ;;  %s4034_s10 = sld [smem:[#allocation9 + $0x63]]  ;;  %v1232_v56 = vmul.f32 %v6752_v52, %v3870_v29  ;;  %v6758_v52 = vstv %s3576_s12  ;;  %v6765_v17 = vstv %s6613_s13 }
 0x1c5   : > { %6732 = sst [smem:[#allocation141_spill]] %s4007_s9  ;;  %v1208_v47 = vmul.f32 %v6742_v61, %v3783_v41  ;;  %v1238_v61 = vmul.f32 %v6753_v9, %v3898_v50  ;;  %v1416_v33 = vmul.f32 %v6758_v52, %v3704_v14  ;;  %v1338_v9 = vmul.f32 %v6765_v17, %v3837_v37 }
 0x1c6   : > { %6736 = sst [smem:[#allocation142_spill]] %s4018_s17 }
 0x1c7   : > { %s4043_s7 = sld [smem:[#allocation9 + $0x64]]  ;;  %v1210_v57 = vadd.f32 %v1208_v47, %v1204_v0  ;;  %v1316_v47 = vadd.f32 %v1314_v28, %v1310_v51  ;;  %v1420_v0 = vmul.f32 %v6760_v42, %v3702_v1 }
 0x1c8   : > { %6739 = sst [smem:[#allocation143_spill]] %s4026_s26 }
 0x1c9   : > { %s4054_s3 = sld [smem:[#allocation9 + $0x65]]  ;;  %v6751_v54 = vstv %s6740_s2  ;;  %v1216_v45 = vadd.f32 %v3635_v63, %v1210_v57  ;;  %v6767_v63 = vstv %s3554_s0  ;;  %v1422_v52 = vadd.f32 %v1420_v0, %v1416_v33 }
 0x1ca   : > { %6743 = sst [smem:[#allocation144_spill]] %s4034_s10  ;;  %v1020_v26 = vadd.f32 %v6751_v54, %v1016_v5  ;;  %v1320_v5 = vmul.f32 %v6755_v18, %v3783_v41  ;;  %v1332_v54 = vmul.f32 %v6757_v36, %v3811_v62  ;;  %v6766_v18 = vstv %s6614_s25 }
 0x1cb   : > { %s4064_s14 = sld [smem:[#allocation9 + $0x66]]  ;;  %v1344_v36 = vmul.f32 %v6766_v18, %v3870_v29  ;;  %v1350_v28 = vmul.f32 %v6767_v63, %v3898_v50  ;;  %v1222_v57 = vadd.f32 %v1220_v46, %v1216_v45  ;;  %v1428_v45 = vadd.f32 %v1426_v55, %v1422_v52 }
 0x1cc   : > { %s4069_s2 = sld [smem:[#allocation9 + $0x67]]  ;;  %v4071_v24 = vmax.f32 %v1020_v26, 0.0  ;;  %v1122_v26 = vadd.f32 %v1120_v44, %v1116_v25  ;;  %v1322_v51 = vadd.f32 %v1320_v5, %v1316_v47  ;;  %v6773_v44 = vstv %s6620_s11 }
 0x1cd   : > { %6746 = sst [smem:[#allocation145_spill]] %s4043_s7  ;;  %v1432_v25 = vmul.f32 %v6773_v44, %v3783_v41  ;;  %v1228_v5 = vadd.f32 %v1226_v22, %v1222_v57  ;;  %v1528_v47 = vmul.f32 %v1526_v30, %v3704_v14  ;;  %v6356_v22 = vstv %s3954_s18 }
 0x1ce   : > { %s4079_s5 = sld [smem:[#allocation9 + $0x68]]  ;;  %v1128_v17 = vadd.f32 %v1126_v7, %v1122_v26  ;;  %v1328_v33 = vadd.f32 %v3658_v38, %v1322_v51  ;;  %v1532_v26 = vmul.f32 %v1530_v34, %v3702_v1 }
 0x1cf   : > { %6750 = sst [smem:[#allocation146_spill]] %s4054_s3  ;;  %v1234_v55 = vadd.f32 %v1232_v56, %v1228_v5  ;;  %v1434_v51 = vadd.f32 %v1432_v25, %v1428_v45 }
 0x1d0   : > { %s6759_s8 = sld [smem:[#allocation95_spill]]  ;;  %v1334_v57 = vadd.f32 %v1332_v54, %v1328_v33  ;;  %v1534_v44 = vadd.f32 %v1532_v26, %v1528_v47  ;;  %v6300_v54 = vstv %s3980_s16 }
 0x1d1   : > { %6754 = sst [smem:[#allocation147_spill]] %s4064_s14  ;;  %v1440_v56 = vadd.f32 %v3690_v40, %v1434_v51  ;;  %v6296_v51 = vstv %s4007_s9 }
 0x1d2   : > { %6756 = sst [smem:[#allocation148_spill]] %s4069_s2 }
 0x1d3   : > { %s6761_s19 = sld [smem:[#allocation133_spill]] }
 0x1d4   : > { %s6763_s27 = sld [smem:[#allocation134_spill]] }
 0x1d5   : > { %s4088_s6 = sld [smem:[#allocation9 + $0x69]] }
 0x1d6   : > { %s4099_s24 = sld [smem:[#allocation9 + $0x6a]]  ;;  %v6775_v42 = vstv %s6759_s8 }
 0x1d7   : > { %s6770_s22 = sld [smem:[#allocation105_spill]]  ;;  %v1026_v48 = vmul.f32 %v6775_v42, %v4071_v24  ;;  %v1544_v42 = vmul.f32 %v6356_v22, %v3783_v41 }
 0x1d8   : > { %s4104_s13 = sld [smem:[#allocation9 + $0x6b]] }
 0x1d9   : > { %v6776_v18 = vstv %s6761_s19  ;;  %s4115_s0 = sld [smem:[#allocation10 + $0xb]]  ;;  %v1028_v38 = vadd.f32 %v1026_v48, %v916_v6  ;;  %v1240_v6 = vadd.f32 %v1238_v61, %v1234_v55  ;;  %v1340_v48 = vadd.f32 %v1338_v9, %v1334_v57 }
 0x1da   : > { %v1444_v63 = vmul.f32 %v6776_v18, %v3811_v62  ;;  %v6777_v19 = vstv %s6763_s27  ;;  %s6779_s11 = sld [smem:[#allocation99_spill]]  ;;  %v6297_v57 = vstv %s3999_s4 }
 0x1db   : > { %6764 = sst [smem:[#allocation149_spill]] %s4088_s6  ;;  %v1450_v46 = vmul.f32 %v6777_v19, %v3837_v37  ;;  %v1538_v19 = vmul.f32 %v1536_v23, %v3746_v49 }
 0x1dc   : > { %6769 = sst [smem:[#allocation150_spill]] %s4099_s24 }
 0x1dd   : > { %s4121_s8 = sld [smem:[#allocation12 + $0x63]]  ;;  %v6781_v7 = vstv %s6770_s22  ;;  %v1540_v45 = vadd.f32 %v1538_v19, %v1534_v44  ;;  %v1556_v19 = vmul.f32 %v6300_v54, %v3811_v62 }
 0x1de   : > { %6774 = sst [smem:[#allocation151_spill]] %s4104_s13  ;;  %v1132_v0 = vadd.f32 %v6781_v7, %v1128_v17  ;;  %v1346_v7 = vadd.f32 %v1344_v36, %v1340_v48 }
 0x1df   : > { %6778 = sst [smem:[#allocation152_spill]] %s4115_s0  ;;  %v1546_v55 = vadd.f32 %v1544_v42, %v1540_v45 }
 0x1e0   : > { %s4132_s27 = sld [smem:[#allocation9 + $0x6c]]  ;;  %v4136_v52 = vmax.f32 %v1132_v0, 0.0  ;;  %v6338_v17 = vstv %s6779_s11  ;;  %v1446_v0 = vadd.f32 %v1444_v63, %v1440_v56  ;;  %v1352_v36 = vadd.f32 %v1350_v28, %v1346_v7 }
 0x1e1   : > { %s6782_s19 = sld [smem:[#allocation106_spill]]  ;;  %v6301_v7 = vstv %s4054_s3 }
 0x1e2   : > { %s6783_s25 = sld [smem:[#allocation135_spill]]  ;;  %v1452_v63 = vadd.f32 %v1450_v46, %v1446_v0 }
 0x1e3   : > { %6780 = sst [smem:[#allocation153_spill]] %s4121_s8 }
 0x1e4   : > { %s6784_s12 = sld [smem:[#allocation29_spill]] }
 0x1e5   : > { %s4134_s22 = sld [smem:[#allocation9 + $0x6d]] }
 0x1e6   : > { %s6785_s30 = sld [smem:[#allocation116_spill]] }
 0x1e7   : > { %s6786_s21 = sld [smem:[#allocation139_spill]]  ;;  %v6789_v25 = vstv %s6782_s19 }
 0x1e8   : > { %s4142_s15 = sld [smem:[#allocation9 + $0x6e]]  ;;  %v1138_v18 = vmul.f32 %v6789_v25, %v4136_v52  ;;  %v6790_v5 = vstv %s6783_s25 }
 0x1e9   : > { %s4146_s1 = sld [smem:[#allocation9 + $0x6f]]  ;;  %v1456_v33 = vmul.f32 %v6790_v5, %v3870_v29  ;;  %v1568_v5 = vmul.f32 %v6297_v57, %v3870_v29 }
 0x1ea   : > { %v4155_v47 = vld [vmem:[%s6784_s12 + $0x8] sm:$0xff]  ;;  %s6791_s18 = sld [smem:[#allocation136_spill]]  ;;  %v1140_v42 = vadd.f32 %v1138_v18, %v1028_v38  ;;  %v6336_v38 = vstv %s4034_s10 }
 0x1eb   : > { %v1550_v61 = vmul.f32 %v4155_v47, %v6338_v17  ;;  %s4160_s28 = sld [smem:[#allocation9 + $0x70]]  ;;  %v1458_v45 = vadd.f32 %v1456_v33, %v1452_v63 }
 0x1ec   : > { %v6792_v40 = vstv %s6785_s30  ;;  %s4165_s19 = sld [smem:[#allocation9 + $0x71]] }
 0x1ed   : > { %v1244_v9 = vadd.f32 %v6792_v40, %v1240_v6  ;;  %v6298_v26 = vstv %s6786_s21  ;;  %s6793_s25 = sld [smem:[#allocation127_spill]]  ;;  %v1552_v56 = vadd.f32 %v1550_v61, %v1546_v55  ;;  %v1574_v40 = vmul.f32 %v6296_v51, %v3898_v50 }
 0x1ee   : > { %6787 = sst [smem:[#allocation29_spill]] %s4142_s15  ;;  %v1562_v25 = vmul.f32 %v6298_v26, %v3837_v37  ;;  %v1640_v61 = vmul.f32 %v6336_v38, %v3704_v14 }
 0x1ef   : > { %6788 = sst [smem:[#allocation154_spill]] %s4146_s1  ;;  %v4174_v44 = vmax.f32 %v1244_v9, 0.0  ;;  %v1558_v18 = vadd.f32 %v1556_v19, %v1552_v56  ;;  %v6302_v9 = vstv %s4043_s7  ;;  %v6319_v56 = vstv %s4064_s14 }
 0x1f0   : > { %s4172_s11 = sld [smem:[#allocation9 + $0x72]]  ;;  %v6795_v6 = vstv %s6791_s18  ;;  %v1644_v63 = vmul.f32 %v6302_v9, %v3702_v1  ;;  %v1656_v26 = vmul.f32 %v6319_v56, %v3783_v41  ;;  %v6310_v9 = vstv %s4079_s5 }
 0x1f1   : > { %v1462_v48 = vmul.f32 %v6795_v6, %v3898_v50  ;;  %s4179_s30 = sld [smem:[#allocation9 + $0x73]]  ;;  %v1564_v19 = vadd.f32 %v1562_v25, %v1558_v18  ;;  %v1650_v6 = vmul.f32 %v6301_v7, %v3746_v49  ;;  %v6308_v7 = vstv %s4018_s17 }
 0x1f2   : > { %s6797_s16 = sld [smem:[#allocation117_spill]]  ;;  %v1646_v57 = vadd.f32 %v1644_v63, %v1640_v61 }
 0x1f3   : > { %s4187_s29 = sld [smem:[#allocation9 + $0x74]]  ;;  %v6799_v28 = vstv %s6793_s25  ;;  %v1570_v54 = vadd.f32 %v1568_v5, %v1564_v19  ;;  %v6324_v19 = vstv %s4026_s26 }
 0x1f4   : > { %v1356_v46 = vadd.f32 %v6799_v28, %v1352_v36  ;;  %s4195_s18 = sld [smem:[#allocation10 + $0xc]]  ;;  %v1464_v36 = vadd.f32 %v1462_v48, %v1458_v45  ;;  %v6317_v28 = vstv %s4069_s2  ;;  %v1652_v61 = vadd.f32 %v1650_v6, %v1646_v57 }
 0x1f5   : > { %s6801_s4 = sld [smem:[#allocation34_spill]] }
 0x1f6   : > { %6794 = sst [smem:[#allocation155_spill]] %s4172_s11  ;;  %v4207_v55 = vmax.f32 %v1356_v46, 0.0  ;;  %v407_v46 = vld [vmem:[#allocation7 + $0x70] sm:$0xff]  ;;  %v1658_v6 = vadd.f32 %v1656_v26, %v1652_v61 }
 0x1f7   : > { %6796 = sst [smem:[#allocation156_spill]] %s4179_s30  ;;  %v4244_v5 = vmul.f32 %v407_v46, %v3860_v32  ;;  %v6312_v32 = vstv %s4099_s24  ;;  %v6314_v46 = vstv %s4132_s27 }
 0x1f8   : > { %s4202_s21 = sld [smem:[#allocation12 + $0x6c]]  ;;  %v6803_v0 = vstv %s6797_s16  ;;  %v1680_v61 = vmul.f32 %v6312_v32, %v3870_v29 }
 0x1f9   : > { %6798 = sst [smem:[#allocation157_spill]] %s4187_s29  ;;  %v1250_v33 = vmul.f32 %v6803_v0, %v4174_v44  ;;  %v419_v0 = vld [vmem:[#allocation7 + $0x80] sm:$0xff] }
 0x1fa   : > { %6800 = sst [smem:[#allocation158_spill]] %s4195_s18  ;;  %v4247_v63 = vmul.f32 %v419_v0, %v3969_v21 }
 0x1fb   : > { %s6804_s9 = sld [smem:[#allocation128_spill]]  ;;  %v1252_v48 = vadd.f32 %v1250_v33, %v1140_v42  ;;  %v6806_v45 = vstv %s6801_s4  ;;  %v1662_v33 = vmul.f32 %v4155_v47, %v6317_v28  ;;  %v6328_v28 = vstv %s4179_s30 }
 0x1fc   : > { %s4212_s25 = sld [smem:[#allocation9 + $0x75]]  ;;  %v1468_v51 = vadd.f32 %v6806_v45, %v1464_v36  ;;  %v6309_v36 = vstv %s4088_s6  ;;  %v1668_v45 = vmul.f32 %v6310_v9, %v3811_v62  ;;  %v6332_v9 = vstv %s4160_s28 }
 0x1fd   : > { %s4219_s16 = sld [smem:[#allocation9 + $0x76]] }
 0x1fe   : > { %6802 = sst [smem:[#allocation159_spill]] %s4202_s21  ;;  %v4235_v42 = vmax.f32 %v1468_v51, 0.0  ;;  %v1576_v51 = vadd.f32 %v1574_v40, %v1570_v54  ;;  %v1674_v54 = vmul.f32 %v6309_v36, %v3837_v37  ;;  %v6320_v40 = vstv %s4104_s13 }
 0x1ff   : > { %s4226_s7 = sld [smem:[#allocation9 + $0x77]]  ;;  %v1686_v32 = vmul.f32 %v6320_v40, %v3898_v50  ;;  %v1774_v40 = vmul.f32 %v4155_v47, %v6332_v9 }
 0x200   : > { %s4233_s3 = sld [smem:[#allocation9 + $0x78]]  ;;  %v1580_v21 = vadd.f32 %v6308_v7, %v1576_v51  ;;  %v6316_v7 = vstv %s4142_s15 }
 0x201   : > { %v6808_v25 = vstv %s6804_s9  ;;  %s4241_s9 = sld [smem:[#allocation9 + $0x79]]  ;;  %v1762_v36 = vmul.f32 %v6316_v7, %v3746_v49  ;;  %v6326_v7 = vstv %s4172_s11 }
 0x202   : > { %v1362_v18 = vmul.f32 %v6808_v25, %v4207_v55  ;;  %s6811_s4 = sld [smem:[#allocation44_spill]]  ;;  %v1752_v25 = vmul.f32 %v6314_v46, %v3704_v14 }
 0x203   : > { %6805 = sst [smem:[#allocation160_spill]] %s4219_s16 }
 0x204   : > { %s4250_s14 = sld [smem:[#allocation9 + $0x7a]]  ;;  %v1364_v57 = vadd.f32 %v1362_v18, %v1252_v48  ;;  %v1664_v48 = vadd.f32 %v1662_v33, %v1658_v6  ;;  %v6313_v18 = vstv %s4134_s22  ;;  %v4286_v33 = vmax.f32 %v1580_v21, 0.0 }
 0x205   : > { %6807 = sst [smem:[#allocation161_spill]] %s4226_s7  ;;  %v1756_v51 = vmul.f32 %v6313_v18, %v3702_v1  ;;  %v6329_v21 = vstv %s4165_s19 }
 0x206   : > { %6809 = sst [smem:[#allocation162_spill]] %s4233_s3  ;;  %v1670_v6 = vadd.f32 %v1668_v45, %v1664_v48  ;;  %v6340_v48 = vstv %s4115_s0 }
 0x207   : > { %6810 = sst [smem:[#allocation163_spill]] %s4241_s9  ;;  %v1758_v18 = vadd.f32 %v1756_v51, %v1752_v25  ;;  %v6359_v25 = vstv %s4121_s8 }
 0x208   : > { %s4256_s2 = sld [smem:[#allocation9 + $0x7b]]  ;;  %v6815_v26 = vstv %s6811_s4  ;;  %v1676_v45 = vadd.f32 %v1674_v54, %v1670_v6  ;;  %v1586_v54 = vmul.f32 %v6324_v19, %v4286_v33  ;;  %v6333_v19 = vstv %s4219_s16 }
 0x209   : > { %s4265_s10 = sld [smem:[#allocation9 + $0x7c]]  ;;  %v1474_v0 = vmul.f32 %v6815_v26, %v4235_v42  ;;  %v6322_v26 = vstv %s4146_s1  ;;  %v1764_v51 = vadd.f32 %v1762_v36, %v1758_v18  ;;  %v6331_v18 = vstv %s4212_s25 }
 0x20a   : > { %6812 = sst [smem:[#allocation164_spill]] %s4250_s14  ;;  %v1768_v46 = vmul.f32 %v6322_v26, %v3783_v41  ;;  %v1682_v6 = vadd.f32 %v1680_v61, %v1676_v45  ;;  %v1780_v26 = vmul.f32 %v6329_v21, %v3811_v62  ;;  %v1864_v45 = vmul.f32 %v6331_v18, %v3704_v14 }
 0x20b   : > { %s4274_s17 = sld [smem:[#allocation9 + $0x7d]]  ;;  %v1476_v56 = vadd.f32 %v1474_v0, %v1364_v57  ;;  %v1786_v57 = vmul.f32 %v6326_v7, %v3837_v37  ;;  %v1792_v0 = vmul.f32 %v6328_v28, %v3870_v29  ;;  %v1868_v7 = vmul.f32 %v6333_v19, %v3702_v1 }
 0x20c   : > { %s4284_s4 = sld [smem:[#allocation10 + $0xd]]  ;;  %v1770_v36 = vadd.f32 %v1768_v46, %v1764_v51  ;;  %v1688_v61 = vadd.f32 %v1686_v32, %v1682_v6  ;;  %v6335_v46 = vstv %s4226_s7  ;;  %v6351_v21 = vstv %s4233_s3 }
 0x20d   : > { %s4292_s24 = sld [smem:[#allocation12 + $0x75]]  ;;  %v1874_v28 = vmul.f32 %v6335_v46, %v3746_v49  ;;  %v6343_v32 = vstv %s4241_s9  ;;  %v6349_v18 = vstv %s4187_s29  ;;  %v1870_v9 = vadd.f32 %v1868_v7, %v1864_v45 }
 0x20e   : > { %6813 = sst [smem:[#allocation165_spill]] %s4256_s2  ;;  %v1776_v51 = vadd.f32 %v1774_v40, %v1770_v36  ;;  %v1692_v6 = vadd.f32 %v6340_v48, %v1688_v61  ;;  %v1880_v19 = vmul.f32 %v6351_v21, %v3783_v41  ;;  %v6345_v36 = vstv %s4250_s14 }
 0x20f   : > { %6814 = sst [smem:[#allocation166_spill]] %s4265_s10  ;;  %v6346_v46 = vstv %s4256_s2  ;;  %v6347_v38 = vstv %s4265_s10  ;;  %v1588_v17 = vadd.f32 %v1586_v54, %v1476_v56  ;;  %v6360_v61 = vstv %s4195_s18 }
 0x210   : > { %s4301_s6 = sld [smem:[#allocation9 + $0x7e]]  ;;  %v1782_v40 = vadd.f32 %v1780_v26, %v1776_v51  ;;  %v1876_v7 = vadd.f32 %v1874_v28, %v1870_v9  ;;  %v1886_v45 = vmul.f32 %v4155_v47, %v6343_v32  ;;  %v4367_v26 = vmax.f32 %v1692_v6, 0.0 }
 0x211   : > { %s4306_s15 = sld [smem:[#allocation9 + $0x7f]]  ;;  %v1798_v48 = vmul.f32 %v6349_v18, %v3898_v50  ;;  %v6374_v56 = vstv %s4202_s21  ;;  %v1892_v9 = vmul.f32 %v6345_v36, %v3811_v62  ;;  %v1898_v28 = vmul.f32 %v6346_v46, %v3837_v37 }
 0x212   : > { %6816 = sst [smem:[#allocation167_spill]] %s4284_s4  ;;  %v1788_v51 = vadd.f32 %v1786_v57, %v1782_v40  ;;  %v1882_v54 = vadd.f32 %v1880_v19, %v1876_v7  ;;  %v1904_v57 = vmul.f32 %v6347_v38, %v3870_v29  ;;  %v6365_v36 = vstv %s4274_s17 }
 0x213   : > { %6817 = sst [smem:[#allocation168_spill]] %s4292_s24  ;;  %v6375_v21 = vstv %s4284_s4 }
 0x214   : > { %s4312_s13 = sld [smem:[#allocation9 + $0x80]]  ;;  %v1794_v6 = vadd.f32 %v1792_v0, %v1788_v51  ;;  %v1888_v7 = vadd.f32 %v1886_v45, %v1882_v54 }
 0x215   : > { %s4323_s1 = sld [smem:[#allocation9 + $0x81]] }
 0x216   : > { %s4330_s26 = sld [smem:[#allocation9 + $0x82]]  ;;  %v6352_v40 = vstv %s4301_s6  ;;  %v1800_v0 = vadd.f32 %v1798_v48, %v1794_v6  ;;  %v1894_v54 = vadd.f32 %v1892_v9, %v1888_v7  ;;  %v1698_v48 = vmul.f32 %v6359_v25, %v4367_v26 }
 0x217   : > { %s4339_s11 = sld [smem:[#allocation9 + $0x83]]  ;;  %v6353_v32 = vstv %s4306_s15  ;;  %v1976_v46 = vmul.f32 %v6352_v40, %v3704_v14  ;;  %v6388_v25 = vstv %s4292_s24 }
 0x218   : > { %s4346_s30 = sld [smem:[#allocation9 + $0x84]]  ;;  %v1980_v38 = vmul.f32 %v6353_v32, %v3702_v1  ;;  %v1804_v6 = vadd.f32 %v6360_v61, %v1800_v0  ;;  %v1900_v9 = vadd.f32 %v1898_v28, %v1894_v54  ;;  %v1700_v0 = vadd.f32 %v1698_v48, %v1588_v17 }
 0x219   : > { %s4354_s16 = sld [smem:[#allocation9 + $0x85]] }
 0x21a   : > { %6818 = sst [smem:[#allocation169_spill]] %s4312_s13  ;;  %v6355_v19 = vstv %s4312_s13  ;;  %v1982_v40 = vadd.f32 %v1980_v38, %v1976_v46  ;;  %v1910_v38 = vmul.f32 %v6365_v36, %v3898_v50  ;;  %v4437_v54 = vmax.f32 %v1804_v6, 0.0 }
 0x21b   : > { %s4359_s7 = sld [smem:[#allocation9 + $0x86]]  ;;  %v1986_v51 = vmul.f32 %v6355_v19, %v3746_v49  ;;  %v6366_v18 = vstv %s4323_s1 }
 0x21c   : > { %6819 = sst [smem:[#allocation170_spill]] %s4330_s26  ;;  %v6364_v45 = vstv %s4330_s26  ;;  %v1992_v32 = vmul.f32 %v6366_v18, %v3783_v41 }
 0x21d   : > { %6820 = sst [smem:[#allocation171_spill]] %s4339_s11  ;;  %v6363_v19 = vstv %s4339_s11  ;;  %v1988_v46 = vadd.f32 %v1986_v51, %v1982_v40  ;;  %v1998_v7 = vmul.f32 %v4155_v47, %v6364_v45  ;;  %v1906_v40 = vadd.f32 %v1904_v57, %v1900_v9 }
 0x21e   : > { %6821 = sst [smem:[#allocation172_spill]] %s4346_s30  ;;  %v6371_v22 = vstv %s4346_s30  ;;  %v2004_v61 = vmul.f32 %v6363_v19, %v3811_v62 }
 0x21f   : > { %6822 = sst [smem:[#allocation173_spill]] %s4354_s16  ;;  %v6369_v28 = vstv %s4354_s16  ;;  %v1994_v51 = vadd.f32 %v1992_v32, %v1988_v46  ;;  %v2010_v17 = vmul.f32 %v6371_v22, %v3837_v37  ;;  %v1912_v18 = vadd.f32 %v1910_v38, %v1906_v40 }
 0x220   : > { %s4365_s0 = sld [smem:[#allocation10 + $0xe]]  ;;  %v2016_v9 = vmul.f32 %v6369_v28, %v3870_v29  ;;  %v1810_v28 = vmul.f32 %v6374_v56, %v4437_v54 }
 0x221   : > { %6823 = sst [smem:[#allocation174_spill]] %s4359_s7  ;;  %v6376_v48 = vstv %s4359_s7  ;;  %v2000_v6 = vadd.f32 %v1998_v7, %v1994_v51  ;;  %v1916_v7 = vadd.f32 %v6375_v21, %v1912_v18 }
 0x222   : > { %s4373_s3 = sld [smem:[#allocation9 + $0x87]] }
 0x223   : > { %s4384_s9 = sld [smem:[#allocation9 + $0x88]]  ;;  %v4483_v56 = vmax.f32 %v1916_v7, 0.0 }
 0x224   : > { %s4389_s29 = sld [smem:[#allocation9 + $0x89]] }
 0x225   : > { %s4398_s10 = sld [smem:[#allocation9 + $0x8a]] }
 0x226   : > { %6824 = sst [smem:[#allocation175_spill]] %s4365_s0  ;;  %v6392_v22 = vstv %s4365_s0 }
 0x227   : > { %s4405_s2 = sld [smem:[#allocation9 + $0x8b]] }
 0x228   : > { %s4411_s14 = sld [smem:[#allocation12 + $0x7e]]  ;;  %v2086_v19 = vstv %s4373_s3 }
 0x229   : > { %s4420_s13 = sld [smem:[#allocation9 + $0x8c]]  ;;  %v2090_v45 = vstv %s4384_s9  ;;  %v2088_v32 = vmul.f32 %v2086_v19, %v3704_v14  ;;  %v2006_v14 = vadd.f32 %v2004_v61, %v2000_v6 }
 0x22a   : > { %6825 = sst [smem:[#allocation176_spill]] %s4389_s29  ;;  %v6379_v36 = vstv %s4389_s29  ;;  %v2092_v57 = vmul.f32 %v2090_v45, %v3702_v1 }
 0x22b   : > { %6826 = sst [smem:[#allocation177_spill]] %s4398_s10  ;;  %v2098_v46 = vmul.f32 %v6379_v36, %v3746_v49  ;;  %v6378_v38 = vstv %s4398_s10  ;;  %v2022_v49 = vmul.f32 %v6376_v48, %v3898_v50  ;;  %v2012_v61 = vadd.f32 %v2010_v17, %v2006_v14 }
 0x22c   : > { %s4428_s8 = sld [smem:[#allocation9 + $0x8d]]  ;;  %v2094_v51 = vadd.f32 %v2092_v57, %v2088_v32  ;;  %v2104_v1 = vmul.f32 %v6378_v38, %v3783_v41  ;;  %v1812_v57 = vadd.f32 %v1810_v28, %v1700_v0 }
 0x22d   : > { %6827 = sst [smem:[#allocation178_spill]] %s4405_s2  ;;  %v6398_v40 = vstv %s4405_s2  ;;  %v2018_v38 = vadd.f32 %v2016_v9, %v2012_v61 }
 0x22e   : > { %s4435_s18 = sld [smem:[#allocation9 + $0x8e]]  ;;  %v2100_v6 = vadd.f32 %v2098_v46, %v2094_v51  ;;  %v2110_v41 = vmul.f32 %v4155_v47, %v6398_v40  ;;  %v6397_v21 = vstv %s4411_s14 }
 0x22f   : > { %6828 = sst [smem:[#allocation179_spill]] %s4420_s13  ;;  %v6394_v18 = vstv %s4420_s13 }
 0x230   : > { %s4442_s26 = sld [smem:[#allocation9 + $0x8f]]  ;;  %v2106_v36 = vadd.f32 %v2104_v1, %v2100_v6  ;;  %v2116_v17 = vmul.f32 %v6394_v18, %v3811_v62  ;;  %v2024_v1 = vadd.f32 %v2022_v49, %v2018_v38 }
 0x231   : > { %s4454_s30 = sld [smem:[#allocation10 + $0xf]] }
 0x232   : > { %6829 = sst [smem:[#allocation180_spill]] %s4428_s8  ;;  %v6389_v32 = vstv %s4428_s8  ;;  %v2112_v61 = vadd.f32 %v2110_v41, %v2106_v36  ;;  %v2028_v36 = vadd.f32 %v6392_v22, %v2024_v1  ;;  %v459_v1 = vmul.f32 %v458_v12, %v3928_v60 }
 0x233   : > { %s4469_s11 = sld [smem:[#allocation12 + $0x87]]  ;;  %v2122_v47 = vmul.f32 %v6389_v32, %v3837_v37  ;;  %v1922_v37 = vmul.f32 %v6388_v25, %v4483_v56 }
 0x234   : > { %6830 = sst [smem:[#allocation181_spill]] %s4435_s18  ;;  %v6387_v48 = vstv %s4435_s18  ;;  %v2118_v38 = vadd.f32 %v2116_v17, %v2112_v61  ;;  %v453_v17 = vmul.f32 %v452_v11, %v3925_v31 }
 0x235   : > { %s6832_s4 = sld [smem:[#allocation30_spill]]  ;;  %v2128_v62 = vmul.f32 %v6387_v48, %v3870_v29  ;;  %v1924_v48 = vadd.f32 %v1922_v37, %v1812_v57 }
 0x236   : > { %6831 = sst [smem:[#allocation182_spill]] %s4442_s26  ;;  %v6393_v46 = vstv %s4442_s26 }
 0x237   : > { %s6833_s16 = sld [smem:[#allocation31_spill]]  ;;  %v6396_v6 = vstv %s4454_s30 }
 0x238   : > { %s6834_s29 = sld [smem:[#allocation32_spill]] }
 0x239   : > { %s6836_s2 = sld [smem:[#allocation39_spill]]  ;;  %v6395_v49 = vstv %s4469_s11 }
 0x23a   : > { %s6840_s7 = sld [smem:[#allocation40_spill]] }
 0x23b   : > { %v6837_v0 = vstv %s6832_s4  ;;  %s6841_s10 = sld [smem:[#allocation41_spill]] }
 0x23c   : > { %v425_v28 = vmul.f32 %v6837_v0, %v3744_v16  ;;  %s6844_s4 = sld [smem:[#allocation37_spill]]  ;;  %v2134_v0 = vmul.f32 %v6393_v46, %v3898_v50 }
 0x23d   : > { %v6838_v7 = vstv %s6833_s16  ;;  %s6845_s16 = sld [smem:[#allocation38_spill]] }
 0x23e   : > { %v429_v14 = vmul.f32 %v6838_v7, %v3715_v58  ;;  %v6839_v51 = vstv %s6834_s29  ;;  %s6846_s29 = sld [smem:[#allocation43_spill]] }
 0x23f   : > { %v435_v9 = vmul.f32 %v6839_v51, %v3835_v20  ;;  %v441_v51 = vmul.f32 %v440_v8, %v3896_v27  ;;  %v6847_v29 = vstv %s6836_s2  ;;  %s6848_s18 = sld [smem:[#allocation52_spill]]  ;;  %v2124_v8 = vadd.f32 %v2122_v47, %v2118_v38 }
 0x240   : > { %v431_v7 = vadd.f32 %v429_v14, %v425_v28  ;;  %v519_v41 = vmul.f32 %v6847_v29, %v3744_v16  ;;  %s6849_s24 = sld [smem:[#allocation53_spill]]  ;;  %v6850_v32 = vstv %s6840_s7  ;;  %v4543_v38 = vmax.f32 %v2028_v36, 0.0 }
 0x241   : > { %v523_v50 = vmul.f32 %v6850_v32, %v3715_v58  ;;  %v6851_v28 = vstv %s6841_s10  ;;  %s6852_s26 = sld [smem:[#allocation45_spill]]  ;;  %v2130_v11 = vadd.f32 %v2128_v62, %v2124_v8 }
 0x242   : > { %v437_v25 = vadd.f32 %v435_v9, %v431_v7  ;;  %v529_v14 = vmul.f32 %v6851_v28, %v3835_v20  ;;  %s6853_s21 = sld [smem:[#allocation54_spill]]  ;;  %v6855_v61 = vstv %s6844_s4 }
 0x243   : > { %s6854_s2 = sld [smem:[#allocation47_spill]]  ;;  %v465_v57 = vmul.f32 %v6855_v61, %v4244_v5  ;;  %v6857_v32 = vstv %s6845_s16  ;;  %v525_v7 = vadd.f32 %v523_v50, %v519_v41  ;;  %v2136_v62 = vadd.f32 %v2134_v0, %v2130_v11 }
 0x244   : > { %s6856_s0 = sld [smem:[#allocation55_spill]]  ;;  %v443_v9 = vadd.f32 %v441_v51, %v437_v25  ;;  %v471_v37 = vmul.f32 %v6857_v32, %v4247_v63  ;;  %v6858_v29 = vstv %s6846_s29  ;;  %v2034_v0 = vmul.f32 %v6397_v21, %v4543_v38 }
 0x245   : > { %s6859_s7 = sld [smem:[#allocation48_spill]]  ;;  %v535_v47 = vmul.f32 %v6858_v29, %v3896_v27  ;;  %v6861_v12 = vstv %s6848_s18  ;;  %v531_v41 = vadd.f32 %v529_v14, %v525_v7  ;;  %v2140_v11 = vadd.f32 %v6396_v6, %v2136_v62 }
 0x246   : > { %s6860_s10 = sld [smem:[#allocation49_spill]]  ;;  %v631_v28 = vmul.f32 %v6861_v12, %v3744_v16  ;;  %v6862_v61 = vstv %s6849_s24  ;;  %v449_v51 = vadd.f32 %v3667_v39, %v443_v9 }
 0x247   : > { %v635_v25 = vmul.f32 %v6862_v61, %v3715_v58  ;;  %s6863_s8 = sld [smem:[#allocation63_spill]]  ;;  %v6864_v50 = vstv %s6852_s26  ;;  %v537_v39 = vadd.f32 %v535_v47, %v531_v41 }
 0x248   : > { %v547_v32 = vmul.f32 %v6864_v50, %v3925_v31  ;;  %v6865_v29 = vstv %s6853_s21  ;;  %s6866_s13 = sld [smem:[#allocation64_spill]]  ;;  %v455_v18 = vadd.f32 %v453_v17, %v449_v51 }
 0x249   : > { %v641_v36 = vmul.f32 %v6865_v29, %v3835_v20  ;;  %s6867_s4 = sld [smem:[#allocation65_spill]]  ;;  %v6868_v8 = vstv %s6854_s2  ;;  %v637_v12 = vadd.f32 %v635_v25, %v631_v28  ;;  %v543_v47 = vadd.f32 %v3676_v2, %v537_v39 }
 0x24a   : > { %v553_v22 = vmul.f32 %v6868_v8, %v3928_v60  ;;  %v6869_v46 = vstv %s6856_s0  ;;  %s6870_s24 = sld [smem:[#allocation57_spill]]  ;;  %v461_v17 = vadd.f32 %v459_v1, %v455_v18 }
 0x24b   : > { %v647_v61 = vmul.f32 %v6869_v46, %v3896_v27  ;;  %v6871_v14 = vstv %s6859_s7  ;;  %s6873_s26 = sld [smem:[#allocation66_spill]]  ;;  %v643_v28 = vadd.f32 %v641_v36, %v637_v12  ;;  %v549_v18 = vadd.f32 %v547_v32, %v543_v47 }
 0x24c   : > { %v559_v9 = vmul.f32 %v6871_v14, %v4244_v5  ;;  %v6872_v7 = vstv %s6860_s10  ;;  %s6875_s0 = sld [smem:[#allocation58_spill]]  ;;  %v2036_v14 = vadd.f32 %v2034_v0, %v1924_v48 }
 0x24d   : > { %v565_v50 = vmul.f32 %v6872_v7, %v4247_v63  ;;  %v6874_v25 = vstv %s6863_s8  ;;  %s6876_s18 = sld [smem:[#allocation59_spill]]  ;;  %v4585_v7 = vmax.f32 %v2140_v11, 0.0  ;;  %v649_v62 = vadd.f32 %v647_v61, %v643_v28 }
 0x24e   : > { %v743_v46 = vmul.f32 %v6874_v25, %v3744_v16  ;;  %v6877_v51 = vstv %s6866_s13  ;;  %s6879_s16 = sld [smem:[#allocation74_spill]]  ;;  %v467_v25 = vadd.f32 %v465_v57, %v461_v17  ;;  %v555_v32 = vadd.f32 %v553_v22, %v549_v18 }
 0x24f   : > { %v747_v41 = vmul.f32 %v6877_v51, %v3715_v58  ;;  %v6878_v29 = vstv %s6867_s4  ;;  %s6881_s29 = sld [smem:[#allocation75_spill]]  ;;  %v2146_v51 = vmul.f32 %v6395_v49, %v4585_v7  ;;  %v655_v48 = vadd.f32 %v3684_v3, %v649_v62 }
 0x250   : > { %v753_v8 = vmul.f32 %v6878_v29, %v3835_v20  ;;  %v6880_v36 = vstv %s6870_s24  ;;  %s6882_s21 = sld [smem:[#allocation76_spill]]  ;;  %v473_v57 = vadd.f32 %v471_v37, %v467_v25  ;;  %v561_v37 = vadd.f32 %v559_v9, %v555_v32 }
 0x251   : > { %v659_v12 = vmul.f32 %v6880_v36, %v3925_v31  ;;  %s6883_s2 = sld [smem:[#allocation42_spill]]  ;;  %v749_v2 = vadd.f32 %v747_v41, %v743_v46  ;;  %v6884_v1 = vstv %s6873_s26  ;;  %v2148_v41 = vadd.f32 %v2146_v51, %v2036_v14 }
 0x252   : > { %v759_v39 = vmul.f32 %v6884_v1, %v3896_v27  ;;  %s6885_s7 = sld [smem:[#allocation68_spill]]  ;;  %v6886_v61 = vstv %s6875_s0 }
 0x253   : > { %v665_v0 = vmul.f32 %v6886_v61, %v3928_v60  ;;  %v6887_v11 = vstv %s6876_s18  ;;  %s6888_s10 = sld [smem:[#allocation60_spill]]  ;;  %v755_v46 = vadd.f32 %v753_v8, %v749_v2  ;;  %v661_v29 = vadd.f32 %v659_v12, %v655_v48  ;;  %s6900_s18 = smov 17  }
 0x254   : > { %v671_v28 = vmul.f32 %v6887_v11, %v4244_v5  ;;  %s6889_s8 = sld [smem:[#allocation77_spill]]  ;;  %v6890_v17 = vstv %s6879_s16  ;;  %2199 = vrot.lane.b32.xlu1 %v2148_v41, %s6900_s18 }
 0x255   : > { %v855_v47 = vmul.f32 %v6890_v17, %v3744_v16  ;;  %s6891_s13 = sld [smem:[#allocation69_spill]]  ;;  %v6893_v3 = vstv %s6881_s29  ;;  %v761_v22 = vadd.f32 %v759_v39, %v755_v46  ;;  %v667_v14 = vadd.f32 %v665_v0, %v661_v29 }
 0x256   : > { %s6892_s4 = sld [smem:[#allocation70_spill]]  ;;  %v859_v62 = vmul.f32 %v6893_v3, %v3715_v58  ;;  %v6894_v36 = vstv %s6882_s21 }
 0x257   : > { %s6895_s24 = sld [smem:[#allocation71_spill]]  ;;  %v865_v1 = vmul.f32 %v6894_v36, %v3835_v20  ;;  %v6896_v61 = vstv %s6883_s2  ;;  %v767_v9 = vadd.f32 %v3713_v15, %v761_v22  ;;  %v673_v0 = vadd.f32 %v671_v28, %v667_v14 }
 0x258   : > { %v477_v11 = vadd.f32 %v6896_v61, %v473_v57  ;;  %s6897_s26 = sld [smem:[#allocation85_spill]]  ;;  %v6898_v8 = vstv %s6885_s7  ;;  %v861_v2 = vadd.f32 %v859_v62, %v855_v47  ;;  %v567_v57 = vadd.f32 %v565_v50, %v561_v37 }
 0x259   : > { %s6899_s0 = sld [smem:[#allocation50_spill]]  ;;  %v771_v25 = vmul.f32 %v6898_v8, %v3925_v31  ;;  %v6902_v12 = vstv %s6888_s10 }
 0x25a   : > { %s6901_s16 = sld [smem:[#allocation86_spill]]  ;;  %v677_v18 = vmul.f32 %v6902_v12, %v4247_v63  ;;  %v6903_v51 = vstv %s6889_s8  ;;  %v867_v29 = vadd.f32 %v865_v1, %v861_v2  ;;  %v4637_v50 = vmax.f32 %v477_v11, 0.0 }
 0x25b   : > { %s6904_s29 = sld [smem:[#allocation79_spill]]  ;;  %v871_v48 = vmul.f32 %v6903_v51, %v3896_v27  ;;  %v6906_v39 = vstv %s6891_s13  ;;  %v773_v61 = vadd.f32 %v771_v25, %v767_v9 }
 0x25c   : > { %s6905_s21 = sld [smem:[#allocation87_spill]]  ;;  %v777_v32 = vmul.f32 %v6906_v39, %v3928_v60  ;;  %v6907_v46 = vstv %s6892_s4  ;;  %v679_v28 = vadd.f32 %v677_v18, %v673_v0 }
 0x25d   : > { %v783_v17 = vmul.f32 %v6907_v46, %v4244_v5  ;;  %s6908_s2 = sld [smem:[#allocation88_spill]]  ;;  %v6909_v41 = vstv %s6895_s24  ;;  %v873_v8 = vadd.f32 %v871_v48, %v867_v29 }
 0x25e   : > { %s6910_s7 = sld [smem:[#allocation61_spill]]  ;;  %v789_v47 = vmul.f32 %v6909_v41, %v4247_v63  ;;  %v6911_v3 = vstv %s6897_s26  ;;  %v779_v51 = vadd.f32 %v777_v32, %v773_v61 }
 0x25f   : > { %s6912_s10 = sld [smem:[#allocation80_spill]]  ;;  %v967_v62 = vmul.f32 %v6911_v3, %v3744_v16  ;;  %v6914_v15 = vstv %s6899_s0  ;;  %v879_v48 = vadd.f32 %v3842_v53, %v873_v8 }
 0x260   : > { %s6913_s8 = sld [smem:[#allocation81_spill]]  ;;  %v571_v36 = vadd.f32 %v6914_v15, %v567_v57  ;;  %v6916_v37 = vstv %s6901_s16 }
 0x261   : > { %s6915_s13 = sld [smem:[#allocation46_spill]]  ;;  %v971_v22 = vmul.f32 %v6916_v37, %v3715_v58  ;;  %v6918_v1 = vstv %s6904_s29 }
 0x262   : > { %s6917_s4 = sld [smem:[#allocation89_spill]]  ;;  %v883_v14 = vmul.f32 %v6918_v1, %v3925_v31  ;;  %v6920_v12 = vstv %s6905_s21  ;;  %v4650_v11 = vmax.f32 %v571_v36, 0.0  ;;  %v4668_v36 = vld [vmem:[%s6784_s12] sm:$0xff] }
 0x263   : > { %s6919_s24 = sld [smem:[#allocation51_spill]]  ;;  %v977_v2 = vmul.f32 %v6920_v12, %v3835_v20  ;;  %v973_v25 = vadd.f32 %v971_v22, %v967_v62  ;;  %v6923_v57 = vstv %s6908_s2  ;;  %v785_v62 = vadd.f32 %v783_v17, %v779_v51 }
 0x264   : > { %s6921_s26 = sld [smem:[#allocation90_spill]]  ;;  %v983_v9 = vmul.f32 %v6923_v57, %v3896_v27  ;;  %v6924_v39 = vstv %s6910_s7 }
 0x265   : > { %s6922_s0 = sld [smem:[#allocation96_spill]]  ;;  %v683_v18 = vadd.f32 %v6924_v39, %v679_v28  ;;  %v6926_v46 = vstv %s6912_s10  ;;  %v979_v15 = vadd.f32 %v977_v2, %v973_v25  ;;  %v885_v28 = vadd.f32 %v883_v14, %v879_v48 }
 0x266   : > { %s6925_s16 = sld [smem:[#allocation97_spill]]  ;;  %v889_v0 = vmul.f32 %v6926_v46, %v3928_v60  ;;  %v6927_v41 = vstv %s6913_s8  ;;  %v791_v2 = vadd.f32 %v789_v47, %v785_v62  ;;  %v6947_v62 = vstv %s6710_s20 }
 0x267   : > { %s6928_s29 = sld [smem:[#allocation82_spill]]  ;;  %v895_v29 = vmul.f32 %v6927_v41, %v4244_v5  ;;  %v6929_v3 = vstv %s6915_s13  ;;  %v4682_v17 = vmax.f32 %v683_v18, 0.0  ;;  %v985_v51 = vadd.f32 %v983_v9, %v979_v15 }
 0x268   : > { %s6930_s21 = sld [smem:[#allocation91_spill]]  ;;  %v483_v32 = vmul.f32 %v6929_v3, %v4637_v50  ;;  %v6933_v61 = vstv %s6917_s4  ;;  %v891_v46 = vadd.f32 %v889_v0, %v885_v28  ;;  %v1095_v15 = vmul.f32 %v6947_v62, %v3896_v27 }
 0x269   : > { %s6931_s18 = sld [smem:[#allocation98_spill]]  ;;  %v989_v53 = vmul.f32 %v4668_v36, %v6933_v61  ;;  %v6934_v37 = vstv %s6919_s24 }
 0x26a   : > { %s6932_s2 = sld [smem:[#allocation72_spill]]  ;;  %v577_v22 = vmul.f32 %v6934_v37, %v4650_v11  ;;  %v6935_v8 = vstv %s6921_s26  ;;  %v897_v28 = vadd.f32 %v895_v29, %v891_v46 }
 0x26b   : > { %v995_v1 = vmul.f32 %v6935_v8, %v3925_v31  ;;  %v6936_v12 = vstv %s6922_s0  ;;  %s6937_s7 = sld [smem:[#allocation92_spill]]  ;;  %v991_v47 = vadd.f32 %v989_v53, %v985_v51 }
 0x26c   : > { %v1079_v57 = vmul.f32 %v6936_v12, %v3744_v16  ;;  %s6938_s10 = sld [smem:[#allocation93_spill]]  ;;  %v6940_v25 = vstv %s6925_s16  ;;  %v579_v0 = vadd.f32 %v577_v22, %v483_v32  ;;  %v6959_v22 = vstv %s6596_s23 }
 0x26d   : > { %s6939_s12 = sld [smem:[#allocation62_spill]]  ;;  %v1083_v39 = vmul.f32 %v6940_v25, %v3715_v58  ;;  %v6942_v14 = vstv %s6928_s29  ;;  %v997_v53 = vadd.f32 %v995_v1, %v991_v47  ;;  %v1191_v46 = vmul.f32 %v6959_v22, %v3744_v16 }
 0x26e   : > { %s6941_s8 = sld [smem:[#allocation100_spill]]  ;;  %v901_v48 = vmul.f32 %v6942_v14, %v4247_v63  ;;  %v6943_v41 = vstv %s6930_s21 }
 0x26f   : > { %v1001_v3 = vmul.f32 %v6943_v41, %v3928_v60  ;;  %v6944_v61 = vstv %s6931_s18  ;;  %s6946_s13 = sld [smem:[#allocation108_spill]]  ;;  %v1085_v9 = vadd.f32 %v1083_v39, %v1079_v57 }
 0x270   : > { %v1089_v37 = vmul.f32 %v6944_v61, %v3835_v20  ;;  %v6945_v18 = vstv %s6932_s2  ;;  %s6948_s4 = sld [smem:[#allocation101_spill]]  ;;  %v903_v29 = vadd.f32 %v901_v48, %v897_v28 }
 0x271   : > { %v795_v8 = vadd.f32 %v6945_v18, %v791_v2  ;;  %s6949_s24 = sld [smem:[#allocation109_spill]]  ;;  %v6950_v12 = vstv %s6937_s7 }
 0x272   : > { %s6951_s26 = sld [smem:[#allocation83_spill]]  ;;  %v1007_v25 = vmul.f32 %v6950_v12, %v4244_v5  ;;  %v6952_v14 = vstv %s6938_s10  ;;  %v1091_v57 = vadd.f32 %v1089_v37, %v1085_v9  ;;  %v1003_v12 = vadd.f32 %v1001_v3, %v997_v53 }
 0x273   : > { %v1013_v41 = vmul.f32 %v6952_v14, %v4247_v63  ;;  %v6953_v61 = vstv %s6939_s12  ;;  %s6954_s18 = sld [smem:[#allocation110_spill]]  ;;  %v4713_v32 = vmax.f32 %v795_v8, 0.0 }
 0x274   : > { %v689_v2 = vmul.f32 %v6953_v61, %v4682_v17  ;;  %v6955_v51 = vstv %s6941_s8  ;;  %s6956_s20 = sld [smem:[#allocation102_spill]]  ;;  %v1097_v1 = vadd.f32 %v1095_v15, %v1091_v57 }
 0x275   : > { %v1101_v39 = vmul.f32 %v4668_v36, %v6955_v51  ;;  %s6957_s0 = sld [smem:[#allocation103_spill]]  ;;  %v6961_v18 = vstv %s6946_s13 }
 0x276   : > { %s6958_s16 = sld [smem:[#allocation73_spill]]  ;;  %v1195_v62 = vmul.f32 %v6961_v18, %v3715_v58  ;;  %v6963_v37 = vstv %s6948_s4  ;;  %v691_v8 = vadd.f32 %v689_v2, %v579_v0  ;;  %v1009_v18 = vadd.f32 %v1007_v25, %v1003_v12 }
 0x277   : > { %s6960_s29 = sld [smem:[#allocation104_spill]]  ;;  %v1107_v47 = vmul.f32 %v6963_v37, %v3925_v31  ;;  %v6964_v9 = vstv %s6949_s24  ;;  %v1103_v3 = vadd.f32 %v1101_v39, %v1097_v1 }
 0x278   : > { %s6962_s21 = sld [smem:[#allocation111_spill]]  ;;  %v1201_v14 = vmul.f32 %v6964_v9, %v3835_v20  ;;  %v6966_v61 = vstv %s6951_s26  ;;  %v1197_v28 = vadd.f32 %v1195_v62, %v1191_v46  ;;  %v1015_v12 = vadd.f32 %v1013_v41, %v1009_v18 }
 0x279   : > { %s6965_s2 = sld [smem:[#allocation118_spill]]  ;;  %v907_v48 = vadd.f32 %v6966_v61, %v903_v29  ;;  %v6968_v51 = vstv %s6954_s18  ;;  %v1109_v1 = vadd.f32 %v1107_v47, %v1103_v3 }
 0x27a   : > { %s6967_s7 = sld [smem:[#allocation112_spill]]  ;;  %v1207_v22 = vmul.f32 %v6968_v51, %v3896_v27  ;;  %v6971_v15 = vstv %s6956_s20  ;;  %v1203_v62 = vadd.f32 %v1201_v14, %v1197_v28 }
 0x27b   : > { %s6969_s23 = sld [smem:[#allocation119_spill]]  ;;  %v1113_v53 = vmul.f32 %v6971_v15, %v3928_v60  ;;  %v6973_v57 = vstv %s6957_s0  ;;  %v4747_v39 = vmax.f32 %v907_v48, 0.0 }
 0x27c   : > { %s6970_s10 = sld [smem:[#allocation120_spill]]  ;;  %v1119_v37 = vmul.f32 %v6973_v57, %v4244_v5  ;;  %v6974_v0 = vstv %s6958_s16  ;;  %v1209_v15 = vadd.f32 %v1207_v22, %v1203_v62 }
 0x27d   : > { %s6972_s12 = sld [smem:[#allocation94_spill]]  ;;  %v801_v2 = vmul.f32 %v6974_v0, %v4713_v32  ;;  %v6976_v29 = vstv %s6960_s29  ;;  %v1115_v47 = vadd.f32 %v1113_v53, %v1109_v1 }
 0x27e   : > { %s6975_s8 = sld [smem:[#allocation113_spill]]  ;;  %v1125_v46 = vmul.f32 %v6976_v29, %v4247_v63  ;;  %v6978_v9 = vstv %s6962_s21 }
 0x27f   : > { %s6977_s13 = sld [smem:[#allocation114_spill]]  ;;  %v1213_v25 = vmul.f32 %v4668_v36, %v6978_v9  ;;  %v6981_v61 = vstv %s6965_s2  ;;  %v803_v48 = vadd.f32 %v801_v2, %v691_v8 }
 0x280   : > { %s6979_s4 = sld [smem:[#allocation121_spill]]  ;;  %v1303_v51 = vmul.f32 %v6981_v61, %v3744_v16  ;;  %v6984_v57 = vstv %s6967_s7 }
 0x281   : > { %s6980_s24 = sld [smem:[#allocation84_spill]]  ;;  %v1219_v0 = vmul.f32 %v6984_v57, %v3925_v31  ;;  %v6985_v14 = vstv %s6969_s23  ;;  %v1215_v22 = vadd.f32 %v1213_v25, %v1209_v15 }
 0x282   : > { %s6982_s26 = sld [smem:[#allocation115_spill]]  ;;  %v1307_v28 = vmul.f32 %v6985_v14, %v3715_v58  ;;  %v6986_v29 = vstv %s6970_s10 }
 0x283   : > { %s6983_s18 = sld [smem:[#allocation122_spill]]  ;;  %v1313_v9 = vmul.f32 %v6986_v29, %v3835_v20  ;;  %v6988_v49 = vstv %s6972_s12 }
 0x284   : > { %s6987_s20 = sld [smem:[#allocation129_spill]]  ;;  %v1019_v41 = vadd.f32 %v6988_v49, %v1015_v12  ;;  %v6989_v18 = vstv %s6975_s8  ;;  %v1309_v57 = vadd.f32 %v1307_v28, %v1303_v51  ;;  %v1121_v49 = vadd.f32 %v1119_v37, %v1115_v47 }
 0x285   : > { %s6990_s0 = sld [smem:[#allocation130_spill]]  ;;  %v1225_v3 = vmul.f32 %v6989_v18, %v3928_v60  ;;  %v6992_v62 = vstv %s6977_s13  ;;  %v1221_v51 = vadd.f32 %v1219_v0, %v1215_v22 }
 0x286   : > { %s6991_s16 = sld [smem:[#allocation131_spill]]  ;;  %v1231_v61 = vmul.f32 %v6992_v62, %v4244_v5  ;;  %v6993_v14 = vstv %s6979_s4  ;;  %v4781_v1 = vmax.f32 %v1019_v41, 0.0  ;;  %v1315_v15 = vadd.f32 %v1313_v9, %v1309_v57 }
 0x287   : > { %s6994_s29 = sld [smem:[#allocation123_spill]]  ;;  %v1319_v6 = vmul.f32 %v6993_v14, %v3896_v27  ;;  %v6995_v29 = vstv %s6980_s24  ;;  %v1127_v14 = vadd.f32 %v1125_v46, %v1121_v49 }
 0x288   : > { %s6996_s21 = sld [smem:[#allocation124_spill]]  ;;  %v913_v8 = vmul.f32 %v6995_v29, %v4747_v39  ;;  %v6998_v53 = vstv %s6982_s26 }
 0x289   : > { %s6997_s2 = sld [smem:[#allocation105_spill]]  ;;  %v1237_v2 = vmul.f32 %v6998_v53, %v4247_v63  ;;  %v7000_v12 = vstv %s6983_s18  ;;  %v1321_v41 = vadd.f32 %v1319_v6, %v1315_v15 }
 0x28a   : > { %s6999_s7 = sld [smem:[#allocation125_spill]]  ;;  %v1325_v25 = vmul.f32 %v4668_v36, %v7000_v12  ;;  %v7003_v28 = vstv %s6987_s20  ;;  %v915_v62 = vadd.f32 %v913_v8, %v803_v48  ;;  %v1227_v12 = vadd.f32 %v1225_v3, %v1221_v51 }
 0x28b   : > { %s7001_s23 = sld [smem:[#allocation132_spill]]  ;;  %v1415_v18 = vmul.f32 %v7003_v28, %v3744_v16  ;;  %v7005_v37 = vstv %s6990_s0 }
 0x28c   : > { %s7002_s10 = sld [smem:[#allocation95_spill]]  ;;  %v1419_v47 = vmul.f32 %v7005_v37, %v3715_v58  ;;  %v7006_v29 = vstv %s6991_s16  ;;  %v1327_v51 = vadd.f32 %v1325_v25, %v1321_v41  ;;  %v1537_v25 = vmul.f32 %v1536_v23, %v3835_v20 }
 0x28d   : > { %s7004_s12 = sld [smem:[#allocation126_spill]]  ;;  %v1425_v53 = vmul.f32 %v7006_v29, %v3835_v20  ;;  %v7009_v21 = vstv %s6994_s29 }
 0x28e   : > { %s7007_s8 = sld [smem:[#allocation107_spill]]  ;;  %v1331_v0 = vmul.f32 %v7009_v21, %v3925_v31  ;;  %v7010_v9 = vstv %s6996_s21  ;;  %v1421_v49 = vadd.f32 %v1419_v47, %v1415_v18  ;;  %v1233_v21 = vadd.f32 %v1231_v61, %v1227_v12 }
 0x28f   : > { %v1337_v22 = vmul.f32 %v7010_v9, %v3928_v60  ;;  %v7012_v57 = vstv %s6997_s2  ;;  %s7016_s26 = sld [smem:[#allocation133_spill]]  ;;  %v1531_v61 = vmul.f32 %v1530_v34, %v3715_v58 }
 0x290   : > { %v1131_v46 = vadd.f32 %v7012_v57, %v1127_v14  ;;  %v7014_v48 = vstv %s6999_s7  ;;  %s7018_s18 = sld [smem:[#allocation134_spill]]  ;;  %v1427_v9 = vadd.f32 %v1425_v53, %v1421_v49  ;;  %v1527_v57 = vmul.f32 %v1526_v30, %v3744_v16 }
 0x291   : > { %v1343_v8 = vmul.f32 %v7014_v48, %v4244_v5  ;;  %v7015_v28 = vstv %s7001_s23  ;;  %s7019_s20 = sld [smem:[#allocation116_spill]]  ;;  %v1239_v48 = vadd.f32 %v1237_v2, %v1233_v21 }
 0x292   : > { %v1431_v37 = vmul.f32 %v7015_v28, %v3896_v27  ;;  %v7017_v6 = vstv %s7002_s10  ;;  %s7021_s0 = sld [smem:[#allocation78_spill]]  ;;  %v4812_v14 = vmax.f32 %v1131_v46, 0.0  ;;  %v1333_v28 = vadd.f32 %v1331_v0, %v1327_v51 }
 0x293   : > { %v1025_v3 = vmul.f32 %v7017_v6, %v4781_v1  ;;  %v7020_v15 = vstv %s7004_s12  ;;  %s7022_s16 = sld [smem:[#allocation106_spill]]  ;;  %v1533_v21 = vadd.f32 %v1531_v61, %v1527_v57 }
 0x294   : > { %v1349_v29 = vmul.f32 %v7020_v15, %v4247_v63  ;;  %v7023_v18 = vstv %s7007_s8  ;;  %s7024_s29 = sld [smem:[#allocation135_spill]]  ;;  %v1433_v41 = vadd.f32 %v1431_v37, %v1427_v9  ;;  %v1339_v0 = vadd.f32 %v1337_v22, %v1333_v28 }
 0x295   : > { %v1437_v47 = vmul.f32 %v4668_v36, %v7023_v18  ;;  %s7025_s21 = sld [smem:[#allocation136_spill]]  ;;  %v1027_v12 = vadd.f32 %v1025_v3, %v915_v62  ;;  %v7027_v53 = vstv %s7016_s26  ;;  %v1539_v57 = vadd.f32 %v1537_v25, %v1533_v21 }
 0x296   : > { %s7026_s2 = sld [smem:[#allocation99_spill]]  ;;  %v1443_v46 = vmul.f32 %v7027_v53, %v3925_v31  ;;  %v7029_v49 = vstv %s7018_s18  ;;  %v1345_v22 = vadd.f32 %v1343_v8, %v1339_v0 }
 0x297   : > { %s7028_s7 = sld [smem:[#allocation144_spill]]  ;;  %v1449_v30 = vmul.f32 %v7029_v49, %v3928_v60  ;;  %v7031_v6 = vstv %s7019_s20  ;;  %v1439_v37 = vadd.f32 %v1437_v47, %v1433_v41 }
 0x298   : > { %s7030_s23 = sld [smem:[#allocation145_spill]]  ;;  %v1243_v2 = vadd.f32 %v7031_v6, %v1239_v48  ;;  %v7033_v34 = vstv %s7021_s0  ;;  %v1351_v8 = vadd.f32 %v1349_v29, %v1345_v22 }
 0x299   : > { %s7032_s10 = sld [smem:[#allocation146_spill]]  ;;  %v1543_v51 = vmul.f32 %v7033_v34, %v3896_v27  ;;  %v7034_v23 = vstv %s7022_s16  ;;  %v1445_v61 = vadd.f32 %v1443_v46, %v1439_v37 }
 0x29a   : > { %s7035_s12 = sld [smem:[#allocation138_spill]]  ;;  %v1137_v62 = vmul.f32 %v7034_v23, %v4812_v14  ;;  %v7036_v3 = vstv %s7024_s29  ;;  %v4846_v53 = vmax.f32 %v1243_v2, 0.0 }
 0x29b   : > { %s7037_s8 = sld [smem:[#allocation139_spill]]  ;;  %v1455_v15 = vmul.f32 %v7036_v3, %v4244_v5  ;;  %v7038_v9 = vstv %s7025_s21  ;;  %v1545_v25 = vadd.f32 %v1543_v51, %v1539_v57  ;;  %v1451_v46 = vadd.f32 %v1449_v30, %v1445_v61 }
 0x29c   : > { %v1461_v18 = vmul.f32 %v7038_v9, %v4247_v63  ;;  %s7039_s13 = sld [smem:[#allocation147_spill]]  ;;  %v7041_v48 = vstv %s7026_s2  ;;  %v1139_v23 = vadd.f32 %v1137_v62, %v1027_v12 }
 0x29d   : > { %s7040_s4 = sld [smem:[#allocation127_spill]]  ;;  %v1549_v28 = vmul.f32 %v4668_v36, %v7041_v48  ;;  %v7044_v47 = vstv %s7028_s7  ;;  %v1457_v61 = vadd.f32 %v1455_v15, %v1451_v46  ;;  %v7065_v15 = vstv %s4079_s5 }
 0x29e   : > { %s7042_s24 = sld [smem:[#allocation140_spill]]  ;;  %v1639_v41 = vmul.f32 %v7044_v47, %v3744_v16  ;;  %v7046_v49 = vstv %s7030_s23 }
 0x29f   : > { %s7043_s26 = sld [smem:[#allocation141_spill]]  ;;  %v1643_v6 = vmul.f32 %v7046_v49, %v3715_v58  ;;  %v7047_v34 = vstv %s7032_s10  ;;  %v1551_v12 = vadd.f32 %v1549_v28, %v1545_v25  ;;  %v7063_v25 = vstv %s4132_s27 }
 0x2a0   : > { %s7045_s18 = sld [smem:[#allocation117_spill]]  ;;  %v1649_v2 = vmul.f32 %v7047_v34, %v3835_v20  ;;  %v7049_v0 = vstv %s7035_s12 }
 0x2a1   : > { %s7048_s20 = sld [smem:[#allocation148_spill]]  ;;  %v1555_v21 = vmul.f32 %v7049_v0, %v3925_v31  ;;  %v7050_v37 = vstv %s7037_s8  ;;  %v1645_v9 = vadd.f32 %v1643_v6, %v1639_v41 }
 0x2a2   : > { %v1561_v3 = vmul.f32 %v7050_v37, %v3928_v60  ;;  %v7051_v48 = vstv %s7039_s13  ;;  %s7053_s0 = sld [smem:[#allocation29_spill]]  ;;  %v1751_v37 = vmul.f32 %v7063_v25, %v3744_v16 }
 0x2a3   : > { %v1655_v47 = vmul.f32 %v7051_v48, %v3896_v27  ;;  %v7052_v49 = vstv %s7040_s4  ;;  %s7057_s16 = sld [smem:[#allocation154_spill]]  ;;  %v1651_v41 = vadd.f32 %v1649_v2, %v1645_v9  ;;  %v1557_v28 = vadd.f32 %v1555_v21, %v1551_v12 }
 0x2a4   : > { %v1355_v34 = vadd.f32 %v7052_v49, %v1351_v8  ;;  %v7054_v29 = vstv %s7042_s24  ;;  %s7058_s29 = sld [smem:[#allocation34_spill]]  ;;  %v7064_v48 = vstv %s4134_s22  ;;  %v1667_v2 = vmul.f32 %v7065_v15, %v3925_v31 }
 0x2a5   : > { %v1567_v51 = vmul.f32 %v7054_v29, %v4244_v5  ;;  %v7055_v62 = vstv %s7043_s26  ;;  %s7060_s21 = sld [smem:[#allocation149_spill]]  ;;  %v1755_v49 = vmul.f32 %v7064_v48, %v3715_v58  ;;  %v1463_v29 = vadd.f32 %v1461_v18, %v1457_v61 }
 0x2a6   : > { %v1573_v22 = vmul.f32 %v7055_v62, %v4247_v63  ;;  %v7056_v30 = vstv %s7045_s18  ;;  %s7061_s2 = sld [smem:[#allocation150_spill]]  ;;  %v4883_v8 = vmax.f32 %v1355_v34, 0.0  ;;  %v1657_v62 = vadd.f32 %v1655_v47, %v1651_v41 }
 0x2a7   : > { %v1249_v57 = vmul.f32 %v7056_v30, %v4846_v53  ;;  %v7059_v6 = vstv %s7048_s20  ;;  %s7062_s7 = sld [smem:[#allocation128_spill]]  ;;  %v1563_v30 = vadd.f32 %v1561_v3, %v1557_v28  ;;  %v1757_v21 = vadd.f32 %v1755_v49, %v1751_v37 }
 0x2a8   : > { %v1661_v0 = vmul.f32 %v4668_v36, %v7059_v6  ;;  %v7066_v46 = vstv %s7053_s0  ;;  %s7068_s27 = sld [smem:[#allocation160_spill]]  ;;  %v7077_v28 = vstv %s4160_s28 }
 0x2a9   : > { %v1761_v9 = vmul.f32 %v7066_v46, %v3835_v20  ;;  %v1251_v34 = vadd.f32 %v1249_v57, %v1139_v23  ;;  %v7067_v12 = vstv %s7057_s16  ;;  %s7070_s22 = sld [smem:[#allocation161_spill]]  ;;  %v1569_v3 = vadd.f32 %v1567_v51, %v1563_v30 }
 0x2aa   : > { %v1767_v6 = vmul.f32 %v7067_v12, %v3896_v27  ;;  %v7069_v25 = vstv %s7058_s29  ;;  %v1663_v18 = vadd.f32 %v1661_v0, %v1657_v62  ;;  %s7073_s5 = sld [smem:[#allocation151_spill]]  ;;  %v1773_v37 = vmul.f32 %v4668_v36, %v7077_v28 }
 0x2ab   : > { %v1467_v48 = vadd.f32 %v7069_v25, %v1463_v29  ;;  %v7071_v47 = vstv %s7060_s21  ;;  %s7075_s23 = sld [smem:[#allocation155_spill]]  ;;  %v1763_v57 = vadd.f32 %v1761_v9, %v1757_v21  ;;  %v7080_v29 = vstv %s4165_s19 }
 0x2ac   : > { %v1673_v61 = vmul.f32 %v7071_v47, %v3928_v60  ;;  %v7072_v41 = vstv %s7061_s2  ;;  %s7076_s10 = sld [smem:[#allocation142_spill]]  ;;  %v1669_v0 = vadd.f32 %v1667_v2, %v1663_v18  ;;  %v1779_v62 = vmul.f32 %v7080_v29, %v3925_v31 }
 0x2ad   : > { %v1679_v15 = vmul.f32 %v7072_v41, %v4244_v5  ;;  %v7074_v46 = vstv %s7062_s7  ;;  %s7078_s12 = sld [smem:[#allocation162_spill]]  ;;  %v4914_v49 = vmax.f32 %v1467_v48, 0.0  ;;  %v7081_v12 = vstv %s4212_s25 }
 0x2ae   : > { %v1361_v23 = vmul.f32 %v7074_v46, %v4883_v8  ;;  %s7079_s8 = sld [smem:[#allocation44_spill]]  ;;  %v1863_v25 = vmul.f32 %v7081_v12, %v3744_v16  ;;  %v1575_v47 = vadd.f32 %v1573_v22, %v1569_v3  ;;  %v1769_v41 = vadd.f32 %v1767_v6, %v1763_v57 }
 0x2af   : > { %s7082_s13 = sld [smem:[#allocation156_spill]]  ;;  %v7084_v51 = vstv %s7068_s27  ;;  %v7085_v30 = vstv %s7070_s22  ;;  %v1675_v46 = vadd.f32 %v1673_v61, %v1669_v0 }
 0x2b0   : > { %s7083_s4 = sld [smem:[#allocation157_spill]]  ;;  %v1867_v9 = vmul.f32 %v7084_v51, %v3715_v58  ;;  %v1873_v21 = vmul.f32 %v7085_v30, %v3835_v20  ;;  %v1363_v48 = vadd.f32 %v1361_v23, %v1251_v34  ;;  %v7087_v2 = vstv %s7073_s5 }
 0x2b1   : > { %s7086_s28 = sld [smem:[#allocation163_spill]]  ;;  %v1685_v18 = vmul.f32 %v7087_v2, %v4247_v63  ;;  %v7088_v28 = vstv %s7075_s23  ;;  %v1775_v6 = vadd.f32 %v1773_v37, %v1769_v41  ;;  %v1681_v61 = vadd.f32 %v1679_v15, %v1675_v46 }
 0x2b2   : > { %v1785_v29 = vmul.f32 %v7088_v28, %v3928_v60  ;;  %v7089_v12 = vstv %s7076_s10  ;;  %s7090_s25 = sld [smem:[#allocation169_spill]]  ;;  %v1869_v3 = vadd.f32 %v1867_v9, %v1863_v25  ;;  %v7101_v46 = vstv %s4306_s15 }
 0x2b3   : > { %v1579_v22 = vadd.f32 %v7089_v12, %v1575_v47  ;;  %v7091_v57 = vstv %s7078_s12  ;;  %s7093_s19 = sld [smem:[#allocation164_spill]]  ;;  %v1781_v37 = vadd.f32 %v1779_v62, %v1775_v6  ;;  %v1687_v9 = vadd.f32 %v1685_v18, %v1681_v61 }
 0x2b4   : > { %v1879_v51 = vmul.f32 %v7091_v57, %v3896_v27  ;;  %v7092_v30 = vstv %s7079_s8  ;;  %s7095_s24 = sld [smem:[#allocation152_spill]]  ;;  %v1875_v25 = vadd.f32 %v1873_v21, %v1869_v3  ;;  %v7099_v12 = vstv %s4301_s6 }
 0x2b5   : > { %v1473_v34 = vmul.f32 %v7092_v30, %v4914_v49  ;;  %v7094_v23 = vstv %s7082_s13  ;;  %s7097_s26 = sld [smem:[#allocation165_spill]]  ;;  %v4948_v40 = vmax.f32 %v1579_v22, 0.0  ;;  %v1975_v15 = vmul.f32 %v7099_v12, %v3744_v16 }
 0x2b6   : > { %v1791_v0 = vmul.f32 %v7094_v23, %v4244_v5  ;;  %v7096_v2 = vstv %s7083_s4  ;;  %s7100_s18 = sld [smem:[#allocation166_spill]]  ;;  %v1979_v57 = vmul.f32 %v7101_v46, %v3715_v58  ;;  %v1881_v62 = vadd.f32 %v1879_v51, %v1875_v25 }
 0x2b7   : > { %v1797_v28 = vmul.f32 %v7096_v2, %v4247_v63  ;;  %v7098_v47 = vstv %s7086_s28  ;;  %s7103_s20 = sld [smem:[#allocation143_spill]]  ;;  %v1475_v23 = vadd.f32 %v1473_v34, %v1363_v48  ;;  %v1787_v2 = vadd.f32 %v1785_v29, %v1781_v37 }
 0x2b8   : > { %v1885_v41 = vmul.f32 %v4668_v36, %v7098_v47  ;;  %v7102_v30 = vstv %s7090_s25  ;;  %s7104_s0 = sld [smem:[#allocation170_spill]]  ;;  %v1981_v12 = vadd.f32 %v1979_v57, %v1975_v15  ;;  %v7108_v46 = vstv %s4323_s1 }
 0x2b9   : > { %v1985_v22 = vmul.f32 %v7102_v30, %v3835_v20  ;;  %v7105_v21 = vstv %s7093_s19  ;;  %s4965_s16 = sld [smem:[#allocation12 + $0x1]]  ;;  %v1991_v30 = vmul.f32 %v7108_v46, %v3896_v27  ;;  %v1793_v48 = vadd.f32 %v1791_v0, %v1787_v2 }
 0x2ba   : > { %v1891_v6 = vmul.f32 %v7105_v21, %v3925_v31  ;;  %v7106_v18 = vstv %s7095_s24  ;;  %s4975_s6 = sld [smem:[#allocation12 + $0xa]]  ;;  %v1887_v29 = vadd.f32 %v1885_v41, %v1881_v62  ;;  %v7112_v37 = vstv %s4274_s17 }
 0x2bb   : > { %v1691_v3 = vadd.f32 %v7106_v18, %v1687_v9  ;;  %v7107_v61 = vstv %s7097_s26  ;;  %s7109_s15 = sld [smem:[#allocation171_spill]]  ;;  %v1909_v25 = vmul.f32 %v7112_v37, %v4247_v63  ;;  %v1987_v57 = vadd.f32 %v1985_v22, %v1981_v12 }
 0x2bc   : > { %v1897_v47 = vmul.f32 %v7107_v61, %v3928_v60  ;;  %v7110_v51 = vstv %s7100_s18  ;;  %s7111_s29 = sld [smem:[#allocation176_spill]]  ;;  %v1799_v41 = vadd.f32 %v1797_v28, %v1793_v48  ;;  %v1893_v2 = vadd.f32 %v1891_v6, %v1887_v29 }
 0x2bd   : > { %v1903_v34 = vmul.f32 %v7110_v51, %v4244_v5  ;;  %s7113_s21 = sld [smem:[#allocation158_spill]]  ;;  %v7114_v9 = vstv %s7103_s20  ;;  %v4986_v15 = vmax.f32 %v1691_v3, 0.0  ;;  %v2087_v62 = vmul.f32 %v2086_v19, %v3744_v16 }
 0x2be   : > { %v1585_v21 = vmul.f32 %v7114_v9, %v4948_v40  ;;  %s7115_s1 = sld [smem:[#allocation177_spill]]  ;;  %v7116_v18 = vstv %s7104_s0  ;;  %v2091_v3 = vmul.f32 %v2090_v45, %v3715_v58  ;;  %v1993_v61 = vadd.f32 %v1991_v30, %v1987_v57 }
 0x2bf   : > { %v1997_v0 = vmul.f32 %v4668_v36, %v7116_v18  ;;  %s4991_s2 = sld [smem:[#allocation12 + $0x13]]  ;;  %v1899_v16 = vadd.f32 %v1897_v47, %v1893_v2 }
 0x2c0   : > { %s7117_s7 = sld [smem:[#allocation172_spill]]  ;;  %v1587_v22 = vadd.f32 %v1585_v21, %v1475_v23  ;;  %v2093_v19 = vadd.f32 %v2091_v3, %v2087_v62 }
 0x2c1   : > { %s7118_s27 = sld [smem:[#allocation173_spill]]  ;;  %v7122_v12 = vstv %s7109_s15  ;;  %v1999_v23 = vadd.f32 %v1997_v0, %v1993_v61  ;;  %v1905_v18 = vadd.f32 %v1903_v34, %v1899_v16  ;;  %v486_v61 = vstv %s4965_s16  ;;  %s7150_s16 = smov 17  }
 0x2c2   : > { %s7119_s17 = sld [smem:[#allocation174_spill]]  ;;  %v2003_v46 = vmul.f32 %v7122_v12, %v3925_v31  ;;  %v7123_v28 = vstv %s7111_s29  ;;  %v582_v12 = vstv %s4975_s6 }
 0x2c3   : > { %s7120_s22 = sld [smem:[#allocation153_spill]]  ;;  %v2097_v48 = vmul.f32 %v7123_v28, %v3835_v20  ;;  %v7124_v6 = vstv %s7113_s21  ;;  %v1911_v34 = vadd.f32 %v1909_v25, %v1905_v18 }
 0x2c4   : > { %s4999_s5 = sld [smem:[#allocation12 + $0x1c]]  ;;  %v1803_v29 = vadd.f32 %v7124_v6, %v1799_v41  ;;  %v7126_v58 = vstv %s7115_s1  ;;  %v2005_v2 = vadd.f32 %v2003_v46, %v1999_v23  ;;  %v488_v6 = vmul.f32 %v486_v61, %v3946_v59 }
 0x2c5   : > { %s7121_s23 = sld [smem:[#allocation178_spill]]  ;;  %v2103_v45 = vmul.f32 %v7126_v58, %v3896_v27  ;;  %v2099_v27 = vadd.f32 %v2097_v48, %v2093_v19  ;;  %v694_v16 = vstv %s4991_s2 }
 0x2c6   : > { %s7125_s10 = sld [smem:[#allocation179_spill]]  ;;  %v7127_v30 = vstv %s7117_s7  ;;  %v5036_v28 = vmax.f32 %v1803_v29, 0.0 }
 0x2c7   : > { %s5012_s3 = sld [smem:[#allocation12 + $0x25]]  ;;  %v2009_v51 = vmul.f32 %v7127_v30, %v3928_v60  ;;  %v7128_v37 = vstv %s7118_s27  ;;  %v2105_v48 = vadd.f32 %v2103_v45, %v2099_v27 }
 0x2c8   : > { %v2015_v20 = vmul.f32 %v7128_v37, %v4244_v5  ;;  %v7129_v9 = vstv %s7119_s17  ;;  %s7132_s9 = sld [smem:[#allocation167_spill]] }
 0x2c9   : > { %v2021_v21 = vmul.f32 %v7129_v9, %v4247_v63  ;;  %v7130_v47 = vstv %s7120_s22  ;;  %s5029_s12 = sld [smem:[#allocation12 + $0x2e]]  ;;  %v2011_v46 = vadd.f32 %v2009_v51, %v2005_v2  ;;  %v696_v9 = vmul.f32 %v694_v16, %v3950_v43 }
 0x2ca   : > { %v1697_v57 = vmul.f32 %v7130_v47, %v4986_v15  ;;  %s7133_s8 = sld [smem:[#allocation180_spill]]  ;;  %v806_v23 = vstv %s4999_s5 }
 0x2cb   : > { %v7131_v41 = vstv %s7121_s23  ;;  %s7135_s13 = sld [smem:[#allocation181_spill]]  ;;  %v2017_v30 = vadd.f32 %v2015_v20, %v2011_v46 }
 0x2cc   : > { %v2109_v0 = vmul.f32 %v4668_v36, %v7131_v41  ;;  %v7134_v62 = vstv %s7125_s10  ;;  %s7136_s4 = sld [smem:[#allocation159_spill]]  ;;  %v1699_v36 = vadd.f32 %v1697_v57, %v1587_v22  ;;  %v808_v41 = vmul.f32 %v806_v23, %v3952_v13 }
 0x2cd   : > { %v2115_v3 = vmul.f32 %v7134_v62, %v3925_v31  ;;  %s5041_s28 = sld [smem:[#allocation12 + $0x37]]  ;;  %v584_v31 = vmul.f32 %v582_v12, %v3948_v35  ;;  %v918_v20 = vstv %s5012_s3 }
 0x2ce   : > { %v7137_v19 = vstv %s7132_s9  ;;  %v2111_v29 = vadd.f32 %v2109_v0, %v2105_v48  ;;  %s5053_s25 = sld [smem:[#allocation12 + $0x40]] }
 0x2cf   : > { %v1915_v58 = vadd.f32 %v7137_v19, %v1911_v34  ;;  %s7140_s19 = sld [smem:[#allocation182_spill]]  ;;  %v586_v51 = vadd.f32 %v584_v31, %v488_v6  ;;  %v1030_v48 = vstv %s5029_s12 }
 0x2d0   : > { %v7138_v25 = vstv %s7133_s8  ;;  %s7141_s24 = sld [smem:[#allocation175_spill]]  ;;  %v2117_v18 = vadd.f32 %v2115_v3, %v2111_v29 }
 0x2d1   : > { %v2121_v45 = vmul.f32 %v7138_v25, %v3928_v60  ;;  %v7139_v37 = vstv %s7135_s13  ;;  %s5061_s26 = sld [smem:[#allocation12 + $0x49]]  ;;  %v5066_v60 = vmax.f32 %v1915_v58, 0.0  ;;  %v698_v27 = vadd.f32 %v696_v9, %v586_v51 }
 0x2d2   : > { %v2127_v22 = vmul.f32 %v7139_v37, %v4244_v5  ;;  %v7142_v47 = vstv %s7136_s4  ;;  %s7143_s18 = sld [smem:[#allocation168_spill]]  ;;  %v2023_v5 = vadd.f32 %v2021_v21, %v2017_v30  ;;  %v920_v21 = vmul.f32 %v918_v20, %v3956_v10 }
 0x2d3   : > { %v1809_v57 = vmul.f32 %v7142_v47, %v5036_v28  ;;  %s5069_s20 = sld [smem:[#allocation12 + $0x52]]  ;;  %v2123_v2 = vadd.f32 %v2121_v45, %v2117_v18  ;;  %v810_v46 = vadd.f32 %v808_v41, %v698_v27  ;;  %v1032_v25 = vmul.f32 %v1030_v48, %v4071_v24 }
 0x2d4   : > { %s5074_s0 = sld [smem:[#allocation12 + $0x5b]]  ;;  %v1254_v37 = vstv %s5053_s25  ;;  %v7147_v9 = vstv %s4411_s14  ;;  %s7151_s25 = smov 16  }
 0x2d5   : > { %v1811_v0 = vadd.f32 %v1809_v57, %v1699_v36  ;;  %v7144_v62 = vstv %s7140_s19  ;;  %s5080_s15 = sld [smem:[#allocation12 + $0x64]]  ;;  %v2129_v19 = vadd.f32 %v2127_v22, %v2123_v2  ;;  %v922_v29 = vadd.f32 %v920_v21, %v810_v46 }
 0x2d6   : > { %v2133_v34 = vmul.f32 %v7144_v62, %v4247_v63  ;;  %v7145_v3 = vstv %s7141_s24  ;;  %s5087_s29 = sld [smem:[#allocation12 + $0x6d]]  ;;  %v1142_v63 = vstv %s5041_s28  ;;  %v7148_v57 = vstv %s4454_s30 }
 0x2d7   : > { %v2027_v6 = vadd.f32 %v7145_v3, %v2023_v5  ;;  %s5093_s21 = sld [smem:[#allocation12 + $0x76]]  ;;  %v1034_v22 = vadd.f32 %v1032_v25, %v922_v29  ;;  %v1144_v51 = vmul.f32 %v1142_v63, %v4136_v52  ;;  %v1366_v5 = vstv %s5061_s26 }
 0x2d8   : > { %v7146_v31 = vstv %s7143_s18  ;;  %s5100_s1 = sld [smem:[#allocation12 + $0x7f]]  ;;  %v2135_v30 = vadd.f32 %v2133_v34, %v2129_v19  ;;  %v1256_v41 = vmul.f32 %v1254_v37, %v4174_v44  ;;  %v487_v3 = vmul.f32 %v486_v61, %v4637_v50 }
 0x2d9   : > { %v1921_v36 = vmul.f32 %v7146_v31, %v5066_v60  ;;  %v5095_v58 = vmax.f32 %v2027_v6, 0.0  ;;  %s5103_s7 = sld [smem:[#allocation12 + $0x88]]  ;;  %v1146_v27 = vadd.f32 %v1144_v51, %v1034_v22  ;;  %v583_v6 = vmul.f32 %v582_v12, %v4650_v11 }
 0x2da   : > { %s5108_s27 = sld [smem:[#allocation12 + $0x2]]  ;;  %v2139_v18 = vadd.f32 %v7148_v57, %v2135_v30  ;;  %v1590_v2 = vstv %s5074_s0  ;;  %v1368_v21 = vmul.f32 %v1366_v5, %v4207_v55  ;;  %v695_v61 = vmul.f32 %v694_v16, %v4682_v17 }
 0x2db   : > { %v1923_v45 = vadd.f32 %v1921_v36, %v1811_v0  ;;  %v2033_v47 = vmul.f32 %v7147_v9, %v5095_v58  ;;  %s5116_s17 = sld [smem:[#allocation12 + $0xb]]  ;;  %v1478_v0 = vstv %s5069_s20  ;;  %v1258_v46 = vadd.f32 %v1256_v41, %v1146_v27 }
 0x2dc   : > { %s5123_s22 = sld [smem:[#allocation12 + $0x14]]  ;;  %v5125_v34 = vmax.f32 %v2139_v18, 0.0  ;;  %v1702_v31 = vstv %s5080_s15  ;;  %v7149_v36 = vstv %s4469_s11  ;;  %v1814_v29 = vstv %s5087_s29 }
 0x2dd   : > { %v2035_v62 = vadd.f32 %v2033_v47, %v1923_v45  ;;  %s5133_s14 = sld [smem:[#allocation12 + $0x1d]]  ;;  %v585_v25 = vadd.f32 %v583_v6, %v487_v3  ;;  %v1370_v12 = vadd.f32 %v1368_v21, %v1258_v46  ;;  %v1480_v45 = vmul.f32 %v1478_v0, %v4235_v42 }
 0x2de   : > { %v2145_v19 = vmul.f32 %v7149_v36, %v5125_v34  ;;  %s5146_s30 = sld [smem:[#allocation12 + $0x26]]  ;;  %v1592_v30 = vmul.f32 %v1590_v2, %v4286_v33  ;;  %v1704_v51 = vmul.f32 %v1702_v31, %v4367_v26  ;;  %v807_v16 = vmul.f32 %v806_v23, %v4713_v32 }
 0x2df   : > { %v697_v9 = vadd.f32 %v695_v61, %v585_v25  ;;  %s5158_s11 = sld [smem:[#allocation12 + $0x2f]]  ;;  %v1482_v47 = vadd.f32 %v1480_v45, %v1370_v12  ;;  %v1816_v57 = vmul.f32 %v1814_v29, %v4437_v54  ;;  %v1926_v18 = vstv %s5093_s21 }
 0x2e0   : > { %v2147_v22 = vadd.f32 %v2145_v19, %v2035_v62  ;;  %v2038_v27 = vstv %s5100_s1  ;;  %v919_v62 = vmul.f32 %v918_v20, %v4747_v39  ;;  %v490_v3 = vstv %s5108_s27  ;;  %s5169_s6 = sld [smem:[#allocation12 + $0x38]] }
 0x2e1   : > { %v809_v41 = vadd.f32 %v807_v16, %v697_v9  ;;  %v588_v6 = vstv %s5116_s17  ;;  %v1594_v23 = vadd.f32 %v1592_v30, %v1482_v47  ;;  %v492_v46 = vmul.f32 %v490_v3, %v3946_v59  ;;  %s5174_s2 = sld [smem:[#allocation12 + $0x41]] }
 0x2e2   : > { %2197 = vrot.lane.b32.xlu0 %v2147_v22, %s7150_s16  ;;  %v590_v21 = vmul.f32 %v588_v6, %v3948_v35  ;;  %v700_v36 = vstv %s5123_s22  ;;  %v2150_v19 = vstv %s5103_s7  ;;  %v1031_v20 = vmul.f32 %v1030_v48, %v4781_v1  ;;  %s5181_s5 = sld [smem:[#allocation12 + $0x4a]]  ;;  %s7153_s16 = smov 15  }
 0x2e3   : > { %v921_v25 = vadd.f32 %v919_v62, %v809_v41  ;;  %v812_v61 = vstv %s5133_s14  ;;  %v1706_v12 = vadd.f32 %v1704_v51, %v1594_v23  ;;  %v1928_v45 = vmul.f32 %v1926_v18, %v4483_v56  ;;  %s5187_s23 = sld [smem:[#allocation12 + $0x53]] }
 0x2e4   : > { %v592_v30 = vadd.f32 %v590_v21, %v492_v46  ;;  %v702_v22 = vmul.f32 %v700_v36, %v3950_v43  ;;  %v2040_v9 = vmul.f32 %v2038_v27, %v4543_v38  ;;  %v1143_v16 = vmul.f32 %v1142_v63, %v4812_v14  ;;  %s5194_s10 = sld [smem:[#allocation12 + $0x5c]] }
 0x2e5   : > { %v1033_v48 = vadd.f32 %v1031_v20, %v921_v25  ;;  %v924_v51 = vstv %s5146_s30  ;;  %v1818_v47 = vadd.f32 %v1816_v57, %v1706_v12  ;;  %v2152_v41 = vmul.f32 %v2150_v19, %v4585_v7  ;;  %s5202_s3 = sld [smem:[#allocation12 + $0x65]] }
 0x2e6   : > { %v704_v62 = vadd.f32 %v702_v22, %v592_v30  ;;  %v814_v23 = vmul.f32 %v812_v61, %v3952_v13  ;;  %v1255_v63 = vmul.f32 %v1254_v37, %v4846_v53  ;;  %v1367_v21 = vmul.f32 %v1366_v5, %v4883_v8  ;;  %s5211_s9 = sld [smem:[#allocation12 + $0x6e]] }
 0x2e7   : > { %v1145_v46 = vadd.f32 %v1143_v16, %v1033_v48  ;;  %v1036_v25 = vstv %s5158_s11  ;;  %v1930_v57 = vadd.f32 %v1928_v45, %v1818_v47  ;;  %v1479_v20 = vmul.f32 %v1478_v0, %v4914_v49  ;;  %s5224_s12 = sld [smem:[#allocation12 + $0x77]] }
 0x2e8   : > { %v816_v12 = vadd.f32 %v814_v23, %v704_v62  ;;  %v926_v30 = vmul.f32 %v924_v51, %v3956_v10  ;;  %v1591_v48 = vmul.f32 %v1590_v2, %v4948_v40  ;;  %v1703_v37 = vmul.f32 %v1702_v31, %v4986_v15  ;;  %s5228_s8 = sld [smem:[#allocation12 + $0x3]] }
 0x2e9   : > { %v1257_v22 = vadd.f32 %v1255_v63, %v1145_v46  ;;  %v1148_v5 = vstv %s5169_s6  ;;  %v2042_v45 = vadd.f32 %v2040_v9, %v1930_v57  ;;  %v1815_v0 = vmul.f32 %v1814_v29, %v5036_v28  ;;  %s5233_s13 = sld [smem:[#allocation12 + $0xc]] }
 0x2ea   : > { %v928_v16 = vadd.f32 %v926_v30, %v816_v12  ;;  %v1038_v47 = vmul.f32 %v1036_v25, %v4071_v24  ;;  %v1927_v23 = vmul.f32 %v1926_v18, %v5066_v60  ;;  %v2039_v2 = vmul.f32 %v2038_v27, %v5095_v58  ;;  %s5239_s4 = sld [smem:[#allocation12 + $0x15]] }
 0x2eb   : > { %v1369_v62 = vadd.f32 %v1367_v21, %v1257_v22  ;;  %v1260_v31 = vstv %s5174_s2  ;;  %v2154_v9 = vadd.f32 %v2152_v41, %v2042_v45  ;;  %v1150_v29 = vmul.f32 %v1148_v5, %v4136_v52  ;;  %s5242_s28 = sld [smem:[#allocation12 + $0x80]] }
 0x2ec   : > { %v1040_v46 = vadd.f32 %v1038_v47, %v928_v16  ;;  %v1372_v63 = vstv %s5181_s5  ;;  %v1484_v18 = vstv %s5187_s23  ;;  %v491_v27 = vmul.f32 %v490_v3, %v4637_v50  ;;  %s5252_s19 = sld [smem:[#allocation12 + $0x1e]] }
 0x2ed   : > { %v1481_v21 = vadd.f32 %v1479_v20, %v1369_v62  ;;  %v589_v41 = vmul.f32 %v588_v6, %v4650_v11  ;;  %2209 = vrot.lane.b32.xlu1 %v2154_v9, %s7151_s25  ;;  %v1262_v12 = vmul.f32 %v1260_v31, %v4174_v44  ;;  %v1596_v30 = vstv %s5194_s10  ;;  %s5255_s24 = sld [smem:[#allocation12 + $0x89]] }
 0x2ee   : > { %v1152_v57 = vadd.f32 %v1150_v29, %v1040_v46  ;;  %v1708_v20 = vstv %s5202_s3  ;;  %v6399_v45 = vstv %s5211_s9  ;;  %v701_v6 = vmul.f32 %v700_v36, %v4682_v17  ;;  %s5269_s26 = sld [smem:[#allocation12 + $0x27]] }
 0x2ef   : > { %v1593_v22 = vadd.f32 %v1591_v48, %v1481_v21  ;;  %v591_v3 = vadd.f32 %v589_v41, %v491_v27  ;;  %v2151_v16 = vmul.f32 %v2150_v19, %v5125_v34  ;;  %v1374_v62 = vmul.f32 %v1372_v63, %v4207_v55  ;;  %s5284_s18 = sld [smem:[#allocation12 + $0x30]] }
 0x2f0   : > { %v1264_v47 = vadd.f32 %v1262_v12, %v1152_v57  ;;  %v1486_v48 = vmul.f32 %v1484_v18, %v4235_v42  ;;  %v1598_v36 = vmul.f32 %v1596_v30, %v4286_v33  ;;  %v813_v19 = vmul.f32 %v812_v61, %v4713_v32  ;;  %s5293_s20 = sld [smem:[#allocation12 + $0x39]] }
 0x2f1   : > { %v1705_v9 = vadd.f32 %v1703_v37, %v1593_v22  ;;  %v703_v46 = vadd.f32 %v701_v6, %v591_v3  ;;  %v1710_v21 = vmul.f32 %v1708_v20, %v4367_v26  ;;  %v1822_v27 = vmul.f32 %v6399_v45, %v4437_v54  ;;  %s5299_s0 = sld [smem:[#allocation12 + $0x42]] }
 0x2f2   : > { %v1376_v29 = vadd.f32 %v1374_v62, %v1264_v47  ;;  %v1932_v41 = vstv %s5224_s12  ;;  %v925_v12 = vmul.f32 %v924_v51, %v4747_v39  ;;  %v1037_v61 = vmul.f32 %v1036_v25, %v4781_v1  ;;  %s5306_s15 = sld [smem:[#allocation12 + $0x4b]] }
 0x2f3   : > { %v1817_v37 = vadd.f32 %v1815_v0, %v1705_v9  ;;  %v815_v57 = vadd.f32 %v813_v19, %v703_v46  ;;  %v494_v3 = vstv %s5228_s8  ;;  %v594_v6 = vstv %s5233_s13  ;;  %s5311_s29 = sld [smem:[#allocation12 + $0x54]] }
 0x2f4   : > { %v1488_v22 = vadd.f32 %v1486_v48, %v1376_v29  ;;  %v706_v47 = vstv %s5239_s4  ;;  %v496_v0 = vmul.f32 %v494_v3, %v3946_v59  ;;  %v596_v9 = vmul.f32 %v594_v6, %v3948_v35  ;;  %s5318_s21 = sld [smem:[#allocation12 + $0x5d]] }
 0x2f5   : > { %v1929_v62 = vadd.f32 %v1927_v23, %v1817_v37  ;;  %v927_v45 = vadd.f32 %v925_v12, %v815_v57  ;;  %v2044_v25 = vstv %s5242_s28  ;;  %v1149_v48 = vmul.f32 %v1148_v5, %v4812_v14  ;;  %s5323_s1 = sld [smem:[#allocation12 + $0x66]] }
 0x2f6   : > { %v1600_v51 = vadd.f32 %v1598_v36, %v1488_v22  ;;  %v818_v46 = vstv %s5252_s19  ;;  %v598_v29 = vadd.f32 %v596_v9, %v496_v0  ;;  %v708_v37 = vmul.f32 %v706_v47, %v3950_v43  ;;  %s5330_s7 = sld [smem:[#allocation12 + $0x6f]] }
 0x2f7   : > { %v2041_v23 = vadd.f32 %v2039_v2, %v1929_v62  ;;  %v1039_v19 = vadd.f32 %v1037_v61, %v927_v45  ;;  %v2156_v36 = vstv %s5255_s24  ;;  %v1261_v5 = vmul.f32 %v1260_v31, %v4846_v53  ;;  %s5339_s27 = sld [smem:[#allocation12 + $0x78]] }
 0x2f8   : > { %v1712_v57 = vadd.f32 %v1710_v21, %v1600_v51  ;;  %v930_v12 = vstv %s5269_s26  ;;  %v710_v45 = vadd.f32 %v708_v37, %v598_v29  ;;  %v820_v61 = vmul.f32 %v818_v46, %v3952_v13  ;;  %s5352_s17 = sld [smem:[#allocation12 + $0x81]]  ;;  %s7155_s26 = smov 1  }
 0x2f9   : > { %v2153_v2 = vadd.f32 %v2151_v16, %v2041_v23  ;;  %v1151_v22 = vadd.f32 %v1149_v48, %v1039_v19  ;;  %v1934_v62 = vmul.f32 %v1932_v41, %v4483_v56  ;;  %v2046_v31 = vmul.f32 %v2044_v25, %v4543_v38  ;;  %s5361_s22 = sld [smem:[#allocation12 + $0x5]] }
 0x2fa   : > { %v1824_v21 = vadd.f32 %v1822_v27, %v1712_v57  ;;  %v1042_v0 = vstv %s5284_s18  ;;  %v1373_v9 = vmul.f32 %v1372_v63, %v4883_v8  ;;  %v822_v27 = vadd.f32 %v820_v61, %v710_v45  ;;  %s5367_s14 = sld [smem:[#allocation12 + $0xe]] }
 0x2fb   : > { %2207 = vrot.lane.b32.xlu0 %v2153_v2, %s7151_s25  ;;  %v1263_v16 = vadd.f32 %v1261_v5, %v1151_v22  ;;  %v932_v51 = vmul.f32 %v930_v12, %v3956_v10  ;;  %v2158_v23 = vmul.f32 %v2156_v36, %v4585_v7  ;;  %v1485_v19 = vmul.f32 %v1484_v18, %v4914_v49  ;;  %s5374_s30 = sld [smem:[#allocation12 + $0x17]] }
 0x2fc   : > { %v1936_v48 = vadd.f32 %v1934_v62, %v1824_v21  ;;  %v1154_v29 = vstv %s5293_s20  ;;  %v1597_v63 = vmul.f32 %v1596_v30, %v4948_v40  ;;  %v1044_v5 = vmul.f32 %v1042_v0, %v4071_v24  ;;  %s5380_s11 = sld [smem:[#allocation12 + $0x8a]] }
 0x2fd   : > { %v1375_v37 = vadd.f32 %v1373_v9, %v1263_v16  ;;  %v934_v57 = vadd.f32 %v932_v51, %v822_v27  ;;  %v1709_v22 = vmul.f32 %v1708_v20, %v4986_v15  ;;  %v7152_v45 = vstv %s5211_s9  ;;  %s5391_s6 = sld [smem:[#allocation12 + $0x20]] }
 0x2fe   : > { %v2048_v2 = vadd.f32 %v2046_v31, %v1936_v48  ;;  %v1821_v18 = vmul.f32 %v7152_v45, %v5036_v28  ;;  %v1266_v61 = vstv %s5299_s0  ;;  %v1156_v62 = vmul.f32 %v1154_v29, %v4136_v52  ;;  %s5402_s2 = sld [smem:[#allocation12 + $0x29]] }
 0x2ff   : > { %v1487_v21 = vadd.f32 %v1485_v19, %v1375_v37  ;;  %v1046_v30 = vadd.f32 %v1044_v5, %v934_v57  ;;  %v1378_v31 = vstv %s5306_s15  ;;  %v1933_v16 = vmul.f32 %v1932_v41, %v5066_v60  ;;  %s5419_s5 = sld [smem:[#allocation12 + $0x32]] }
 0x300   : > { %v2160_v20 = vadd.f32 %v2158_v23, %v2048_v2  ;;  %v2045_v9 = vmul.f32 %v2044_v25, %v5095_v58  ;;  %v495_v27 = vmul.f32 %v494_v3, %v4637_v50  ;;  %v1268_v19 = vmul.f32 %v1266_v61, %v4174_v44  ;;  %s5430_s23 = sld [smem:[#allocation12 + $0x3b]] }
 0x301   : > { %v1599_v51 = vadd.f32 %v1597_v63, %v1487_v21  ;;  %v1158_v48 = vadd.f32 %v1156_v62, %v1046_v30  ;;  %v1490_v37 = vstv %s5311_s29  ;;  %v1380_v41 = vmul.f32 %v1378_v31, %v4207_v55  ;;  %s5434_s10 = sld [smem:[#allocation12 + $0x44]] }
 0x302   : > { %2219 = vrot.lane.b32.xlu1 %v2160_v20, %s7153_s16  ;;  %v1602_v3 = vstv %s5318_s21  ;;  %v1714_v25 = vstv %s5323_s1  ;;  %v595_v23 = vmul.f32 %v594_v6, %v4650_v11  ;;  %v1826_v5 = vstv %s5330_s7  ;;  %s5441_s3 = sld [smem:[#allocation12 + $0x4d]] }
 0x303   : > { %v1711_v63 = vadd.f32 %v1709_v22, %v1599_v51  ;;  %v1270_v57 = vadd.f32 %v1268_v19, %v1158_v48  ;;  %v6400_v2 = vstv %s5339_s27  ;;  %v2157_v45 = vmul.f32 %v2156_v36, %v5125_v34  ;;  %s5446_s9 = sld [smem:[#allocation12 + $0x56]] }
 0x304   : > { %v1492_v21 = vmul.f32 %v1490_v37, %v4235_v42  ;;  %v597_v30 = vadd.f32 %v595_v23, %v495_v27  ;;  %v707_v62 = vmul.f32 %v706_v47, %v4682_v17  ;;  %v1604_v20 = vmul.f32 %v1602_v3, %v4286_v33  ;;  %s5453_s12 = sld [smem:[#allocation12 + $0x5f]] }
 0x305   : > { %v1823_v6 = vadd.f32 %v1821_v18, %v1711_v63  ;;  %v1382_v22 = vadd.f32 %v1380_v41, %v1270_v57  ;;  %v1716_v36 = vmul.f32 %v1714_v25, %v4367_v26  ;;  %v1828_v51 = vmul.f32 %v1826_v5, %v4437_v54  ;;  %s5462_s8 = sld [smem:[#allocation12 + $0x68]] }
 0x306   : > { %v1940_v47 = vmul.f32 %v6400_v2, %v4483_v56  ;;  %v709_v27 = vadd.f32 %v707_v62, %v597_v30  ;;  %v819_v48 = vmul.f32 %v818_v46, %v4713_v32  ;;  %v931_v41 = vmul.f32 %v930_v12, %v4747_v39  ;;  %s5471_s13 = sld [smem:[#allocation12 + $0x71]] }
 0x307   : > { %v1935_v18 = vadd.f32 %v1933_v16, %v1823_v6  ;;  %v1494_v19 = vadd.f32 %v1492_v21, %v1382_v22  ;;  %v502_v23 = vstv %s5361_s22  ;;  %v606_v2 = vstv %s5367_s14  ;;  %s5486_s4 = sld [smem:[#allocation12 + $0x7a]] }
 0x308   : > { %v821_v63 = vadd.f32 %v819_v48, %v709_v27  ;;  %v504_v57 = vmul.f32 %v502_v23, %v3946_v59  ;;  %v718_v30 = vstv %s5374_s30  ;;  %v2050_v16 = vstv %s5352_s17  ;;  %s5492_s28 = sld [smem:[#allocation12 + $0x6]] }
 0x309   : > { %v2047_v46 = vadd.f32 %v2045_v9, %v1935_v18  ;;  %v1606_v62 = vadd.f32 %v1604_v20, %v1494_v19  ;;  %v608_v21 = vmul.f32 %v606_v2, %v3948_v35  ;;  %v2162_v12 = vstv %s5380_s11  ;;  %s5499_s25 = sld [smem:[#allocation12 + $0xf]] }
 0x30a   : > { %v933_v6 = vadd.f32 %v931_v41, %v821_v63  ;;  %v1043_v22 = vmul.f32 %v1042_v0, %v4781_v1  ;;  %v830_v27 = vstv %s5391_s6  ;;  %v720_v18 = vmul.f32 %v718_v30, %v3950_v43  ;;  %s5503_s19 = sld [smem:[#allocation12 + $0x18]] }
 0x30b   : > { %v2159_v48 = vadd.f32 %v2157_v45, %v2047_v46  ;;  %v1718_v9 = vadd.f32 %v1716_v36, %v1606_v62  ;;  %v610_v20 = vadd.f32 %v608_v21, %v504_v57  ;;  %v2052_v19 = vmul.f32 %v2050_v16, %v4543_v38  ;;  %s5506_s24 = sld [smem:[#allocation12 + $0x83]] }
 0x30c   : > { %v1045_v41 = vadd.f32 %v1043_v22, %v933_v6  ;;  %v1155_v0 = vmul.f32 %v1154_v29, %v4812_v14  ;;  %v942_v63 = vstv %s5402_s2  ;;  %v2164_v36 = vmul.f32 %v2162_v12, %v4585_v7  ;;  %s5516_s18 = sld [smem:[#allocation12 + $0x21]] }
 0x30d   : > { %2217 = vrot.lane.b32.xlu0 %v2159_v48, %s7153_s16  ;;  %v1830_v45 = vadd.f32 %v1828_v51, %v1718_v9  ;;  %v722_v57 = vadd.f32 %v720_v18, %v610_v20  ;;  %v832_v46 = vmul.f32 %v830_v27, %v3952_v13  ;;  %v1267_v62 = vmul.f32 %v1266_v61, %v4846_v53  ;;  %s5519_s20 = sld [smem:[#allocation12 + $0x8c]] }
 0x30e   : > { %v1157_v29 = vadd.f32 %v1155_v0, %v1045_v41  ;;  %v1379_v21 = vmul.f32 %v1378_v31, %v4883_v8  ;;  %v1054_v51 = vstv %s5419_s5  ;;  %v1491_v22 = vmul.f32 %v1490_v37, %v4914_v49  ;;  %s5533_s0 = sld [smem:[#allocation12 + $0x2a]]  ;;  %s7157_s5 = smov 127  }
 0x30f   : > { %v1942_v6 = vadd.f32 %v1940_v47, %v1830_v45  ;;  %v834_v48 = vadd.f32 %v832_v46, %v722_v57  ;;  %v944_v9 = vmul.f32 %v942_v63, %v3956_v10  ;;  %v1603_v61 = vmul.f32 %v1602_v3, %v4948_v40  ;;  %s5548_s15 = sld [smem:[#allocation12 + $0x33]] }
 0x310   : > { %v1269_v20 = vadd.f32 %v1267_v62, %v1157_v29  ;;  %v1715_v31 = vmul.f32 %v1714_v25, %v4986_v15  ;;  %v1166_v18 = vstv %s5430_s23  ;;  %v1827_v37 = vmul.f32 %v1826_v5, %v5036_v28  ;;  %s5557_s29 = sld [smem:[#allocation12 + $0x3c]] }
 0x311   : > { %v2054_v47 = vadd.f32 %v2052_v19, %v1942_v6  ;;  %v946_v41 = vadd.f32 %v944_v9, %v834_v48  ;;  %v1056_v0 = vmul.f32 %v1054_v51, %v4071_v24  ;;  %v7154_v3 = vstv %s5339_s27  ;;  %s5566_s21 = sld [smem:[#allocation12 + $0x45]] }
 0x312   : > { %v1381_v45 = vadd.f32 %v1379_v21, %v1269_v20  ;;  %v1939_v57 = vmul.f32 %v7154_v3, %v5066_v60  ;;  %v2051_v25 = vmul.f32 %v2050_v16, %v5095_v58  ;;  %v1278_v46 = vstv %s5434_s10  ;;  %s5571_s1 = sld [smem:[#allocation12 + $0x4e]] }
 0x313   : > { %v2166_v19 = vadd.f32 %v2164_v36, %v2054_v47  ;;  %v1058_v29 = vadd.f32 %v1056_v0, %v946_v41  ;;  %v1168_v5 = vmul.f32 %v1166_v18, %v4136_v52  ;;  %v1390_v62 = vstv %s5441_s3  ;;  %s5576_s7 = sld [smem:[#allocation12 + $0x57]] }
 0x314   : > { %v1493_v21 = vadd.f32 %v1491_v22, %v1381_v45  ;;  %v1502_v6 = vstv %s5446_s9  ;;  %v503_v16 = vmul.f32 %v502_v23, %v4637_v50  ;;  %v607_v36 = vmul.f32 %v606_v2, %v4650_v11  ;;  %s5581_s27 = sld [smem:[#allocation12 + $0x60]] }
 0x315   : > { %2229 = vrot.lane.b32.xlu1 %v2166_v19, %s7155_s26  ;;  %v1170_v48 = vadd.f32 %v1168_v5, %v1058_v29  ;;  %v1280_v9 = vmul.f32 %v1278_v46, %v4174_v44  ;;  %v1614_v20 = vstv %s5453_s12  ;;  %v1726_v22 = vstv %s5462_s8  ;;  %s5587_s17 = sld [smem:[#allocation12 + $0x69]] }
 0x316   : > { %v1605_v47 = vadd.f32 %v1603_v61, %v1493_v21  ;;  %v6401_v41 = vstv %s5471_s13  ;;  %v609_v23 = vadd.f32 %v607_v36, %v503_v16  ;;  %v719_v2 = vmul.f32 %v718_v30, %v4682_v17  ;;  %s5596_s22 = sld [smem:[#allocation12 + $0x72]] }
 0x317   : > { %v2163_v0 = vmul.f32 %v2162_v12, %v5125_v34  ;;  %v1282_v45 = vadd.f32 %v1280_v9, %v1170_v48  ;;  %v1392_v3 = vmul.f32 %v1390_v62, %v4207_v55  ;;  %v1504_v61 = vmul.f32 %v1502_v6, %v4235_v42  ;;  %s5601_s14 = sld [smem:[#allocation12 + $0x7b]] }
 0x318   : > { %v1717_v19 = vadd.f32 %v1715_v31, %v1605_v47  ;;  %v1616_v30 = vmul.f32 %v1614_v20, %v4286_v33  ;;  %v721_v29 = vadd.f32 %v719_v2, %v609_v23  ;;  %v831_v12 = vmul.f32 %v830_v27, %v4713_v32  ;;  %s5609_s30 = sld [smem:[#allocation12 + $0x84]] }
 0x319   : > { %v1394_v5 = vadd.f32 %v1392_v3, %v1282_v45  ;;  %v1728_v21 = vmul.f32 %v1726_v22, %v4367_v26  ;;  %v1840_v16 = vmul.f32 %v6401_v41, %v4437_v54  ;;  %v1950_v36 = vstv %s5486_s4  ;;  %s5618_s11 = sld [smem:[#allocation12 + $0x7]] }
 0x31a   : > { %v1829_v31 = vadd.f32 %v1827_v37, %v1717_v19  ;;  %v833_v48 = vadd.f32 %v831_v12, %v721_v29  ;;  %v943_v9 = vmul.f32 %v942_v63, %v4747_v39  ;;  %v1055_v27 = vmul.f32 %v1054_v51, %v4781_v1  ;;  %s5626_s16 = sld [smem:[#allocation12 + $0x10]] }
 0x31b   : > { %v1506_v47 = vadd.f32 %v1504_v61, %v1394_v5  ;;  %v506_v23 = vstv %s5492_s28  ;;  %v612_v2 = vstv %s5499_s25  ;;  %v724_v45 = vstv %s5503_s19  ;;  %s5633_s6 = sld [smem:[#allocation12 + $0x19]] }
 0x31c   : > { %v1941_v3 = vadd.f32 %v1939_v57, %v1829_v31  ;;  %v945_v41 = vadd.f32 %v943_v9, %v833_v48  ;;  %v508_v37 = vmul.f32 %v506_v23, %v3946_v59  ;;  %v614_v19 = vmul.f32 %v612_v2, %v3948_v35  ;;  %s5639_s2 = sld [smem:[#allocation12 + $0x8d]] }
 0x31d   : > { %v1618_v29 = vadd.f32 %v1616_v30, %v1506_v47  ;;  %v2062_v63 = vstv %s5506_s24  ;;  %v1167_v51 = vmul.f32 %v1166_v18, %v4812_v14  ;;  %v836_v61 = vstv %s5516_s18  ;;  %s5648_s23 = sld [smem:[#allocation12 + $0x22]] }
 0x31e   : > { %v2053_v12 = vadd.f32 %v2051_v25, %v1941_v3  ;;  %v1057_v5 = vadd.f32 %v1055_v27, %v945_v41  ;;  %v616_v57 = vadd.f32 %v614_v19, %v508_v37  ;;  %v726_v31 = vmul.f32 %v724_v45, %v3950_v43  ;;  %s5661_s10 = sld [smem:[#allocation12 + $0x2b]] }
 0x31f   : > { %v1730_v48 = vadd.f32 %v1728_v21, %v1618_v29  ;;  %v2174_v30 = vstv %s5519_s20  ;;  %v1279_v9 = vmul.f32 %v1278_v46, %v4846_v53  ;;  %v948_v18 = vstv %s5533_s0  ;;  %s5676_s3 = sld [smem:[#allocation12 + $0x34]]  ;;  %s7159_s20 = smov 113  }
 0x320   : > { %v2165_v47 = vadd.f32 %v2163_v0, %v2053_v12  ;;  %v1169_v25 = vadd.f32 %v1167_v51, %v1057_v5  ;;  %v728_v3 = vadd.f32 %v726_v31, %v616_v57  ;;  %v838_v41 = vmul.f32 %v836_v61, %v3952_v13  ;;  %s5682_s9 = sld [smem:[#allocation12 + $0x3d]] }
 0x321   : > { %v1842_v27 = vadd.f32 %v1840_v16, %v1730_v48  ;;  %v1952_v21 = vmul.f32 %v1950_v36, %v4483_v56  ;;  %v1060_v37 = vstv %s5548_s15  ;;  %v1391_v0 = vmul.f32 %v1390_v62, %v4883_v8  ;;  %s5689_s12 = sld [smem:[#allocation12 + $0x46]] }
 0x322   : > { %2227 = vrot.lane.b32.xlu0 %v2165_v47, %s7155_s26  ;;  %v1281_v46 = vadd.f32 %v1279_v9, %v1169_v25  ;;  %v840_v19 = vadd.f32 %v838_v41, %v728_v3  ;;  %v950_v16 = vmul.f32 %v948_v18, %v3956_v10  ;;  %v2064_v51 = vmul.f32 %v2062_v63, %v4543_v38  ;;  %s5698_s8 = sld [smem:[#allocation12 + $0x4f]] }
 0x323   : > { %v1954_v29 = vadd.f32 %v1952_v21, %v1842_v27  ;;  %v2176_v12 = vmul.f32 %v2174_v30, %v4585_v7  ;;  %v1172_v5 = vstv %s5557_s29  ;;  %v1503_v62 = vmul.f32 %v1502_v6, %v4914_v49  ;;  %s5710_s4 = sld [smem:[#allocation12 + $0x61]] }
 0x324   : > { %v1393_v57 = vadd.f32 %v1391_v0, %v1281_v46  ;;  %v952_v31 = vadd.f32 %v950_v16, %v840_v19  ;;  %v1062_v48 = vmul.f32 %v1060_v37, %v4071_v24  ;;  %v1615_v47 = vmul.f32 %v1614_v20, %v4948_v40  ;;  %s5719_s28 = sld [smem:[#allocation12 + $0x6a]] }
 0x325   : > { %v2066_v9 = vadd.f32 %v2064_v51, %v1954_v29  ;;  %v1727_v25 = vmul.f32 %v1726_v22, %v4986_v15  ;;  %v1284_v3 = vstv %s5566_s21  ;;  %v7156_v41 = vstv %s5471_s13  ;;  %s5703_s13 = sld [smem:[#allocation12 + $0x58]] }
 0x326   : > { %v1505_v6 = vadd.f32 %v1503_v62, %v1393_v57  ;;  %v1839_v27 = vmul.f32 %v7156_v41, %v5036_v28  ;;  %v1064_v21 = vadd.f32 %v1062_v48, %v952_v31  ;;  %v1174_v46 = vmul.f32 %v1172_v5, %v4136_v52  ;;  %s5728_s25 = sld [smem:[#allocation12 + $0x73]] }
 0x327   : > { %v2178_v20 = vadd.f32 %v2176_v12, %v2066_v9  ;;  %v1951_v22 = vmul.f32 %v1950_v36, %v5066_v60  ;;  %v1396_v0 = vstv %s5571_s1  ;;  %v507_v19 = vmul.f32 %v506_v23, %v4637_v50  ;;  %s5745_s19 = sld [smem:[#allocation12 + $0x8]] }
 0x328   : > { %v1617_v16 = vadd.f32 %v1615_v47, %v1505_v6  ;;  %v1176_v29 = vadd.f32 %v1174_v46, %v1064_v21  ;;  %v1286_v51 = vmul.f32 %v1284_v3, %v4174_v44  ;;  %v1508_v57 = vstv %s5576_s7  ;;  %s5754_s24 = sld [smem:[#allocation12 + $0x11]] }
 0x329   : > { %2239 = vrot.lane.b32.xlu1 %v2178_v20, %s7157_s5  ;;  %v2063_v36 = vmul.f32 %v2062_v63, %v5095_v58  ;;  %v1620_v12 = vstv %s5581_s27  ;;  %v1732_v23 = vstv %s5587_s17  ;;  %v613_v62 = vmul.f32 %v612_v2, %v4650_v11  ;;  %s5762_s26 = sld [smem:[#allocation12 + $0x1a]] }
 0x32a   : > { %v1729_v31 = vadd.f32 %v1727_v25, %v1617_v16  ;;  %v1288_v48 = vadd.f32 %v1286_v51, %v1176_v29  ;;  %v1398_v9 = vmul.f32 %v1396_v0, %v4207_v55  ;;  %v1844_v47 = vstv %s5596_s22  ;;  %s5765_s18 = sld [smem:[#allocation12 + $0x7c]] }
 0x32b   : > { %v2175_v63 = vmul.f32 %v2174_v30, %v5125_v34  ;;  %v1510_v6 = vmul.f32 %v1508_v57, %v4235_v42  ;;  %v615_v41 = vadd.f32 %v613_v62, %v507_v19  ;;  %v725_v2 = vmul.f32 %v724_v45, %v4682_v17  ;;  %s5775_s0 = sld [smem:[#allocation12 + $0x23]] }
 0x32c   : > { %v1841_v25 = vadd.f32 %v1839_v27, %v1729_v31  ;;  %v1400_v21 = vadd.f32 %v1398_v9, %v1288_v48  ;;  %v1622_v46 = vmul.f32 %v1620_v12, %v4286_v33  ;;  %v1734_v30 = vmul.f32 %v1732_v23, %v4367_v26  ;;  %s5778_s15 = sld [smem:[#allocation12 + $0x85]] }
 0x32d   : > { %v1846_v20 = vmul.f32 %v1844_v47, %v4437_v54  ;;  %v1956_v19 = vstv %s5601_s14  ;;  %v727_v16 = vadd.f32 %v725_v2, %v615_v41  ;;  %v837_v45 = vmul.f32 %v836_v61, %v4713_v32  ;;  %s5792_s29 = sld [smem:[#allocation12 + $0x2c]] }
 0x32e   : > { %v1953_v27 = vadd.f32 %v1951_v22, %v1841_v25  ;;  %v1512_v29 = vadd.f32 %v1510_v6, %v1400_v21  ;;  %v949_v51 = vmul.f32 %v948_v18, %v4747_v39  ;;  %v6402_v62 = vstv %s5618_s11  ;;  %s5797_s21 = sld [smem:[#allocation12 + $0x8e]] }
 0x32f   : > { %v839_v31 = vadd.f32 %v837_v45, %v727_v16  ;;  %v512_v48 = vmul.f32 %v6402_v62, %v3946_v59  ;;  %v618_v9 = vstv %s5626_s16  ;;  %v730_v61 = vstv %s5633_s6  ;;  %s5811_s1 = sld [smem:[#allocation12 + $0x35]]  ;;  %s7160_s16 = smov 112  }
 0x330   : > { %v2065_v41 = vadd.f32 %v2063_v36, %v1953_v27  ;;  %v1624_v22 = vadd.f32 %v1622_v46, %v1512_v29  ;;  %v2068_v6 = vstv %s5609_s30  ;;  %v620_v2 = vmul.f32 %v618_v9, %v3948_v35  ;;  %s5820_s7 = sld [smem:[#allocation12 + $0x3e]] }
 0x331   : > { %v2180_v18 = vstv %s5639_s2  ;;  %v951_v25 = vadd.f32 %v949_v51, %v839_v31  ;;  %v1061_v21 = vmul.f32 %v1060_v37, %v4781_v1  ;;  %v842_v16 = vstv %s5648_s23  ;;  %s5829_s27 = sld [smem:[#allocation12 + $0x47]]  ;;  %s7161_s23 = smov 111  }
 0x332   : > { %v2177_v45 = vadd.f32 %v2175_v63, %v2065_v41  ;;  %v1736_v62 = vadd.f32 %v1734_v30, %v1624_v22  ;;  %v622_v36 = vadd.f32 %v620_v2, %v512_v48  ;;  %v732_v46 = vmul.f32 %v730_v61, %v3950_v43  ;;  %s5839_s17 = sld [smem:[#allocation12 + $0x50]] }
 0x333   : > { %v1958_v27 = vmul.f32 %v1956_v19, %v4483_v56  ;;  %v1063_v29 = vadd.f32 %v1061_v21, %v951_v25  ;;  %v1173_v37 = vmul.f32 %v1172_v5, %v4812_v14  ;;  %v954_v51 = vstv %s5661_s10  ;;  %s5849_s22 = sld [smem:[#allocation12 + $0x59]] }
 0x334   : > { %2237 = vrot.lane.b32.xlu0 %v2177_v45, %s7157_s5  ;;  %v1848_v63 = vadd.f32 %v1846_v20, %v1736_v62  ;;  %v2070_v30 = vmul.f32 %v2068_v6, %v4543_v38  ;;  %v734_v31 = vadd.f32 %v732_v46, %v622_v36  ;;  %v844_v48 = vmul.f32 %v842_v16, %v3952_v13  ;;  %s5862_s14 = sld [smem:[#allocation12 + $0x62]] }
 0x335   : > { %v2182_v5 = vmul.f32 %v2180_v18, %v4585_v7  ;;  %v1175_v41 = vadd.f32 %v1173_v37, %v1063_v29  ;;  %v1285_v22 = vmul.f32 %v1284_v3, %v4846_v53  ;;  %v1066_v20 = vstv %s5676_s3  ;;  %s5872_s30 = sld [smem:[#allocation12 + $0x6b]] }
 0x336   : > { %v1960_v62 = vadd.f32 %v1958_v27, %v1848_v63  ;;  %v1397_v2 = vmul.f32 %v1396_v0, %v4883_v8  ;;  %v846_v25 = vadd.f32 %v844_v48, %v734_v31  ;;  %v956_v21 = vmul.f32 %v954_v51, %v3956_v10  ;;  %s5888_s6 = sld [smem:[#allocation12 + $0x7d]] }
 0x337   : > { %v1287_v45 = vadd.f32 %v1285_v22, %v1175_v41  ;;  %v1509_v36 = vmul.f32 %v1508_v57, %v4914_v49  ;;  %v1178_v3 = vstv %s5682_s9  ;;  %v1290_v46 = vstv %s5689_s12  ;;  %s5896_s2 = sld [smem:[#allocation12 + $0x86]] }
 0x338   : > { %v2072_v29 = vadd.f32 %v2070_v30, %v1960_v62  ;;  %v1621_v27 = vmul.f32 %v1620_v12, %v4948_v40  ;;  %v958_v37 = vadd.f32 %v956_v21, %v846_v25  ;;  %v1068_v0 = vmul.f32 %v1066_v20, %v4071_v24  ;;  %s5906_s5 = sld [smem:[#allocation12 + $0x8f]] }
 0x339   : > { %v1399_v63 = vadd.f32 %v1397_v2, %v1287_v45  ;;  %v1733_v31 = vmul.f32 %v1732_v23, %v4986_v15  ;;  %v1845_v57 = vmul.f32 %v1844_v47, %v5036_v28  ;;  %v1957_v30 = vmul.f32 %v1956_v19, %v5066_v60  ;;  %s2436_s10 = sld [smem:[#allocation12 + $0x4]] }
 0x33a   : > { %v2184_v12 = vadd.f32 %v2182_v5, %v2072_v29  ;;  %v1070_v48 = vadd.f32 %v1068_v0, %v958_v37  ;;  %v1180_v41 = vmul.f32 %v1178_v3, %v4136_v52  ;;  %v1292_v22 = vmul.f32 %v1290_v46, %v4174_v44  ;;  %s2455_s3 = sld [smem:[#allocation12 + $0xd]] }
 0x33b   : > { %v1511_v23 = vadd.f32 %v1509_v36, %v1399_v63  ;;  %v1402_v47 = vstv %s5698_s8  ;;  %v7158_v19 = vstv %s5618_s11  ;;  %v619_v62 = vmul.f32 %v618_v9, %v4650_v11  ;;  %s5879_s11 = sld [smem:[#allocation12 + $0x74]] }
 0x33c   : > { %v511_v5 = vmul.f32 %v7158_v19, %v4637_v50  ;;  %2249 = vrot.lane.b32.xlu1 %v2184_v12, %s7159_s20  ;;  %v1182_v2 = vadd.f32 %v1180_v41, %v1070_v48  ;;  %v1514_v25 = vstv %s5703_s13  ;;  %v1626_v21 = vstv %s5710_s4  ;;  %s2474_s9 = sld [smem:[#allocation12 + $0x16]] }
 0x33d   : > { %v1738_v45 = vstv %s5719_s28  ;;  %v1623_v36 = vadd.f32 %v1621_v27, %v1511_v23  ;;  %v1850_v29 = vstv %s5728_s25  ;;  %v731_v9 = vmul.f32 %v730_v61, %v4682_v17  ;;  %s2493_s12 = sld [smem:[#allocation12 + $0x1f]] }
 0x33e   : > { %v621_v37 = vadd.f32 %v619_v62, %v511_v5  ;;  %v2069_v0 = vmul.f32 %v2068_v6, %v5095_v58  ;;  %v2181_v63 = vmul.f32 %v2180_v18, %v5125_v34  ;;  %v1294_v12 = vadd.f32 %v1292_v22, %v1182_v2  ;;  %s2512_s8 = sld [smem:[#allocation12 + $0x28]] }
 0x33f   : > { %v1404_v27 = vmul.f32 %v1402_v47, %v4207_v55  ;;  %v1735_v48 = vadd.f32 %v1733_v31, %v1623_v36  ;;  %v1516_v41 = vmul.f32 %v1514_v25, %v4235_v42  ;;  %v843_v6 = vmul.f32 %v842_v16, %v4713_v32  ;;  %s2531_s13 = sld [smem:[#allocation12 + $0x31]] }
 0x340   : > { %v733_v61 = vadd.f32 %v731_v9, %v621_v37  ;;  %v1628_v22 = vmul.f32 %v1626_v21, %v4286_v33  ;;  %v1740_v23 = vmul.f32 %v1738_v45, %v4367_v26  ;;  %v1852_v31 = vmul.f32 %v1850_v29, %v4437_v54  ;;  %s2550_s4 = sld [smem:[#allocation12 + $0x3a]] }
 0x341   : > { %v1406_v18 = vadd.f32 %v1404_v27, %v1294_v12  ;;  %v1847_v19 = vadd.f32 %v1845_v57, %v1735_v48  ;;  %v955_v16 = vmul.f32 %v954_v51, %v4747_v39  ;;  %v1067_v62 = vmul.f32 %v1066_v20, %v4781_v1  ;;  %s2569_s28 = sld [smem:[#allocation12 + $0x43]] }
 0x342   : > { %v845_v5 = vadd.f32 %v843_v6, %v733_v61  ;;  %v514_v36 = vstv %s5745_s19  ;;  %v624_v37 = vstv %s5754_s24  ;;  %v736_v9 = vstv %s5762_s26  ;;  %s2588_s25 = sld [smem:[#allocation12 + $0x4c]] }
 0x343   : > { %v1518_v2 = vadd.f32 %v1516_v41, %v1406_v18  ;;  %v1959_v12 = vadd.f32 %v1957_v30, %v1847_v19  ;;  %v516_v57 = vmul.f32 %v514_v36, %v3946_v59  ;;  %v626_v48 = vmul.f32 %v624_v37, %v3948_v35  ;;  %s2607_s19 = sld [smem:[#allocation12 + $0x55]] }
 0x344   : > { %v957_v27 = vadd.f32 %v955_v16, %v845_v5  ;;  %v1962_v51 = vstv %s5765_s18  ;;  %v1179_v20 = vmul.f32 %v1178_v3, %v4812_v14  ;;  %v848_v41 = vstv %s5775_s0  ;;  %s2626_s24 = sld [smem:[#allocation12 + $0x5e]] }
 0x345   : > { %v1630_v61 = vadd.f32 %v1628_v22, %v1518_v2  ;;  %v2071_v6 = vadd.f32 %v2069_v0, %v1959_v12  ;;  %v628_v18 = vadd.f32 %v626_v48, %v516_v57  ;;  %v738_v19 = vmul.f32 %v736_v9, %v3950_v43  ;;  %s2645_s26 = sld [smem:[#allocation12 + $0x67]] }
 0x346   : > { %v1069_v30 = vadd.f32 %v1067_v62, %v957_v27  ;;  %v2074_v22 = vstv %s5778_s15  ;;  %v1291_v16 = vmul.f32 %v1290_v46, %v4846_v53  ;;  %v960_v3 = vstv %s5792_s29  ;;  %s2664_s18 = sld [smem:[#allocation12 + $0x70]] }
 0x347   : > { %v1742_v5 = vadd.f32 %v1740_v23, %v1630_v61  ;;  %v2183_v2 = vadd.f32 %v2181_v63, %v2071_v6  ;;  %v740_v12 = vadd.f32 %v738_v19, %v628_v18  ;;  %v850_v62 = vmul.f32 %v848_v41, %v3952_v13  ;;  %s2702_s0 = sld [smem:[#allocation12 + $0x82]] }
 0x348   : > { %v1181_v0 = vadd.f32 %v1179_v20, %v1069_v30  ;;  %v1964_v23 = vmul.f32 %v1962_v51, %v4483_v56  ;;  %v2186_v57 = vstv %s5797_s21  ;;  %v1072_v46 = vstv %s5811_s1  ;;  %s2721_s15 = sld [smem:[#allocation12 + $0x8b]] }
 0x349   : > { %v1854_v27 = vadd.f32 %v1852_v31, %v1742_v5  ;;  %2247 = vrot.lane.b32.xlu0 %v2183_v2, %s7159_s20  ;;  %v1403_v48 = vmul.f32 %v1402_v47, %v4883_v8  ;;  %v852_v61 = vadd.f32 %v850_v62, %v740_v12  ;;  %v962_v31 = vmul.f32 %v960_v3, %v3956_v10  ;;  %s2683_s20 = sld [smem:[#allocation12 + $0x79]] }
 0x34a   : > { %v1293_v63 = vadd.f32 %v1291_v16, %v1181_v0  ;;  %v2076_v6 = vmul.f32 %v2074_v22, %v4543_v38  ;;  %v1184_v30 = vstv %s5820_s7  ;;  %v1515_v19 = vmul.f32 %v1514_v25, %v4914_v49  ;;  %s6004_s29 = sld [smem:[#allocation2]] }
 0x34b   : > { %v1966_v20 = vadd.f32 %v1964_v23, %v1854_v27  ;;  %v964_v5 = vadd.f32 %v962_v31, %v852_v61  ;;  %v1074_v47 = vmul.f32 %v1072_v46, %v4071_v24  ;;  %v2188_v2 = vmul.f32 %v2186_v57, %v4585_v7  ;;  %s7162_s21 = sld [smem:[#allocation23_spill]] }
 0x34c   : > { %v1405_v18 = vadd.f32 %v1403_v48, %v1293_v63  ;;  %v1296_v0 = vstv %s5829_s27  ;;  %v1627_v62 = vmul.f32 %v1626_v21, %v4948_v40  ;;  %v1186_v25 = vmul.f32 %v1184_v30, %v4136_v52  ;;  %s7163_s1 = sld [smem:[#allocation28_spill]] }
 0x34d   : > { %v2078_v16 = vadd.f32 %v2076_v6, %v1966_v20  ;;  %v1076_v27 = vadd.f32 %v1074_v47, %v964_v5  ;;  %v1408_v63 = vstv %s5839_s17  ;;  %v515_v48 = vmul.f32 %v514_v36, %v4637_v50  ;;  %s7164_s7 = sld [smem:[#allocation26_spill]] }
 0x34e   : > { %v1517_v12 = vadd.f32 %v1515_v19, %v1405_v18  ;;  %v1739_v31 = vmul.f32 %v1738_v45, %v4986_v15  ;;  %v1298_v21 = vmul.f32 %v1296_v0, %v4174_v44  ;;  %v1520_v6 = vstv %s5849_s22 }
 0x34f   : > { %v2190_v23 = vadd.f32 %v2188_v2, %v2078_v16  ;;  %v1188_v20 = vadd.f32 %v1186_v25, %v1076_v27  ;;  %v625_v18 = vmul.f32 %v624_v37, %v4650_v11  ;;  %v1851_v36 = vmul.f32 %v1850_v29, %v5036_v28 }
 0x350   : > { %v1629_v61 = vadd.f32 %v1627_v62, %v1517_v12  ;;  %v1410_v45 = vmul.f32 %v1408_v63, %v4207_v55  ;;  %v1632_v47 = vstv %s5862_s14  ;;  %v737_v2 = vmul.f32 %v736_v9, %v4682_v17 }
 0x351   : > { %2259 = vrot.lane.b32.xlu1 %v2190_v23, %s7160_s16  ;;  %v1300_v5 = vadd.f32 %v1298_v21, %v1188_v20  ;;  %v627_v16 = vadd.f32 %v625_v18, %v515_v48  ;;  %v1963_v37 = vmul.f32 %v1962_v51, %v5066_v60  ;;  %v1522_v29 = vmul.f32 %v1520_v6, %v4235_v42  ;;  %s2732_s27 = sshll.u32 %s7162_s21, 8 }
 0x352   : > { %v1741_v19 = vadd.f32 %v1739_v31, %v1629_v61  ;;  %v1744_v27 = vstv %s5872_s30  ;;  %v849_v23 = vmul.f32 %v848_v41, %v4713_v32  ;;  %v2075_v9 = vmul.f32 %v2074_v22, %v5095_v58  ;;  %s7165_s17 = sshll.u32 %s7163_s1, 4 }
 0x353   : > { %v1412_v62 = vadd.f32 %v1410_v45, %v1300_v5  ;;  %v739_v25 = vadd.f32 %v737_v2, %v627_v16  ;;  %v1634_v51 = vmul.f32 %v1632_v47, %v4286_v33  ;;  %v1856_v31 = vstv %s5879_s11  ;;  %s322_s22 = scalar_lea.vmem [#allocation13], %s7165_s17  ;;  %p7167_p9 = scmp.ne.s32.totalorder %s7164_s7, 0 }
 0x354   : > { %v1853_v12 = vadd.f32 %v1851_v36, %v1741_v19  ;;  %v961_v21 = vmul.f32 %v960_v3, %v4747_v39  ;;  %v2187_v19 = vmul.f32 %v2186_v57, %v5125_v34  ;;  %v1746_v41 = vmul.f32 %v1744_v27, %v4367_v26  ;;  %s2297_s14 = sshll.u32 %s322_s22, 4  ;;  %s2298_s14 = int_to_ptr.vmem [resolvable:$true] %s2297_s14 }
 0x355   : > { %v1524_v61 = vadd.f32 %v1522_v29, %v1412_v62  ;;  %v851_v20 = vadd.f32 %v849_v23, %v739_v25  ;;  %v1968_v5 = vstv %s5888_s6  ;;  %v1073_v22 = vmul.f32 %v1072_v46, %v4781_v1 }
 0x356   : > { %v1965_v48 = vadd.f32 %v1963_v37, %v1853_v12  ;;  %v1858_v12 = vmul.f32 %v1856_v31, %v4437_v54  ;;  %v2080_v37 = vstv %s5896_s2  ;;  %v1185_v3 = vmul.f32 %v1184_v30, %v4812_v14  ;;  %s2283_s2 = scalar_lea.sflag [#allocation5], %s7163_s1 }
 0x357   : > { %v1636_v36 = vadd.f32 %v1634_v51, %v1524_v61  ;;  %v963_v45 = vadd.f32 %v961_v21, %v851_v20  ;;  %v1970_v57 = vmul.f32 %v1968_v5, %v4483_v56  ;;  %v2192_v25 = vstv %s5906_s5  ;;  %s2947_s5 = scalar_lea.vmem %s2298_s14, 256 }
 0x358   : > { %v2077_v18 = vadd.f32 %v2075_v9, %v1965_v48  ;;  %v1297_v48 = vmul.f32 %v1296_v0, %v4846_v53  ;;  %v2082_v46 = vmul.f32 %v2080_v37, %v4543_v38  ;;  %v1409_v51 = vmul.f32 %v1408_v63, %v4883_v8  ;;  %p2948_p11 = scmp.ne.s32.totalorder %s2298_s14, %s2947_s5 }
 0x359   : > { %v1748_v2 = vadd.f32 %v1746_v41, %v1636_v36  ;;  %v1075_v62 = vadd.f32 %v1073_v22, %v963_v45  ;;  %v2194_v21 = vmul.f32 %v2192_v25, %v4585_v7  ;;  %v1521_v30 = vmul.f32 %v1520_v6, %v4914_v49 }
 0x35a   : > { %v2189_v16 = vadd.f32 %v2187_v19, %v2077_v18  ;;  %v1633_v41 = vmul.f32 %v1632_v47, %v4948_v40  ;;  %v1745_v0 = vmul.f32 %v1744_v27, %v4986_v15  ;;  %v1969_v63 = vmul.f32 %v1968_v5, %v5066_v60  ;;  %p2949_p10 = pnand %p2948_p11, %p7167_p9 }
 0x35b   : > { %v1860_v29 = vadd.f32 %v1858_v12, %v1748_v2  ;;  %v1187_v23 = vadd.f32 %v1185_v3, %v1075_v62  ;;  %v2081_v62 = vmul.f32 %v2080_v37, %v5095_v58  ;;  %v2193_v6 = vmul.f32 %v2192_v25, %v5125_v34 }
 0x35c   : > { %2257 = vrot.lane.b32.xlu0 %v2189_v16, %s7160_s16  ;;  %v1857_v16 = vmul.f32 %v1856_v31, %v5036_v28  ;;  %v498_v47 = vstv %s2436_s10  ;;  %v600_v27 = vstv %s2455_s3  ;;  %s7166_s16 = sld [smem:[#allocation188_spill]]  ;;  %p2950_p12 = pneg %p2949_p10 }
 0x35d   : > { %v1972_v9 = vadd.f32 %v1970_v57, %v1860_v29  ;;  %v1299_v61 = vadd.f32 %v1297_v48, %v1187_v23  ;;  %v499_v31 = vmul.f32 %v498_v47, %v4637_v50  ;;  %v500_v57 = vmul.f32 %v498_v47, %v3946_v59 }
 0x35e   : > { %v601_v5 = vmul.f32 %v600_v27, %v4650_v11  ;;  %v602_v37 = vmul.f32 %v600_v27, %v3948_v35  ;;  %v712_v23 = vstv %s2474_s9 }
 0x35f   : > { %v2084_v20 = vadd.f32 %v2082_v46, %v1972_v9  ;;  %v1411_v18 = vadd.f32 %v1409_v51, %v1299_v61  ;;  %v713_v9 = vmul.f32 %v712_v23, %v4682_v17  ;;  %v714_v46 = vmul.f32 %v712_v23, %v3950_v43 }
 0x360   : > { %v603_v25 = vadd.f32 %v601_v5, %v499_v31  ;;  %v604_v48 = vadd.f32 %v602_v37, %v500_v57  ;;  %v824_v61 = vstv %s2493_s12  ;;  %v1608_v57 = vstv %s2626_s24 }
 0x361   : > { %v2196_v19 = vadd.f32 %v2194_v21, %v2084_v20  ;;  %v1523_v36 = vadd.f32 %v1521_v30, %v1411_v18  ;;  %v825_v50 = vmul.f32 %v824_v61, %v4713_v32  ;;  %v826_v59 = vmul.f32 %v824_v61, %v3952_v13 }
 0x362   : > { %v715_v51 = vadd.f32 %v713_v9, %v603_v25  ;;  %v716_v20 = vadd.f32 %v714_v46, %v604_v48  ;;  %v936_v21 = vstv %s2512_s8  ;;  %v1609_v23 = vmul.f32 %v1608_v57, %v4948_v40  ;;  %s6017_s6 = scalar_lea.hbm %s7166_s16, %s2732_s27 }
 0x363   : > { %2269 = vrot.lane.b32.xlu1 %v2196_v19, %s7161_s23  ;;  %v1635_v45 = vadd.f32 %v1633_v41, %v1523_v36  ;;  %v937_v18 = vmul.f32 %v936_v21, %v4747_v39  ;;  %v938_v30 = vmul.f32 %v936_v21, %v3956_v10  ;;  %v1048_v19 = vstv %s2531_s13 }
 0x364   : > { %v827_v11 = vadd.f32 %v825_v50, %v715_v51  ;;  %v828_v35 = vadd.f32 %v826_v59, %v716_v20  ;;  %v1049_v36 = vmul.f32 %v1048_v19, %v4781_v1  ;;  %v1050_v41 = vmul.f32 %v1048_v19, %v4071_v24  ;;  %v2200_v1 = vpop.permute.xlu1 %2199 }
 0x365   : > { %v1747_v22 = vadd.f32 %v1745_v0, %v1635_v45  ;;  %v1160_v45 = vstv %s2550_s4  ;;  %v1720_v25 = vstv %s2645_s26  ;;  %v1832_v61 = vstv %s2664_s18 }
 0x366   : > { %v939_v17 = vadd.f32 %v937_v18, %v827_v11  ;;  %v940_v43 = vadd.f32 %v938_v30, %v828_v35  ;;  %v1161_v0 = vmul.f32 %v1160_v45, %v4812_v14  ;;  %v1833_v50 = vmul.f32 %v1832_v61, %v5036_v28 }
 0x367   : > { %v1859_v2 = vadd.f32 %v1857_v16, %v1747_v22  ;;  %v1162_v22 = vmul.f32 %v1160_v45, %v4136_v52  ;;  %v1272_v16 = vstv %s2569_s28  ;;  %v1834_v40 = vmul.f32 %v1832_v61, %v4437_v54 }
 0x368   : > { %v1051_v32 = vadd.f32 %v1049_v36, %v939_v17  ;;  %v1052_v13 = vadd.f32 %v1050_v41, %v940_v43  ;;  %v2210_v31 = vpop.permute.xlu1 %2209  ;;  %v1944_v21 = vstv %s2683_s20  ;;  %v2056_v30 = vstv %s2702_s0 }
 0x369   : > { %v1971_v12 = vadd.f32 %v1969_v63, %v1859_v2  ;;  %v1273_v2 = vmul.f32 %v1272_v16, %v4846_v53  ;;  %v1274_v63 = vmul.f32 %v1272_v16, %v4174_v44  ;;  %v1945_v18 = vmul.f32 %v1944_v21, %v5066_v60  ;;  %v2833_v16 = vld [vmem:[#allocation7 + $0x8] sm:$0xff] }
 0x36a   : > { %v1163_v39 = vadd.f32 %v1161_v0, %v1051_v32  ;;  %v1164_v10 = vadd.f32 %v1162_v22, %v1052_v13  ;;  %v2057_v36 = vmul.f32 %v2056_v30, %v5095_v58  ;;  %v2058_v28 = vmul.f32 %v2056_v30, %v4543_v38  ;;  %v2832_v38 = vld [vmem:[#allocation7] sm:$0xff] }
 0x36b   : > { %v2083_v3 = vadd.f32 %v2081_v62, %v1971_v12  ;;  %v1384_v12 = vstv %s2588_s25  ;;  %v2168_v54 = vstv %s2721_s15 }
 0x36c   : > { %v1275_v24 = vadd.f32 %v1273_v2, %v1163_v39  ;;  %v1276_v62 = vadd.f32 %v1274_v63, %v1164_v10  ;;  %v1386_v14 = vmul.f32 %v1384_v12, %v4207_v55  ;;  %v2169_v0 = vmul.f32 %v2168_v54, %v5125_v34 }
 0x36d   : > { %v2195_v29 = vadd.f32 %v2193_v6, %v2083_v3  ;;  %v2198_v3 = vpop.permute.xlu0 %2197  ;;  %v1385_v6 = vmul.f32 %v1384_v12, %v4883_v8  ;;  %v1610_v8 = vmul.f32 %v1608_v57, %v4286_v33  ;;  %v2170_v58 = vmul.f32 %v2168_v54, %v4585_v7 }
 0x36e   : > { %v1388_v47 = vadd.f32 %v1386_v14, %v1276_v62  ;;  %v2201_v41 = vsel %vm332_vm1, %v2198_v3, %v2200_v1  ;;  %v2202_v45 = vsel %vm332_vm1, %v2200_v1, %v2198_v3  ;;  %v2834_v62 = vld [vmem:[#allocation7 + $0x10] sm:$0xff] }
 0x36f   : > { %2267 = vrot.lane.b32.xlu0 %v2195_v29, %s7161_s23  ;;  %v1496_v29 = vstv %s2607_s19  ;;  %v1387_v52 = vadd.f32 %v1385_v6, %v1275_v24  ;;  %v2203_v22 = vmul.f32 %v2832_v38, %v2202_v45  ;;  %v2204_v39 = vmul.f32 %v2833_v16, %v2201_v41  ;;  %v2835_v6 = vld [vmem:[#allocation7 + $0x18] sm:$0xff]  ;;  %s3040_s23 = smov [#allocation13]  }
 0x370   : > { %v1497_v27 = vmul.f32 %v1496_v29, %v4914_v49  ;;  %v1498_v53 = vmul.f32 %v1496_v29, %v4235_v42  ;;  %v1721_v49 = vmul.f32 %v1720_v25, %v4986_v15  ;;  %v1722_v42 = vmul.f32 %v1720_v25, %v4367_v26  ;;  %v2839_v25 = vld [vmem:[#allocation7 + $0x38] sm:$0xff]  ;;  %s2951_s10 = sshll.u32 %s3040_s23, 4  ;;  %s2952_s10 = int_to_ptr.vmem [resolvable:$false] %s2951_s10 }
 0x371   : > { %v2208_v44 = vpop.permute.xlu0 %2207  ;;  %v1946_v15 = vmul.f32 %v1944_v21, %v4483_v56  ;;  %s2953_s3 = scalar_lea.vmem %s2952_s10, 512  ;;  %p2954_p8 = scmp.lt.s32.totalorder %s2298_s14, %s2952_s10 }
 0x372   : > { %v1499_v5 = vadd.f32 %v1497_v27, %v1387_v52  ;;  %v1500_v37 = vadd.f32 %v1498_v53, %v1388_v47  ;;  %v2211_v56 = vsel %vm343_vm0, %v2208_v44, %v2210_v31  ;;  %v2212_v13 = vsel %vm343_vm0, %v2210_v31, %v2208_v44  ;;  %v2836_v47 = vld [vmem:[#allocation7 + $0x20] sm:$0xff]  ;;  %v2837_v53 = vld [vmem:[#allocation7 + $0x28] sm:$0xff]  ;;  %p2955_p5 = scmp.lt.s32.totalorder %s2953_s3, %s2947_s5 }
 0x373   : > { %v2213_v3 = vmul.f32 %v2834_v62, %v2212_v13  ;;  %v2214_v34 = vmul.f32 %v2835_v6, %v2211_v56 }
 0x374   : > { %v1611_v55 = vadd.f32 %v1609_v23, %v1499_v5  ;;  %v1612_v48 = vadd.f32 %v1610_v8, %v1500_v37  ;;  %v2220_v9 = vpop.permute.xlu1 %2219  ;;  %v2838_v23 = vld [vmem:[#allocation7 + $0x30] sm:$0xff]  ;;  %p2956_p7 = por %p2955_p5, %p2954_p8 }
 0x376   : > { %v1723_v51 = vadd.f32 %v1721_v49, %v1611_v55  ;;  %v1724_v20 = vadd.f32 %v1722_v42, %v1612_v48  ;;  %p2957_p1 = pnand %p2956_p7, %p2950_p12 }
 0x378   : > { %v1835_v11 = vadd.f32 %v1833_v50, %v1723_v51  ;;  %v1836_v35 = vadd.f32 %v1834_v40, %v1724_v20  ;;  %v2840_v51 = vld [vmem:[#allocation7 + $0x50] sm:$0xff]  ;;  %v2841_v50 = vld [vmem:[#allocation7 + $0x58] sm:$0xff] }
 0x37a   : > { %v1947_v26 = vadd.f32 %v1945_v18, %v1835_v11  ;;  %v1948_v19 = vadd.f32 %v1946_v15, %v1836_v35  ;;  %v2842_v35 = vld [vmem:[#allocation7 + $0x60] sm:$0xff]  ;;  %v2843_v15 = vld [vmem:[#allocation7 + $0x68] sm:$0xff] }
 0x37c   : > { %v2059_v32 = vadd.f32 %v2057_v36, %v1947_v26  ;;  %v2060_v60 = vadd.f32 %v2058_v28, %v1948_v19  ;;  %v2845_v36 = vld [vmem:[#allocation7 + $0x78] sm:$0xff] }
 0x37e   : > { %v2171_v1 = vadd.f32 %v2169_v0, %v2059_v32  ;;  %v2172_v24 = vadd.f32 %v2170_v58, %v2060_v60  ;;  %v2846_v58 = vld [vmem:[#allocation7 + $0x80] sm:$0xff] }
 0x37f   : > { %v2218_v46 = vpop.permute.xlu0 %2217 }
 0x380   : > { %v2221_v63 = vsel %vm355_vm2, %v2218_v46, %v2220_v9  ;;  %v2222_v12 = vsel %vm355_vm2, %v2220_v9, %v2218_v46  ;;  %v2205_v29 = vadd.f32 %v2203_v22, %v2171_v1  ;;  %v2206_v52 = vadd.f32 %v2204_v39, %v2172_v24  ;;  %v2847_v22 = vld [vmem:[#allocation7 + $0x88] sm:$0xff] }
 0x381   : > { %v2223_v27 = vmul.f32 %v2836_v47, %v2222_v12  ;;  %v2224_v31 = vmul.f32 %v2837_v53, %v2221_v63  ;;  %v2277_v39 = vstv %s6004_s29 }
 0x382   : > { %v2215_v5 = vadd.f32 %v2213_v3, %v2205_v29  ;;  %v2216_v37 = vadd.f32 %v2214_v34, %v2206_v52 }
 0x384   : > { %v2225_v42 = vadd.f32 %v2223_v27, %v2215_v5  ;;  %v2226_v61 = vadd.f32 %v2224_v31, %v2216_v37 }
 0x387   : > { %v2230_v59 = vpop.permute.xlu1 %2229 }
 0x394   : > { %v2228_v33 = vpop.permute.xlu0 %2227 }
 0x395   : > { %v2231_v7 = vsel %vm367_vm3, %v2228_v33, %v2230_v59  ;;  %v2232_v14 = vsel %vm367_vm3, %v2230_v59, %v2228_v33 }
 0x396   : > { %v2233_v8 = vmul.f32 %v2838_v23, %v2232_v14  ;;  %v2234_v55 = vmul.f32 %v2839_v25, %v2231_v7 }
 0x398   : > { %v2235_v21 = vadd.f32 %v2233_v8, %v2225_v42  ;;  %v2236_v11 = vadd.f32 %v2234_v55, %v2226_v61 }
 0x39b   : > { %v2240_v17 = vpop.permute.xlu1 %2239 }
 0x3a6   : > { %v2238_v43 = vpop.permute.xlu0 %2237 }
 0x3a7   : > { %v2241_v44 = vsel %vm379_vm4, %v2238_v43, %v2240_v17  ;;  %v2242_v57 = vsel %vm379_vm4, %v2240_v17, %v2238_v43  ;;  %v2844_v17 = vld [vmem:[#allocation7 + $0x70] sm:$0xff] }
 0x3a8   : > { %v2243_v20 = vmul.f32 %v2840_v51, %v2241_v44  ;;  %v2244_v40 = vmul.f32 %v2841_v50, %v2242_v57 }
 0x3aa   : > { %v2245_v26 = vadd.f32 %v2243_v20, %v2235_v21  ;;  %v2246_v19 = vadd.f32 %v2244_v40, %v2236_v11 }
 0x3ae   : > { %v2250_v10 = vpop.permute.xlu1 %2249 }
 0x3bb   : > { %v2248_v2 = vpop.permute.xlu0 %2247 }
 0x3bc   : > { %v2251_v46 = vsel %vm391_vm5, %v2248_v2, %v2250_v10  ;;  %v2252_v49 = vsel %vm391_vm5, %v2250_v10, %v2248_v2 }
 0x3bd   : > { %v2253_v18 = vmul.f32 %v2842_v35, %v2251_v46  ;;  %v2254_v30 = vmul.f32 %v2843_v15, %v2252_v49 }
 0x3bf   : > { %v2255_v41 = vadd.f32 %v2253_v18, %v2245_v26  ;;  %v2256_v45 = vadd.f32 %v2254_v30, %v2246_v19 }
 0x3c3   : > { %v2260_v48 = vpop.permute.xlu1 %2259 }
 0x3ce   : > { %v2258_v9 = vpop.permute.xlu0 %2257 }
 0x3cf   : > { %v2261_v59 = vsel %vm403_vm6, %v2258_v9, %v2260_v48  ;;  %v2262_v33 = vsel %vm403_vm6, %v2260_v48, %v2258_v9 }
 0x3d0   : > { %v2263_v43 = vmul.f32 %v2844_v17, %v2261_v59  ;;  %v2264_v28 = vmul.f32 %v2845_v36, %v2262_v33 }
 0x3d2   : > { %v2265_v13 = vadd.f32 %v2263_v43, %v2255_v41  ;;  %v2266_v0 = vadd.f32 %v2264_v28, %v2256_v45 }
 0x3d5   : > { %v2270_v54 = vpop.permute.xlu1 %2269 }
 0x3e1   : > { %v2268_v32 = vpop.permute.xlu0 %2267 }
 0x3e2   : > { %v2271_v60 = vsel %vm415_vm7, %v2268_v32, %v2270_v54  ;;  %v2272_v56 = vsel %vm415_vm7, %v2270_v54, %v2268_v32 }
 0x3e3   : > { %v2273_v38 = vmul.f32 %v2846_v58, %v2271_v60  ;;  %v2274_v16 = vmul.f32 %v2847_v22, %v2272_v56 }
 0x3e5   : > { %v2275_v10 = vadd.f32 %v2273_v38, %v2265_v13  ;;  %v2276_v2 = vadd.f32 %v2274_v16, %v2266_v0 }
 0x3e7   : > { %v2278_v63 = vadd.f32 %v2277_v39, %v2275_v10  ;;  %v2279_v12 = vadd.f32 %v2277_v39, %v2276_v2 }
 0x3e9   : > { %2280 = vst [vmem:[%s322_s22] sm:$0xff] %v2278_v63  ;;  %2281 = vst [vmem:[%s322_s22 + $0x8] sm:$0xff] %v2279_v12 }
 0x3ea   : > { %2960 = shalt.err (!%p2957_p1)
}
 0x3eb   : > { %s2961_s9 = scalar_lea.hbm %s6017_s6, 256  ;;  %s2965_s13 = scalar_lea.hbm %s7166_s16, 512 }
 0x3ec   : > { %p2962_p3 = scmp.ne.s32.totalorder %s6017_s6, %s2961_s9  ;;  %p2966_p13 = scmp.lt.s32.totalorder %s6017_s6, %s7166_s16 }
 0x3ed   : > { %p2967_p0 = scmp.lt.s32.totalorder %s2965_s13, %s2961_s9 }
 0x3ee   : > { %p2963_p6 = pnand %p2962_p3, %p7167_p9 }
 0x3ef   : > { %p2968_p2 = por %p2967_p0, %p2966_p13 }
 0x3f0   : > { %p2964_p4 = pneg %p2963_p6 }
 0x3f2   : > { %p2969_p11 = pnand %p2968_p2, %p2964_p4 }
 0x3f4   : > { %2972 = shalt.err (!%p2969_p11)
}
 0x3f5   : > { %2751 = dma.vmem_to_hbm [thread:$0]  (%p7167_p9), %s2298_s14, 256, %s6017_s6, %s2283_s2  }
 0x3f6 PF: > { %s7168_s25 = sld [smem:[#allocation19_spill]] }
 0x3f7   : > { %s7169_s19 = sld [smem:[#allocation27_spill]] }
 0x3f8   : > { %s7170_s24 = sld [smem:[#allocation22_spill]] }
 0x3fc   : > { %s2309_s26 = sand.u32 1, %s7168_s25  }
 0x3fd   : > { %p7171_p10 = scmp.ne.s32.totalorder %s7169_s19, 0  ;;  %s2310_s18 = scalar_lea.sflag [#allocation5], %s2309_s26 }
 0x3fe   : > { %p7172_p12 = scmp.ge.s32.totalorder %s7170_s24, 2 }
 0x400   : > { %p2771_p8 = pnand %p7172_p12, %p7171_p10 }
 0x402   : > { %p2772_p5 = pneg %p2771_p8 }
 0x404   : > { %3006 = dma.done.wait (%p2772_p5), %s2310_s18, 256  }
 0x405   : > { %3008 = vsyncadd (%p2772_p5), %s2310_s18, 4294967040  ;;  %s7173_s26 = sld [smem:[#allocation24_spill]] }
 0x406   : > { %s7174_s23 = sld [smem:[#allocation20_spill]] }
 0x407   : > { %s7175_s24 = sld [smem:[#allocation21_spill]] }
 0x408   : > { %s7176_s25 = sld [smem:[#allocation25_spill]] }
 0x40b   : > { %p23_p7 = scmp.ge.s32.totalorder %s7173_s26, 4  }
 0x40d   :  { %25 = sbr.rel (!%p23_p7) target bundleno = 16 (0x10), region = 113 }
 0x412   :  { %2315 = vsyncpa [#allocation4], 1 }
 0x413   :  { %2317 = vsyncpa [#allocation4 + $0x1], 1 }
 0x414   :  { %2318 = vsyncpa [#allocation8], 1 }
 0x415   :  { %2319 = vsyncpa [#allocation5], 1 }
 0x416   :  { %2321 = vsyncpa [#allocation5 + $0x1], 1 }
 0x417   :  { %2322 = vsyncpa [#allocation6], 1 }
 0x418   :  { %2324 = vsyncpa [#allocation6 + $0x1], 1 }
 0x419   :  { %2325 = vsyncpa [#allocation11], 1 }

</bundles_post_ra>
